<compile_context>
chip_gen: v7x
topology: tpu7x:2x2x1
jax: 0.10.0
libtpu: 0.0.40
codegen_flags: <defaults>
</compile_context>

<pallas_src>
import numpy as np
import jax
import jax.numpy as jnp
from jax import lax
from jax.experimental import pallas as pl
from jax.experimental.pallas import tpu as pltpu


# ---------------------------------------------------------------------------
# Fused forward kernel: per grid step, process a small block of `nb` images.
# Layouts carried inside the kernel (per image):
#   conv1 out  y1: (24, 240)  [h, c*24 + w]      c in 0..9
#   pooled     a1: (12, 120)  [h, c*12 + w]
#   conv2 out  y2: (8, 160)   [h, d*8  + w]      d in 0..19
#   pooled     a2: (4, 80)    [h, d*4  + w]
#   fc1        h : (1, 50),   logits: (1, 10)
# ---------------------------------------------------------------------------
def _fused_net_kernel(x_ref,
                      t1_ref, b1_ref, ce1_ref, co1_ref, re1_ref, ro1_ref,
                      t2_ref, b2_ref, ce2_ref, co2_ref, re2_ref, ro2_ref,
                      v1_ref, bf1_ref, wf2_ref, bf2_ref,
                      o_ref):
    nb = x_ref.shape[0]
    f32 = jnp.float32

    for b in range(nb):                                   # static unroll
        # ---- conv1 (1->10, k5): 28 -> 24, via 5 banded-weight matmuls ----
        y1 = b1_ref[...]                                  # (1, 240) bias row
        for ki in range(5):
            y1 = y1 + jnp.dot(x_ref[b, ki:ki + 24, :],    # (24, 28)
                              t1_ref[ki],                 # (28, 240)
                              preferred_element_type=f32)
        # y1: (24, 240)

        # ---- 2x2 maxpool + relu via 0/1 selection matmuls -> (12, 120) ----
        m1 = jnp.maximum(jnp.dot(y1, ce1_ref[...], preferred_element_type=f32),
                         jnp.dot(y1, co1_ref[...], preferred_element_type=f32))   # (24, 120)
        a1 = jnp.maximum(jnp.dot(re1_ref[...], m1, preferred_element_type=f32),
                         jnp.dot(ro1_ref[...], m1, preferred_element_type=f32))   # (12, 120)
        a1 = jnp.maximum(a1, 0.0)

        # ---- conv2 (10->20, k5): 12 -> 8 ----
        # TODO(synk): nn.Dropout2d(training=True) not applied -> inference-mode identity.
        y2 = b2_ref[...]                                  # (1, 160) bias row
        for ki in range(5):
            y2 = y2 + jnp.dot(a1[ki:ki + 8, :],           # (8, 120)
                              t2_ref[ki],                 # (120, 160)
                              preferred_element_type=f32)
        # y2: (8, 160)

        # ---- 2x2 maxpool + relu -> (4, 80) ----
        m2 = jnp.maximum(jnp.dot(y2, ce2_ref[...], preferred_element_type=f32),
                         jnp.dot(y2, co2_ref[...], preferred_element_type=f32))   # (8, 80)
        a2 = jnp.maximum(jnp.dot(re2_ref[...], m2, preferred_element_type=f32),
                         jnp.dot(ro2_ref[...], m2, preferred_element_type=f32))   # (4, 80)
        a2 = jnp.maximum(a2, 0.0)

        # ---- fc1 (320->50): torch's NCHW view(-1,320) is folded into v1 ----
        h = bf1_ref[...]                                  # (1, 50)
        for hq in range(4):
            h = h + jnp.dot(a2[hq:hq + 1, :],             # (1, 80)
                            v1_ref[hq],                   # (80, 50)
                            preferred_element_type=f32)
        h = jnp.maximum(h, 0.0)
        # TODO(synk): F.dropout(training=True) not applied -> inference-mode identity.

        # ---- fc2 (50->10) + log_softmax ----
        logits = jnp.dot(h, wf2_ref[...], preferred_element_type=f32) + bf2_ref[...]  # (1, 10)
        mx = jnp.max(logits, axis=-1, keepdims=True)
        lse = jnp.log(jnp.sum(jnp.exp(logits - mx), axis=-1, keepdims=True))
        o_ref[pl.ds(b, 1), :] = logits - mx - lse


# ---------------------------------------------------------------------------
# Host-side (tiny, batch-independent) operand preparation.
# ---------------------------------------------------------------------------
def _band(n_k, n_in, n_out):
    """B[k, w + k, w] = 1  (constant band selector)."""
    B = np.zeros((n_k, n_in, n_out), np.float32)
    for k in range(n_k):
        for w in range(n_out):
            B[k, w + k, w] = 1.0
    return B


def _pool_col_selectors(C, W):
    """Even/odd stride-2 column picks within each channel's W-wide block."""
    Wh = W // 2
    ce = np.zeros((C * W, C * Wh), np.float32)
    co = np.zeros((C * W, C * Wh), np.float32)
    for c in range(C):
        for wp in range(Wh):
            ce[c * W + 2 * wp, c * Wh + wp] = 1.0
            co[c * W + 2 * wp + 1, c * Wh + wp] = 1.0
    return ce, co


def _pool_row_selectors(H):
    Hh = H // 2
    re = np.zeros((Hh, H), np.float32)
    ro = np.zeros((Hh, H), np.float32)
    for hp in range(Hh):
        re[hp, 2 * hp] = 1.0
        ro[hp, 2 * hp + 1] = 1.0
    return re, ro


def _prepare_operands(params):
    w1 = params["conv1_w"].astype(jnp.float32)            # (10, 1, 5, 5)
    b1 = params["conv1_b"].astype(jnp.float32)            # (10,)
    w2 = params["conv2_w"].astype(jnp.float32)            # (20, 10, 5, 5)
    b2 = params["conv2_b"].astype(jnp.float32)            # (20,)
    wf1 = params["fc1_w"].astype(jnp.float32)              # (50, 320)
    bf1 = params["fc1_b"].astype(jnp.float32)              # (50,)
    wf2 = params["fc2_w"].astype(jnp.float32)               # (10, 50)
    bf2 = params["fc2_b"].astype(jnp.float32)               # (10,)

    B1 = jnp.asarray(_band(5, 28, 24))                    # (5, 28, 24)
    B2 = jnp.asarray(_band(5, 12, 8))                     # (5, 12, 8)

    # T1[ki, w+kj, c*24+w] = w1[c,0,ki,kj] ; T2[ki, ci*12+w+kj, d*8+w] = w2[d,ci,ki,kj]
    t1 = jnp.einsum('cij,jur->iucr', w1[:, 0], B1).reshape(5, 28, 240)
    t2 = jnp.einsum('dcij,jur->icudr', w2, B2).reshape(5, 120, 160)

    b1row = jnp.repeat(b1, 24).reshape(1, 240)
    b2row = jnp.repeat(b2, 8).reshape(1, 160)

    ce1, co1 = _pool_col_selectors(10, 24)
    re1, ro1 = _pool_row_selectors(24)
    ce2, co2 = _pool_col_selectors(20, 8)
    re2, ro2 = _pool_row_selectors(8)

    # fc1 weight with torch's NCHW flatten folded in: V[h, d*4+w, o] = fc1_w[o, d*16+h*4+w]
    v1 = jnp.transpose(wf1.reshape(50, 20, 4, 4), (2, 1, 3, 0)).reshape(4, 80, 50)

    return (t1, b1row,
            jnp.asarray(ce1), jnp.asarray(co1), jnp.asarray(re1), jnp.asarray(ro1),
            t2, b2row,
            jnp.asarray(ce2), jnp.asarray(co2), jnp.asarray(re2), jnp.asarray(ro2),
            v1, bf1.reshape(1, 50), wf2.T, bf2.reshape(1, 10))


def net_forward(x_nchw, params):
    n = x_nchw.shape[0]
    assert x_nchw.shape[1:] == (1, 28, 28)
    x = x_nchw.reshape(n, 28, 28).astype(jnp.float32)

    nb = 1
    for cand in (8, 4, 2):
        if n % cand == 0:
            nb = cand
            break
    grid = (n // nb,)

    (t1, b1row, ce1, co1, re1, ro1,
     t2, b2row, ce2, co2, re2, ro2,
     v1, bf1, wf2t, bf2) = _prepare_operands(params)

    def const_spec(shape):
        return pl.BlockSpec(shape, lambda i, _s=len(shape): (0,) * _s)

    return pl.pallas_call(
        _fused_net_kernel,
        out_shape=jax.ShapeDtypeStruct((n, 10), jnp.float32),
        grid=grid,
        in_specs=[
            pl.BlockSpec((nb, 28, 28), lambda i: (i, 0, 0)),
            const_spec((5, 28, 240)),    # t1
            const_spec((1, 240)),        # b1 row
            const_spec((240, 120)),      # ce1
            const_spec((240, 120)),      # co1
            const_spec((12, 24)),        # re1
            const_spec((12, 24)),        # ro1
            const_spec((5, 120, 160)),   # t2
            const_spec((1, 160)),        # b2 row
            const_spec((160, 80)),       # ce2
            const_spec((160, 80)),       # co2
            const_spec((4, 8)),          # re2
            const_spec((4, 8)),          # ro2
            const_spec((4, 80, 50)),     # v1 (fc1 + flatten)
            const_spec((1, 50)),         # fc1 bias
            const_spec((50, 10)),        # fc2 weight (transposed)
            const_spec((1, 10)),         # fc2 bias
        ],
        out_specs=pl.BlockSpec((nb, 10), lambda i: (i, 0)),
        compiler_params=pltpu.CompilerParams(
            dimension_semantics=("parallel",),
            vmem_limit_bytes=32 * 1024 * 1024,
        ),
    )(x, t1, b1row, ce1, co1, re1, ro1,
      t2, b2row, ce2, co2, re2, ro2, v1, bf1, wf2t, bf2)


# ---------------------------------------------------------------------------
# Pure-JAX reference (eval-mode PyTorch semantics) for correctness check.
# ---------------------------------------------------------------------------
def _reference_forward(x_nchw, params):
    dn = ('NCHW', 'OIHW', 'NCHW')
    y = lax.conv_general_dilated(x_nchw.astype(jnp.float32), params["conv1_w"],
                                 (1, 1), 'VALID', dimension_numbers=dn)
    y = y + params["conv1_b"][None, :, None, None]
    y = lax.reduce_window(y, -jnp.inf, lax.max, (1, 1, 2, 2), (1, 1, 2, 2), 'VALID')
    y = jnp.maximum(y, 0.0)
    y = lax.conv_general_dilated(y, params["conv2_w"], (1, 1), 'VALID',
                                 dimension_numbers=dn)
    y = y + params["conv2_b"][None, :, None, None]
    y = lax.reduce_window(y, -jnp.inf, lax.max, (1, 1, 2, 2), (1, 1, 2, 2), 'VALID')
    y = jnp.maximum(y, 0.0)
    y = y.reshape(y.shape[0], -1)
    y = jnp.maximum(y @ params["fc1_w"].T + params["fc1_b"], 0.0)
    y = y @ params["fc2_w"].T + params["fc2_b"]
    return jax.nn.log_softmax(y, axis=-1)


def init_params(key):
    ks = jax.random.split(key, 8)

    def rnd(k, shape, scale):
        return jax.random.normal(k, shape, jnp.float32) * scale

    return {
        "conv1_w": rnd(ks[0], (10, 1, 5, 5), 0.2),
        "conv1_b": rnd(ks[1], (10,), 0.1),
        "conv2_w": rnd(ks[2], (20, 10, 5, 5), 0.06),
        "conv2_b": rnd(ks[3], (20,), 0.1),
        "fc1_w": rnd(ks[4], (50, 320), 0.05),
        "fc1_b": rnd(ks[5], (50,), 0.05),
        "fc2_w": rnd(ks[6], (10, 50), 0.1),
        "fc2_b": rnd(ks[7], (10,), 0.1),
    }


if __name__ == "__main__":
    key = jax.random.PRNGKey(0)
    pkey, xkey = jax.random.split(key)
    params = init_params(pkey)
    # batch=2, single 28x28 channel (required so that the flatten yields 320)
    x = jax.random.normal(xkey, (2, 1, 28, 28), jnp.float32)

    out = jax.block_until_ready(jax.jit(net_forward)(x, params))
    ref = jax.block_until_ready(jax.jit(_reference_forward)(x, params))

    assert out.shape == (2, 10)
    assert bool(jnp.all(jnp.isfinite(out)))
    # log_softmax rows should exp-sum to ~1
    assert bool(jnp.allclose(jnp.sum(jnp.exp(out), axis=-1), 1.0, atol=1e-4))
    # match the pure-JAX (eval-mode) reference
    assert bool(jnp.allclose(out, ref, atol=1e-3, rtol=1e-3))
    print("KERNEL_OK")
</pallas_src>

<mosaic_0001>
module attributes {stable_mosaic.version = 11 : i64} {
  func.func @_fused_net_kernel(%arg0: i32, %arg1: memref<2x28x28xf32, #tpu.memory_space<vmem>>, %arg2: memref<5x28x240xf32, #tpu.memory_space<vmem>>, %arg3: memref<1x240xf32, #tpu.memory_space<vmem>>, %arg4: memref<240x120xf32, #tpu.memory_space<vmem>>, %arg5: memref<240x120xf32, #tpu.memory_space<vmem>>, %arg6: memref<12x24xf32, #tpu.memory_space<vmem>>, %arg7: memref<12x24xf32, #tpu.memory_space<vmem>>, %arg8: memref<5x120x160xf32, #tpu.memory_space<vmem>>, %arg9: memref<1x160xf32, #tpu.memory_space<vmem>>, %arg10: memref<160x80xf32, #tpu.memory_space<vmem>>, %arg11: memref<160x80xf32, #tpu.memory_space<vmem>>, %arg12: memref<4x8xf32, #tpu.memory_space<vmem>>, %arg13: memref<4x8xf32, #tpu.memory_space<vmem>>, %arg14: memref<4x80x50xf32, #tpu.memory_space<vmem>>, %arg15: memref<1x50xf32, #tpu.memory_space<vmem>>, %arg16: memref<50x10xf32, #tpu.memory_space<vmem>>, %arg17: memref<1x10xf32, #tpu.memory_space<vmem>>, %arg18: memref<2x10xf32, #tpu.memory_space<vmem>>) attributes {dimension_semantics = [#tpu.dimension_semantics<parallel>], iteration_bounds = array<i64: 1>, scalar_prefetch = 0 : i64, scratch_operands = 0 : i64, tpu.core_type = #tpu.core_type<tc>, window_params = [{transform_indices = @transform_0, window_bounds = array<i64: 2, 28, 28>}, {pipeline_mode = #tpu.pipeline_mode<synchronous>, transform_indices = @transform_1, window_bounds = array<i64: 5, 28, 240>}, {pipeline_mode = #tpu.pipeline_mode<synchronous>, transform_indices = @transform_2, window_bounds = array<i64: 1, 240>}, {pipeline_mode = #tpu.pipeline_mode<synchronous>, transform_indices = @transform_3, window_bounds = array<i64: 240, 120>}, {pipeline_mode = #tpu.pipeline_mode<synchronous>, transform_indices = @transform_4, window_bounds = array<i64: 240, 120>}, {pipeline_mode = #tpu.pipeline_mode<synchronous>, transform_indices = @transform_5, window_bounds = array<i64: 12, 24>}, {pipeline_mode = #tpu.pipeline_mode<synchronous>, transform_indices = @transform_6, window_bounds = array<i64: 12, 24>}, {pipeline_mode = #tpu.pipeline_mode<synchronous>, transform_indices = @transform_7, window_bounds = array<i64: 5, 120, 160>}, {pipeline_mode = #tpu.pipeline_mode<synchronous>, transform_indices = @transform_8, window_bounds = array<i64: 1, 160>}, {pipeline_mode = #tpu.pipeline_mode<synchronous>, transform_indices = @transform_9, window_bounds = array<i64: 160, 80>}, {pipeline_mode = #tpu.pipeline_mode<synchronous>, transform_indices = @transform_10, window_bounds = array<i64: 160, 80>}, {pipeline_mode = #tpu.pipeline_mode<synchronous>, transform_indices = @transform_11, window_bounds = array<i64: 4, 8>}, {pipeline_mode = #tpu.pipeline_mode<synchronous>, transform_indices = @transform_12, window_bounds = array<i64: 4, 8>}, {pipeline_mode = #tpu.pipeline_mode<synchronous>, transform_indices = @transform_13, window_bounds = array<i64: 4, 80, 50>}, {pipeline_mode = #tpu.pipeline_mode<synchronous>, transform_indices = @transform_14, window_bounds = array<i64: 1, 50>}, {pipeline_mode = #tpu.pipeline_mode<synchronous>, transform_indices = @transform_15, window_bounds = array<i64: 50, 10>}, {pipeline_mode = #tpu.pipeline_mode<synchronous>, transform_indices = @transform_16, window_bounds = array<i64: 1, 10>}, {transform_indices = @transform_17, window_bounds = array<i64: 2, 10>}]} {
    %c0 = arith.constant 0 : index
    %c0_0 = arith.constant 0 : index
    %0 = vector.load %arg3[%c0, %c0_0] : memref<1x240xf32, #tpu.memory_space<vmem>>, vector<1x240xf32>
    %c0_1 = arith.constant 0 : index
    %c0_2 = arith.constant 0 : index
    %c0_3 = arith.constant 0 : index
    %1 = vector.load %arg1[%c0_1, %c0_2, %c0_3] : memref<2x28x28xf32, #tpu.memory_space<vmem>>, vector<1x24x28xf32>
    %2 = vector.shape_cast %1 : vector<1x24x28xf32> to vector<24x28xf32>
    %c0_4 = arith.constant 0 : index
    %c0_5 = arith.constant 0 : index
    %c0_6 = arith.constant 0 : index
    %3 = vector.load %arg2[%c0_4, %c0_5, %c0_6] : memref<5x28x240xf32, #tpu.memory_space<vmem>>, vector<1x28x240xf32>
    %4 = vector.shape_cast %3 : vector<1x28x240xf32> to vector<28x240xf32>
    %cst = arith.constant dense<0.000000e+00> : vector<24x240xf32>
    %5 = tpu.matmul %2, %4, %cst {dimension_numbers = #tpu.dot_dimension_numbers<[1], [0], [0], [1], [0, 0, 1, 1], [], []>} : vector<24x28xf32>, vector<28x240xf32>, vector<24x240xf32> -> vector<24x240xf32>
    %6 = vector.broadcast %0 : vector<1x240xf32> to vector<24x240xf32>
    %7 = arith.addf %6, %5 : vector<24x240xf32>
    %c0_7 = arith.constant 0 : index
    %c1 = arith.constant 1 : index
    %c0_8 = arith.constant 0 : index
    %8 = vector.load %arg1[%c0_7, %c1, %c0_8] : memref<2x28x28xf32, #tpu.memory_space<vmem>>, vector<1x24x28xf32>
    %9 = vector.shape_cast %8 : vector<1x24x28xf32> to vector<24x28xf32>
    %c1_9 = arith.constant 1 : index
    %c0_10 = arith.constant 0 : index
    %c0_11 = arith.constant 0 : index
    %10 = vector.load %arg2[%c1_9, %c0_10, %c0_11] : memref<5x28x240xf32, #tpu.memory_space<vmem>>, vector<1x28x240xf32>
    %11 = vector.shape_cast %10 : vector<1x28x240xf32> to vector<28x240xf32>
    %cst_12 = arith.constant dense<0.000000e+00> : vector<24x240xf32>
    %12 = tpu.matmul %9, %11, %cst_12 {dimension_numbers = #tpu.dot_dimension_numbers<[1], [0], [0], [1], [0, 0, 1, 1], [], []>} : vector<24x28xf32>, vector<28x240xf32>, vector<24x240xf32> -> vector<24x240xf32>
    %13 = arith.addf %7, %12 : vector<24x240xf32>
    %c0_13 = arith.constant 0 : index
    %c2 = arith.constant 2 : index
    %c0_14 = arith.constant 0 : index
    %14 = vector.load %arg1[%c0_13, %c2, %c0_14] : memref<2x28x28xf32, #tpu.memory_space<vmem>>, vector<1x24x28xf32>
    %15 = vector.shape_cast %14 : vector<1x24x28xf32> to vector<24x28xf32>
    %c2_15 = arith.constant 2 : index
    %c0_16 = arith.constant 0 : index
    %c0_17 = arith.constant 0 : index
    %16 = vector.load %arg2[%c2_15, %c0_16, %c0_17] : memref<5x28x240xf32, #tpu.memory_space<vmem>>, vector<1x28x240xf32>
    %17 = vector.shape_cast %16 : vector<1x28x240xf32> to vector<28x240xf32>
    %cst_18 = arith.constant dense<0.000000e+00> : vector<24x240xf32>
    %18 = tpu.matmul %15, %17, %cst_18 {dimension_numbers = #tpu.dot_dimension_numbers<[1], [0], [0], [1], [0, 0, 1, 1], [], []>} : vector<24x28xf32>, vector<28x240xf32>, vector<24x240xf32> -> vector<24x240xf32>
    %19 = arith.addf %13, %18 : vector<24x240xf32>
    %c0_19 = arith.constant 0 : index
    %c3 = arith.constant 3 : index
    %c0_20 = arith.constant 0 : index
    %20 = vector.load %arg1[%c0_19, %c3, %c0_20] : memref<2x28x28xf32, #tpu.memory_space<vmem>>, vector<1x24x28xf32>
    %21 = vector.shape_cast %20 : vector<1x24x28xf32> to vector<24x28xf32>
    %c3_21 = arith.constant 3 : index
    %c0_22 = arith.constant 0 : index
    %c0_23 = arith.constant 0 : index
    %22 = vector.load %arg2[%c3_21, %c0_22, %c0_23] : memref<5x28x240xf32, #tpu.memory_space<vmem>>, vector<1x28x240xf32>
    %23 = vector.shape_cast %22 : vector<1x28x240xf32> to vector<28x240xf32>
    %cst_24 = arith.constant dense<0.000000e+00> : vector<24x240xf32>
    %24 = tpu.matmul %21, %23, %cst_24 {dimension_numbers = #tpu.dot_dimension_numbers<[1], [0], [0], [1], [0, 0, 1, 1], [], []>} : vector<24x28xf32>, vector<28x240xf32>, vector<24x240xf32> -> vector<24x240xf32>
    %25 = arith.addf %19, %24 : vector<24x240xf32>
    %c0_25 = arith.constant 0 : index
    %c4 = arith.constant 4 : index
    %c0_26 = arith.constant 0 : index
    %26 = vector.load %arg1[%c0_25, %c4, %c0_26] : memref<2x28x28xf32, #tpu.memory_space<vmem>>, vector<1x24x28xf32>
    %27 = vector.shape_cast %26 : vector<1x24x28xf32> to vector<24x28xf32>
    %c4_27 = arith.constant 4 : index
    %c0_28 = arith.constant 0 : index
    %c0_29 = arith.constant 0 : index
    %28 = vector.load %arg2[%c4_27, %c0_28, %c0_29] : memref<5x28x240xf32, #tpu.memory_space<vmem>>, vector<1x28x240xf32>
    %29 = vector.shape_cast %28 : vector<1x28x240xf32> to vector<28x240xf32>
    %cst_30 = arith.constant dense<0.000000e+00> : vector<24x240xf32>
    %30 = tpu.matmul %27, %29, %cst_30 {dimension_numbers = #tpu.dot_dimension_numbers<[1], [0], [0], [1], [0, 0, 1, 1], [], []>} : vector<24x28xf32>, vector<28x240xf32>, vector<24x240xf32> -> vector<24x240xf32>
    %31 = arith.addf %25, %30 : vector<24x240xf32>
    %c0_31 = arith.constant 0 : index
    %c0_32 = arith.constant 0 : index
    %32 = vector.load %arg4[%c0_31, %c0_32] : memref<240x120xf32, #tpu.memory_space<vmem>>, vector<240x120xf32>
    %cst_33 = arith.constant dense<0.000000e+00> : vector<24x120xf32>
    %33 = tpu.matmul %31, %32, %cst_33 {dimension_numbers = #tpu.dot_dimension_numbers<[1], [0], [0], [1], [0, 0, 1, 1], [], []>} : vector<24x240xf32>, vector<240x120xf32>, vector<24x120xf32> -> vector<24x120xf32>
    %c0_34 = arith.constant 0 : index
    %c0_35 = arith.constant 0 : index
    %34 = vector.load %arg5[%c0_34, %c0_35] : memref<240x120xf32, #tpu.memory_space<vmem>>, vector<240x120xf32>
    %cst_36 = arith.constant dense<0.000000e+00> : vector<24x120xf32>
    %35 = tpu.matmul %31, %34, %cst_36 {dimension_numbers = #tpu.dot_dimension_numbers<[1], [0], [0], [1], [0, 0, 1, 1], [], []>} : vector<24x240xf32>, vector<240x120xf32>, vector<24x120xf32> -> vector<24x120xf32>
    %36 = arith.maximumf %33, %35 : vector<24x120xf32>
    %c0_37 = arith.constant 0 : index
    %c0_38 = arith.constant 0 : index
    %37 = vector.load %arg6[%c0_37, %c0_38] : memref<12x24xf32, #tpu.memory_space<vmem>>, vector<12x24xf32>
    %cst_39 = arith.constant dense<0.000000e+00> : vector<12x120xf32>
    %38 = tpu.matmul %37, %36, %cst_39 {dimension_numbers = #tpu.dot_dimension_numbers<[1], [0], [0], [1], [0, 0, 1, 1], [], []>} : vector<12x24xf32>, vector<24x120xf32>, vector<12x120xf32> -> vector<12x120xf32>
    %c0_40 = arith.constant 0 : index
    %c0_41 = arith.constant 0 : index
    %39 = vector.load %arg7[%c0_40, %c0_41] : memref<12x24xf32, #tpu.memory_space<vmem>>, vector<12x24xf32>
    %cst_42 = arith.constant dense<0.000000e+00> : vector<12x120xf32>
    %40 = tpu.matmul %39, %36, %cst_42 {dimension_numbers = #tpu.dot_dimension_numbers<[1], [0], [0], [1], [0, 0, 1, 1], [], []>} : vector<12x24xf32>, vector<24x120xf32>, vector<12x120xf32> -> vector<12x120xf32>
    %41 = arith.maximumf %38, %40 : vector<12x120xf32>
    %cst_43 = arith.constant 0.000000e+00 : f32
    %42 = vector.broadcast %cst_43 : f32 to vector<12x120xf32>
    %43 = arith.maximumf %41, %42 : vector<12x120xf32>
    %c0_44 = arith.constant 0 : index
    %c0_45 = arith.constant 0 : index
    %44 = vector.load %arg9[%c0_44, %c0_45] : memref<1x160xf32, #tpu.memory_space<vmem>>, vector<1x160xf32>
    %45 = vector.extract_strided_slice %43 {offsets = [0, 0], sizes = [8, 120], strides = [1, 1]} : vector<12x120xf32> to vector<8x120xf32>
    %c0_46 = arith.constant 0 : index
    %c0_47 = arith.constant 0 : index
    %c0_48 = arith.constant 0 : index
    %46 = vector.load %arg8[%c0_46, %c0_47, %c0_48] : memref<5x120x160xf32, #tpu.memory_space<vmem>>, vector<1x120x160xf32>
    %47 = vector.shape_cast %46 : vector<1x120x160xf32> to vector<120x160xf32>
    %cst_49 = arith.constant dense<0.000000e+00> : vector<8x160xf32>
    %48 = tpu.matmul %45, %47, %cst_49 {dimension_numbers = #tpu.dot_dimension_numbers<[1], [0], [0], [1], [0, 0, 1, 1], [], []>} : vector<8x120xf32>, vector<120x160xf32>, vector<8x160xf32> -> vector<8x160xf32>
    %49 = vector.broadcast %44 : vector<1x160xf32> to vector<8x160xf32>
    %50 = arith.addf %49, %48 : vector<8x160xf32>
    %51 = vector.extract_strided_slice %43 {offsets = [1, 0], sizes = [8, 120], strides = [1, 1]} : vector<12x120xf32> to vector<8x120xf32>
    %c1_50 = arith.constant 1 : index
    %c0_51 = arith.constant 0 : index
    %c0_52 = arith.constant 0 : index
    %52 = vector.load %arg8[%c1_50, %c0_51, %c0_52] : memref<5x120x160xf32, #tpu.memory_space<vmem>>, vector<1x120x160xf32>
    %53 = vector.shape_cast %52 : vector<1x120x160xf32> to vector<120x160xf32>
    %cst_53 = arith.constant dense<0.000000e+00> : vector<8x160xf32>
    %54 = tpu.matmul %51, %53, %cst_53 {dimension_numbers = #tpu.dot_dimension_numbers<[1], [0], [0], [1], [0, 0, 1, 1], [], []>} : vector<8x120xf32>, vector<120x160xf32>, vector<8x160xf32> -> vector<8x160xf32>
    %55 = arith.addf %50, %54 : vector<8x160xf32>
    %56 = vector.extract_strided_slice %43 {offsets = [2, 0], sizes = [8, 120], strides = [1, 1]} : vector<12x120xf32> to vector<8x120xf32>
    %c2_54 = arith.constant 2 : index
    %c0_55 = arith.constant 0 : index
    %c0_56 = arith.constant 0 : index
    %57 = vector.load %arg8[%c2_54, %c0_55, %c0_56] : memref<5x120x160xf32, #tpu.memory_space<vmem>>, vector<1x120x160xf32>
    %58 = vector.shape_cast %57 : vector<1x120x160xf32> to vector<120x160xf32>
    %cst_57 = arith.constant dense<0.000000e+00> : vector<8x160xf32>
    %59 = tpu.matmul %56, %58, %cst_57 {dimension_numbers = #tpu.dot_dimension_numbers<[1], [0], [0], [1], [0, 0, 1, 1], [], []>} : vector<8x120xf32>, vector<120x160xf32>, vector<8x160xf32> -> vector<8x160xf32>
    %60 = arith.addf %55, %59 : vector<8x160xf32>
    %61 = vector.extract_strided_slice %43 {offsets = [3, 0], sizes = [8, 120], strides = [1, 1]} : vector<12x120xf32> to vector<8x120xf32>
    %c3_58 = arith.constant 3 : index
    %c0_59 = arith.constant 0 : index
    %c0_60 = arith.constant 0 : index
    %62 = vector.load %arg8[%c3_58, %c0_59, %c0_60] : memref<5x120x160xf32, #tpu.memory_space<vmem>>, vector<1x120x160xf32>
    %63 = vector.shape_cast %62 : vector<1x120x160xf32> to vector<120x160xf32>
    %cst_61 = arith.constant dense<0.000000e+00> : vector<8x160xf32>
    %64 = tpu.matmul %61, %63, %cst_61 {dimension_numbers = #tpu.dot_dimension_numbers<[1], [0], [0], [1], [0, 0, 1, 1], [], []>} : vector<8x120xf32>, vector<120x160xf32>, vector<8x160xf32> -> vector<8x160xf32>
    %65 = arith.addf %60, %64 : vector<8x160xf32>
    %66 = vector.extract_strided_slice %43 {offsets = [4, 0], sizes = [8, 120], strides = [1, 1]} : vector<12x120xf32> to vector<8x120xf32>
    %c4_62 = arith.constant 4 : index
    %c0_63 = arith.constant 0 : index
    %c0_64 = arith.constant 0 : index
    %67 = vector.load %arg8[%c4_62, %c0_63, %c0_64] : memref<5x120x160xf32, #tpu.memory_space<vmem>>, vector<1x120x160xf32>
    %68 = vector.shape_cast %67 : vector<1x120x160xf32> to vector<120x160xf32>
    %cst_65 = arith.constant dense<0.000000e+00> : vector<8x160xf32>
    %69 = tpu.matmul %66, %68, %cst_65 {dimension_numbers = #tpu.dot_dimension_numbers<[1], [0], [0], [1], [0, 0, 1, 1], [], []>} : vector<8x120xf32>, vector<120x160xf32>, vector<8x160xf32> -> vector<8x160xf32>
    %70 = arith.addf %65, %69 : vector<8x160xf32>
    %c0_66 = arith.constant 0 : index
    %c0_67 = arith.constant 0 : index
    %71 = vector.load %arg10[%c0_66, %c0_67] : memref<160x80xf32, #tpu.memory_space<vmem>>, vector<160x80xf32>
    %cst_68 = arith.constant dense<0.000000e+00> : vector<8x80xf32>
    %72 = tpu.matmul %70, %71, %cst_68 {dimension_numbers = #tpu.dot_dimension_numbers<[1], [0], [0], [1], [0, 0, 1, 1], [], []>} : vector<8x160xf32>, vector<160x80xf32>, vector<8x80xf32> -> vector<8x80xf32>
    %c0_69 = arith.constant 0 : index
    %c0_70 = arith.constant 0 : index
    %73 = vector.load %arg11[%c0_69, %c0_70] : memref<160x80xf32, #tpu.memory_space<vmem>>, vector<160x80xf32>
    %cst_71 = arith.constant dense<0.000000e+00> : vector<8x80xf32>
    %74 = tpu.matmul %70, %73, %cst_71 {dimension_numbers = #tpu.dot_dimension_numbers<[1], [0], [0], [1], [0, 0, 1, 1], [], []>} : vector<8x160xf32>, vector<160x80xf32>, vector<8x80xf32> -> vector<8x80xf32>
    %75 = arith.maximumf %72, %74 : vector<8x80xf32>
    %c0_72 = arith.constant 0 : index
    %c0_73 = arith.constant 0 : index
    %76 = vector.load %arg12[%c0_72, %c0_73] : memref<4x8xf32, #tpu.memory_space<vmem>>, vector<4x8xf32>
    %cst_74 = arith.constant dense<0.000000e+00> : vector<4x80xf32>
    %77 = tpu.matmul %76, %75, %cst_74 {dimension_numbers = #tpu.dot_dimension_numbers<[1], [0], [0], [1], [0, 0, 1, 1], [], []>} : vector<4x8xf32>, vector<8x80xf32>, vector<4x80xf32> -> vector<4x80xf32>
    %c0_75 = arith.constant 0 : index
    %c0_76 = arith.constant 0 : index
    %78 = vector.load %arg13[%c0_75, %c0_76] : memref<4x8xf32, #tpu.memory_space<vmem>>, vector<4x8xf32>
    %cst_77 = arith.constant dense<0.000000e+00> : vector<4x80xf32>
    %79 = tpu.matmul %78, %75, %cst_77 {dimension_numbers = #tpu.dot_dimension_numbers<[1], [0], [0], [1], [0, 0, 1, 1], [], []>} : vector<4x8xf32>, vector<8x80xf32>, vector<4x80xf32> -> vector<4x80xf32>
    %80 = arith.maximumf %77, %79 : vector<4x80xf32>
    %cst_78 = arith.constant 0.000000e+00 : f32
    %81 = vector.broadcast %cst_78 : f32 to vector<4x80xf32>
    %82 = arith.maximumf %80, %81 : vector<4x80xf32>
    %c0_79 = arith.constant 0 : index
    %c0_80 = arith.constant 0 : index
    %83 = vector.load %arg15[%c0_79, %c0_80] : memref<1x50xf32, #tpu.memory_space<vmem>>, vector<1x50xf32>
    %84 = vector.extract_strided_slice %82 {offsets = [0, 0], sizes = [1, 80], strides = [1, 1]} : vector<4x80xf32> to vector<1x80xf32>
    %c0_81 = arith.constant 0 : index
    %c0_82 = arith.constant 0 : index
    %c0_83 = arith.constant 0 : index
    %85 = vector.load %arg14[%c0_81, %c0_82, %c0_83] : memref<4x80x50xf32, #tpu.memory_space<vmem>>, vector<1x80x50xf32>
    %86 = vector.shape_cast %85 : vector<1x80x50xf32> to vector<80x50xf32>
    %cst_84 = arith.constant dense<0.000000e+00> : vector<1x50xf32>
    %87 = tpu.matmul %84, %86, %cst_84 {dimension_numbers = #tpu.dot_dimension_numbers<[1], [0], [0], [1], [0, 0, 1, 1], [], []>} : vector<1x80xf32>, vector<80x50xf32>, vector<1x50xf32> -> vector<1x50xf32>
    %88 = arith.addf %83, %87 : vector<1x50xf32>
    %89 = vector.extract_strided_slice %82 {offsets = [1, 0], sizes = [1, 80], strides = [1, 1]} : vector<4x80xf32> to vector<1x80xf32>
    %c1_85 = arith.constant 1 : index
    %c0_86 = arith.constant 0 : index
    %c0_87 = arith.constant 0 : index
    %90 = vector.load %arg14[%c1_85, %c0_86, %c0_87] : memref<4x80x50xf32, #tpu.memory_space<vmem>>, vector<1x80x50xf32>
    %91 = vector.shape_cast %90 : vector<1x80x50xf32> to vector<80x50xf32>
    %cst_88 = arith.constant dense<0.000000e+00> : vector<1x50xf32>
    %92 = tpu.matmul %89, %91, %cst_88 {dimension_numbers = #tpu.dot_dimension_numbers<[1], [0], [0], [1], [0, 0, 1, 1], [], []>} : vector<1x80xf32>, vector<80x50xf32>, vector<1x50xf32> -> vector<1x50xf32>
    %93 = arith.addf %88, %92 : vector<1x50xf32>
    %94 = vector.extract_strided_slice %82 {offsets = [2, 0], sizes = [1, 80], strides = [1, 1]} : vector<4x80xf32> to vector<1x80xf32>
    %c2_89 = arith.constant 2 : index
    %c0_90 = arith.constant 0 : index
    %c0_91 = arith.constant 0 : index
    %95 = vector.load %arg14[%c2_89, %c0_90, %c0_91] : memref<4x80x50xf32, #tpu.memory_space<vmem>>, vector<1x80x50xf32>
    %96 = vector.shape_cast %95 : vector<1x80x50xf32> to vector<80x50xf32>
    %cst_92 = arith.constant dense<0.000000e+00> : vector<1x50xf32>
    %97 = tpu.matmul %94, %96, %cst_92 {dimension_numbers = #tpu.dot_dimension_numbers<[1], [0], [0], [1], [0, 0, 1, 1], [], []>} : vector<1x80xf32>, vector<80x50xf32>, vector<1x50xf32> -> vector<1x50xf32>
    %98 = arith.addf %93, %97 : vector<1x50xf32>
    %99 = vector.extract_strided_slice %82 {offsets = [3, 0], sizes = [1, 80], strides = [1, 1]} : vector<4x80xf32> to vector<1x80xf32>
    %c3_93 = arith.constant 3 : index
    %c0_94 = arith.constant 0 : index
    %c0_95 = arith.constant 0 : index
    %100 = vector.load %arg14[%c3_93, %c0_94, %c0_95] : memref<4x80x50xf32, #tpu.memory_space<vmem>>, vector<1x80x50xf32>
    %101 = vector.shape_cast %100 : vector<1x80x50xf32> to vector<80x50xf32>
    %cst_96 = arith.constant dense<0.000000e+00> : vector<1x50xf32>
    %102 = tpu.matmul %99, %101, %cst_96 {dimension_numbers = #tpu.dot_dimension_numbers<[1], [0], [0], [1], [0, 0, 1, 1], [], []>} : vector<1x80xf32>, vector<80x50xf32>, vector<1x50xf32> -> vector<1x50xf32>
    %103 = arith.addf %98, %102 : vector<1x50xf32>
    %cst_97 = arith.constant 0.000000e+00 : f32
    %104 = vector.broadcast %cst_97 : f32 to vector<1x50xf32>
    %105 = arith.maximumf %103, %104 : vector<1x50xf32>
    %c0_98 = arith.constant 0 : index
    %c0_99 = arith.constant 0 : index
    %106 = vector.load %arg16[%c0_98, %c0_99] : memref<50x10xf32, #tpu.memory_space<vmem>>, vector<50x10xf32>
    %cst_100 = arith.constant dense<0.000000e+00> : vector<1x10xf32>
    %107 = tpu.matmul %105, %106, %cst_100 {dimension_numbers = #tpu.dot_dimension_numbers<[1], [0], [0], [1], [0, 0, 1, 1], [], []>} : vector<1x50xf32>, vector<50x10xf32>, vector<1x10xf32> -> vector<1x10xf32>
    %c0_101 = arith.constant 0 : index
    %c0_102 = arith.constant 0 : index
    %108 = vector.load %arg17[%c0_101, %c0_102] : memref<1x10xf32, #tpu.memory_space<vmem>>, vector<1x10xf32>
    %109 = arith.addf %107, %108 : vector<1x10xf32>
    %cst_103 = arith.constant dense<0xFF800000> : vector<1xf32>
    %110 = vector.multi_reduction <maximumf>, %109, %cst_103 [1] : vector<1x10xf32> to vector<1xf32>
    %111 = vector.shape_cast %110 : vector<1xf32> to vector<1x1xf32>
    %112 = vector.broadcast %111 : vector<1x1xf32> to vector<1x10xf32>
    %113 = arith.subf %109, %112 : vector<1x10xf32>
    %114 = math.exp %113 : vector<1x10xf32>
    %cst_104 = arith.constant dense<0.000000e+00> : vector<1xf32>
    %115 = vector.multi_reduction <add>, %114, %cst_104 [1] : vector<1x10xf32> to vector<1xf32>
    %116 = vector.shape_cast %115 : vector<1xf32> to vector<1x1xf32>
    %117 = math.log %116 : vector<1x1xf32>
    %118 = vector.broadcast %111 : vector<1x1xf32> to vector<1x10xf32>
    %119 = arith.subf %109, %118 : vector<1x10xf32>
    %120 = vector.broadcast %117 : vector<1x1xf32> to vector<1x10xf32>
    %121 = arith.subf %119, %120 : vector<1x10xf32>
    %c0_105 = arith.constant 0 : index
    %c0_106 = arith.constant 0 : index
    %122 = vector.load %arg18[%c0_105, %c0_106] : memref<2x10xf32, #tpu.memory_space<vmem>>, vector<1x10xf32>
    tpu.vector_store %arg18[%c0_105, %c0_106], %121 {strides = array<i32>} : memref<2x10xf32, #tpu.memory_space<vmem>>, vector<1x10xf32>,
    %c0_107 = arith.constant 0 : index
    %c0_108 = arith.constant 0 : index
    %123 = vector.load %arg3[%c0_107, %c0_108] : memref<1x240xf32, #tpu.memory_space<vmem>>, vector<1x240xf32>
    %c1_109 = arith.constant 1 : index
    %c0_110 = arith.constant 0 : index
    %c0_111 = arith.constant 0 : index
    %124 = vector.load %arg1[%c1_109, %c0_110, %c0_111] : memref<2x28x28xf32, #tpu.memory_space<vmem>>, vector<1x24x28xf32>
    %125 = vector.shape_cast %124 : vector<1x24x28xf32> to vector<24x28xf32>
    %c0_112 = arith.constant 0 : index
    %c0_113 = arith.constant 0 : index
    %c0_114 = arith.constant 0 : index
    %126 = vector.load %arg2[%c0_112, %c0_113, %c0_114] : memref<5x28x240xf32, #tpu.memory_space<vmem>>, vector<1x28x240xf32>
    %127 = vector.shape_cast %126 : vector<1x28x240xf32> to vector<28x240xf32>
    %cst_115 = arith.constant dense<0.000000e+00> : vector<24x240xf32>
    %128 = tpu.matmul %125, %127, %cst_115 {dimension_numbers = #tpu.dot_dimension_numbers<[1], [0], [0], [1], [0, 0, 1, 1], [], []>} : vector<24x28xf32>, vector<28x240xf32>, vector<24x240xf32> -> vector<24x240xf32>
    %129 = vector.broadcast %123 : vector<1x240xf32> to vector<24x240xf32>
    %130 = arith.addf %129, %128 : vector<24x240xf32>
    %c1_116 = arith.constant 1 : index
    %c1_117 = arith.constant 1 : index
    %c0_118 = arith.constant 0 : index
    %131 = vector.load %arg1[%c1_116, %c1_117, %c0_118] : memref<2x28x28xf32, #tpu.memory_space<vmem>>, vector<1x24x28xf32>
    %132 = vector.shape_cast %131 : vector<1x24x28xf32> to vector<24x28xf32>
    %c1_119 = arith.constant 1 : index
    %c0_120 = arith.constant 0 : index
    %c0_121 = arith.constant 0 : index
    %133 = vector.load %arg2[%c1_119, %c0_120, %c0_121] : memref<5x28x240xf32, #tpu.memory_space<vmem>>, vector<1x28x240xf32>
    %134 = vector.shape_cast %133 : vector<1x28x240xf32> to vector<28x240xf32>
    %cst_122 = arith.constant dense<0.000000e+00> : vector<24x240xf32>
    %135 = tpu.matmul %132, %134, %cst_122 {dimension_numbers = #tpu.dot_dimension_numbers<[1], [0], [0], [1], [0, 0, 1, 1], [], []>} : vector<24x28xf32>, vector<28x240xf32>, vector<24x240xf32> -> vector<24x240xf32>
    %136 = arith.addf %130, %135 : vector<24x240xf32>
    %c1_123 = arith.constant 1 : index
    %c2_124 = arith.constant 2 : index
    %c0_125 = arith.constant 0 : index
    %137 = vector.load %arg1[%c1_123, %c2_124, %c0_125] : memref<2x28x28xf32, #tpu.memory_space<vmem>>, vector<1x24x28xf32>
    %138 = vector.shape_cast %137 : vector<1x24x28xf32> to vector<24x28xf32>
    %c2_126 = arith.constant 2 : index
    %c0_127 = arith.constant 0 : index
    %c0_128 = arith.constant 0 : index
    %139 = vector.load %arg2[%c2_126, %c0_127, %c0_128] : memref<5x28x240xf32, #tpu.memory_space<vmem>>, vector<1x28x240xf32>
    %140 = vector.shape_cast %139 : vector<1x28x240xf32> to vector<28x240xf32>
    %cst_129 = arith.constant dense<0.000000e+00> : vector<24x240xf32>
    %141 = tpu.matmul %138, %140, %cst_129 {dimension_numbers = #tpu.dot_dimension_numbers<[1], [0], [0], [1], [0, 0, 1, 1], [], []>} : vector<24x28xf32>, vector<28x240xf32>, vector<24x240xf32> -> vector<24x240xf32>
    %142 = arith.addf %136, %141 : vector<24x240xf32>
    %c1_130 = arith.constant 1 : index
    %c3_131 = arith.constant 3 : index
    %c0_132 = arith.constant 0 : index
    %143 = vector.load %arg1[%c1_130, %c3_131, %c0_132] : memref<2x28x28xf32, #tpu.memory_space<vmem>>, vector<1x24x28xf32>
    %144 = vector.shape_cast %143 : vector<1x24x28xf32> to vector<24x28xf32>
    %c3_133 = arith.constant 3 : index
    %c0_134 = arith.constant 0 : index
    %c0_135 = arith.constant 0 : index
    %145 = vector.load %arg2[%c3_133, %c0_134, %c0_135] : memref<5x28x240xf32, #tpu.memory_space<vmem>>, vector<1x28x240xf32>
    %146 = vector.shape_cast %145 : vector<1x28x240xf32> to vector<28x240xf32>
    %cst_136 = arith.constant dense<0.000000e+00> : vector<24x240xf32>
    %147 = tpu.matmul %144, %146, %cst_136 {dimension_numbers = #tpu.dot_dimension_numbers<[1], [0], [0], [1], [0, 0, 1, 1], [], []>} : vector<24x28xf32>, vector<28x240xf32>, vector<24x240xf32> -> vector<24x240xf32>
    %148 = arith.addf %142, %147 : vector<24x240xf32>
    %c1_137 = arith.constant 1 : index
    %c4_138 = arith.constant 4 : index
    %c0_139 = arith.constant 0 : index
    %149 = vector.load %arg1[%c1_137, %c4_138, %c0_139] : memref<2x28x28xf32, #tpu.memory_space<vmem>>, vector<1x24x28xf32>
    %150 = vector.shape_cast %149 : vector<1x24x28xf32> to vector<24x28xf32>
    %c4_140 = arith.constant 4 : index
    %c0_141 = arith.constant 0 : index
    %c0_142 = arith.constant 0 : index
    %151 = vector.load %arg2[%c4_140, %c0_141, %c0_142] : memref<5x28x240xf32, #tpu.memory_space<vmem>>, vector<1x28x240xf32>
    %152 = vector.shape_cast %151 : vector<1x28x240xf32> to vector<28x240xf32>
    %cst_143 = arith.constant dense<0.000000e+00> : vector<24x240xf32>
    %153 = tpu.matmul %150, %152, %cst_143 {dimension_numbers = #tpu.dot_dimension_numbers<[1], [0], [0], [1], [0, 0, 1, 1], [], []>} : vector<24x28xf32>, vector<28x240xf32>, vector<24x240xf32> -> vector<24x240xf32>
    %154 = arith.addf %148, %153 : vector<24x240xf32>
    %c0_144 = arith.constant 0 : index
    %c0_145 = arith.constant 0 : index
    %155 = vector.load %arg4[%c0_144, %c0_145] : memref<240x120xf32, #tpu.memory_space<vmem>>, vector<240x120xf32>
    %cst_146 = arith.constant dense<0.000000e+00> : vector<24x120xf32>
    %156 = tpu.matmul %154, %155, %cst_146 {dimension_numbers = #tpu.dot_dimension_numbers<[1], [0], [0], [1], [0, 0, 1, 1], [], []>} : vector<24x240xf32>, vector<240x120xf32>, vector<24x120xf32> -> vector<24x120xf32>
    %c0_147 = arith.constant 0 : index
    %c0_148 = arith.constant 0 : index
    %157 = vector.load %arg5[%c0_147, %c0_148] : memref<240x120xf32, #tpu.memory_space<vmem>>, vector<240x120xf32>
    %cst_149 = arith.constant dense<0.000000e+00> : vector<24x120xf32>
    %158 = tpu.matmul %154, %157, %cst_149 {dimension_numbers = #tpu.dot_dimension_numbers<[1], [0], [0], [1], [0, 0, 1, 1], [], []>} : vector<24x240xf32>, vector<240x120xf32>, vector<24x120xf32> -> vector<24x120xf32>
    %159 = arith.maximumf %156, %158 : vector<24x120xf32>
    %c0_150 = arith.constant 0 : index
    %c0_151 = arith.constant 0 : index
    %160 = vector.load %arg6[%c0_150, %c0_151] : memref<12x24xf32, #tpu.memory_space<vmem>>, vector<12x24xf32>
    %cst_152 = arith.constant dense<0.000000e+00> : vector<12x120xf32>
    %161 = tpu.matmul %160, %159, %cst_152 {dimension_numbers = #tpu.dot_dimension_numbers<[1], [0], [0], [1], [0, 0, 1, 1], [], []>} : vector<12x24xf32>, vector<24x120xf32>, vector<12x120xf32> -> vector<12x120xf32>
    %c0_153 = arith.constant 0 : index
    %c0_154 = arith.constant 0 : index
    %162 = vector.load %arg7[%c0_153, %c0_154] : memref<12x24xf32, #tpu.memory_space<vmem>>, vector<12x24xf32>
    %cst_155 = arith.constant dense<0.000000e+00> : vector<12x120xf32>
    %163 = tpu.matmul %162, %159, %cst_155 {dimension_numbers = #tpu.dot_dimension_numbers<[1], [0], [0], [1], [0, 0, 1, 1], [], []>} : vector<12x24xf32>, vector<24x120xf32>, vector<12x120xf32> -> vector<12x120xf32>
    %164 = arith.maximumf %161, %163 : vector<12x120xf32>
    %cst_156 = arith.constant 0.000000e+00 : f32
    %165 = vector.broadcast %cst_156 : f32 to vector<12x120xf32>
    %166 = arith.maximumf %164, %165 : vector<12x120xf32>
    %c0_157 = arith.constant 0 : index
    %c0_158 = arith.constant 0 : index
    %167 = vector.load %arg9[%c0_157, %c0_158] : memref<1x160xf32, #tpu.memory_space<vmem>>, vector<1x160xf32>
    %168 = vector.extract_strided_slice %166 {offsets = [0, 0], sizes = [8, 120], strides = [1, 1]} : vector<12x120xf32> to vector<8x120xf32>
    %c0_159 = arith.constant 0 : index
    %c0_160 = arith.constant 0 : index
    %c0_161 = arith.constant 0 : index
    %169 = vector.load %arg8[%c0_159, %c0_160, %c0_161] : memref<5x120x160xf32, #tpu.memory_space<vmem>>, vector<1x120x160xf32>
    %170 = vector.shape_cast %169 : vector<1x120x160xf32> to vector<120x160xf32>
    %cst_162 = arith.constant dense<0.000000e+00> : vector<8x160xf32>
    %171 = tpu.matmul %168, %170, %cst_162 {dimension_numbers = #tpu.dot_dimension_numbers<[1], [0], [0], [1], [0, 0, 1, 1], [], []>} : vector<8x120xf32>, vector<120x160xf32>, vector<8x160xf32> -> vector<8x160xf32>
    %172 = vector.broadcast %167 : vector<1x160xf32> to vector<8x160xf32>
    %173 = arith.addf %172, %171 : vector<8x160xf32>
    %174 = vector.extract_strided_slice %166 {offsets = [1, 0], sizes = [8, 120], strides = [1, 1]} : vector<12x120xf32> to vector<8x120xf32>
    %c1_163 = arith.constant 1 : index
    %c0_164 = arith.constant 0 : index
    %c0_165 = arith.constant 0 : index
    %175 = vector.load %arg8[%c1_163, %c0_164, %c0_165] : memref<5x120x160xf32, #tpu.memory_space<vmem>>, vector<1x120x160xf32>
    %176 = vector.shape_cast %175 : vector<1x120x160xf32> to vector<120x160xf32>
    %cst_166 = arith.constant dense<0.000000e+00> : vector<8x160xf32>
    %177 = tpu.matmul %174, %176, %cst_166 {dimension_numbers = #tpu.dot_dimension_numbers<[1], [0], [0], [1], [0, 0, 1, 1], [], []>} : vector<8x120xf32>, vector<120x160xf32>, vector<8x160xf32> -> vector<8x160xf32>
    %178 = arith.addf %173, %177 : vector<8x160xf32>
    %179 = vector.extract_strided_slice %166 {offsets = [2, 0], sizes = [8, 120], strides = [1, 1]} : vector<12x120xf32> to vector<8x120xf32>
    %c2_167 = arith.constant 2 : index
    %c0_168 = arith.constant 0 : index
    %c0_169 = arith.constant 0 : index
    %180 = vector.load %arg8[%c2_167, %c0_168, %c0_169] : memref<5x120x160xf32, #tpu.memory_space<vmem>>, vector<1x120x160xf32>
    %181 = vector.shape_cast %180 : vector<1x120x160xf32> to vector<120x160xf32>
    %cst_170 = arith.constant dense<0.000000e+00> : vector<8x160xf32>
    %182 = tpu.matmul %179, %181, %cst_170 {dimension_numbers = #tpu.dot_dimension_numbers<[1], [0], [0], [1], [0, 0, 1, 1], [], []>} : vector<8x120xf32>, vector<120x160xf32>, vector<8x160xf32> -> vector<8x160xf32>
    %183 = arith.addf %178, %182 : vector<8x160xf32>
    %184 = vector.extract_strided_slice %166 {offsets = [3, 0], sizes = [8, 120], strides = [1, 1]} : vector<12x120xf32> to vector<8x120xf32>
    %c3_171 = arith.constant 3 : index
    %c0_172 = arith.constant 0 : index
    %c0_173 = arith.constant 0 : index
    %185 = vector.load %arg8[%c3_171, %c0_172, %c0_173] : memref<5x120x160xf32, #tpu.memory_space<vmem>>, vector<1x120x160xf32>
    %186 = vector.shape_cast %185 : vector<1x120x160xf32> to vector<120x160xf32>
    %cst_174 = arith.constant dense<0.000000e+00> : vector<8x160xf32>
    %187 = tpu.matmul %184, %186, %cst_174 {dimension_numbers = #tpu.dot_dimension_numbers<[1], [0], [0], [1], [0, 0, 1, 1], [], []>} : vector<8x120xf32>, vector<120x160xf32>, vector<8x160xf32> -> vector<8x160xf32>
    %188 = arith.addf %183, %187 : vector<8x160xf32>
    %189 = vector.extract_strided_slice %166 {offsets = [4, 0], sizes = [8, 120], strides = [1, 1]} : vector<12x120xf32> to vector<8x120xf32>
    %c4_175 = arith.constant 4 : index
    %c0_176 = arith.constant 0 : index
    %c0_177 = arith.constant 0 : index
    %190 = vector.load %arg8[%c4_175, %c0_176, %c0_177] : memref<5x120x160xf32, #tpu.memory_space<vmem>>, vector<1x120x160xf32>
    %191 = vector.shape_cast %190 : vector<1x120x160xf32> to vector<120x160xf32>
    %cst_178 = arith.constant dense<0.000000e+00> : vector<8x160xf32>
    %192 = tpu.matmul %189, %191, %cst_178 {dimension_numbers = #tpu.dot_dimension_numbers<[1], [0], [0], [1], [0, 0, 1, 1], [], []>} : vector<8x120xf32>, vector<120x160xf32>, vector<8x160xf32> -> vector<8x160xf32>
    %193 = arith.addf %188, %192 : vector<8x160xf32>
    %c0_179 = arith.constant 0 : index
    %c0_180 = arith.constant 0 : index
    %194 = vector.load %arg10[%c0_179, %c0_180] : memref<160x80xf32, #tpu.memory_space<vmem>>, vector<160x80xf32>
    %cst_181 = arith.constant dense<0.000000e+00> : vector<8x80xf32>
    %195 = tpu.matmul %193, %194, %cst_181 {dimension_numbers = #tpu.dot_dimension_numbers<[1], [0], [0], [1], [0, 0, 1, 1], [], []>} : vector<8x160xf32>, vector<160x80xf32>, vector<8x80xf32> -> vector<8x80xf32>
    %c0_182 = arith.constant 0 : index
    %c0_183 = arith.constant 0 : index
    %196 = vector.load %arg11[%c0_182, %c0_183] : memref<160x80xf32, #tpu.memory_space<vmem>>, vector<160x80xf32>
    %cst_184 = arith.constant dense<0.000000e+00> : vector<8x80xf32>
    %197 = tpu.matmul %193, %196, %cst_184 {dimension_numbers = #tpu.dot_dimension_numbers<[1], [0], [0], [1], [0, 0, 1, 1], [], []>} : vector<8x160xf32>, vector<160x80xf32>, vector<8x80xf32> -> vector<8x80xf32>
    %198 = arith.maximumf %195, %197 : vector<8x80xf32>
    %c0_185 = arith.constant 0 : index
    %c0_186 = arith.constant 0 : index
    %199 = vector.load %arg12[%c0_185, %c0_186] : memref<4x8xf32, #tpu.memory_space<vmem>>, vector<4x8xf32>
    %cst_187 = arith.constant dense<0.000000e+00> : vector<4x80xf32>
    %200 = tpu.matmul %199, %198, %cst_187 {dimension_numbers = #tpu.dot_dimension_numbers<[1], [0], [0], [1], [0, 0, 1, 1], [], []>} : vector<4x8xf32>, vector<8x80xf32>, vector<4x80xf32> -> vector<4x80xf32>
    %c0_188 = arith.constant 0 : index
    %c0_189 = arith.constant 0 : index
    %201 = vector.load %arg13[%c0_188, %c0_189] : memref<4x8xf32, #tpu.memory_space<vmem>>, vector<4x8xf32>
    %cst_190 = arith.constant dense<0.000000e+00> : vector<4x80xf32>
    %202 = tpu.matmul %201, %198, %cst_190 {dimension_numbers = #tpu.dot_dimension_numbers<[1], [0], [0], [1], [0, 0, 1, 1], [], []>} : vector<4x8xf32>, vector<8x80xf32>, vector<4x80xf32> -> vector<4x80xf32>
    %203 = arith.maximumf %200, %202 : vector<4x80xf32>
    %cst_191 = arith.constant 0.000000e+00 : f32
    %204 = vector.broadcast %cst_191 : f32 to vector<4x80xf32>
    %205 = arith.maximumf %203, %204 : vector<4x80xf32>
    %c0_192 = arith.constant 0 : index
    %c0_193 = arith.constant 0 : index
    %206 = vector.load %arg15[%c0_192, %c0_193] : memref<1x50xf32, #tpu.memory_space<vmem>>, vector<1x50xf32>
    %207 = vector.extract_strided_slice %205 {offsets = [0, 0], sizes = [1, 80], strides = [1, 1]} : vector<4x80xf32> to vector<1x80xf32>
    %c0_194 = arith.constant 0 : index
    %c0_195 = arith.constant 0 : index
    %c0_196 = arith.constant 0 : index
    %208 = vector.load %arg14[%c0_194, %c0_195, %c0_196] : memref<4x80x50xf32, #tpu.memory_space<vmem>>, vector<1x80x50xf32>
    %209 = vector.shape_cast %208 : vector<1x80x50xf32> to vector<80x50xf32>
    %cst_197 = arith.constant dense<0.000000e+00> : vector<1x50xf32>
    %210 = tpu.matmul %207, %209, %cst_197 {dimension_numbers = #tpu.dot_dimension_numbers<[1], [0], [0], [1], [0, 0, 1, 1], [], []>} : vector<1x80xf32>, vector<80x50xf32>, vector<1x50xf32> -> vector<1x50xf32>
    %211 = arith.addf %206, %210 : vector<1x50xf32>
    %212 = vector.extract_strided_slice %205 {offsets = [1, 0], sizes = [1, 80], strides = [1, 1]} : vector<4x80xf32> to vector<1x80xf32>
    %c1_198 = arith.constant 1 : index
    %c0_199 = arith.constant 0 : index
    %c0_200 = arith.constant 0 : index
    %213 = vector.load %arg14[%c1_198, %c0_199, %c0_200] : memref<4x80x50xf32, #tpu.memory_space<vmem>>, vector<1x80x50xf32>
    %214 = vector.shape_cast %213 : vector<1x80x50xf32> to vector<80x50xf32>
    %cst_201 = arith.constant dense<0.000000e+00> : vector<1x50xf32>
    %215 = tpu.matmul %212, %214, %cst_201 {dimension_numbers = #tpu.dot_dimension_numbers<[1], [0], [0], [1], [0, 0, 1, 1], [], []>} : vector<1x80xf32>, vector<80x50xf32>, vector<1x50xf32> -> vector<1x50xf32>
    %216 = arith.addf %211, %215 : vector<1x50xf32>
    %217 = vector.extract_strided_slice %205 {offsets = [2, 0], sizes = [1, 80], strides = [1, 1]} : vector<4x80xf32> to vector<1x80xf32>
    %c2_202 = arith.constant 2 : index
    %c0_203 = arith.constant 0 : index
    %c0_204 = arith.constant 0 : index
    %218 = vector.load %arg14[%c2_202, %c0_203, %c0_204] : memref<4x80x50xf32, #tpu.memory_space<vmem>>, vector<1x80x50xf32>
    %219 = vector.shape_cast %218 : vector<1x80x50xf32> to vector<80x50xf32>
    %cst_205 = arith.constant dense<0.000000e+00> : vector<1x50xf32>
    %220 = tpu.matmul %217, %219, %cst_205 {dimension_numbers = #tpu.dot_dimension_numbers<[1], [0], [0], [1], [0, 0, 1, 1], [], []>} : vector<1x80xf32>, vector<80x50xf32>, vector<1x50xf32> -> vector<1x50xf32>
    %221 = arith.addf %216, %220 : vector<1x50xf32>
    %222 = vector.extract_strided_slice %205 {offsets = [3, 0], sizes = [1, 80], strides = [1, 1]} : vector<4x80xf32> to vector<1x80xf32>
    %c3_206 = arith.constant 3 : index
    %c0_207 = arith.constant 0 : index
    %c0_208 = arith.constant 0 : index
    %223 = vector.load %arg14[%c3_206, %c0_207, %c0_208] : memref<4x80x50xf32, #tpu.memory_space<vmem>>, vector<1x80x50xf32>
    %224 = vector.shape_cast %223 : vector<1x80x50xf32> to vector<80x50xf32>
    %cst_209 = arith.constant dense<0.000000e+00> : vector<1x50xf32>
    %225 = tpu.matmul %222, %224, %cst_209 {dimension_numbers = #tpu.dot_dimension_numbers<[1], [0], [0], [1], [0, 0, 1, 1], [], []>} : vector<1x80xf32>, vector<80x50xf32>, vector<1x50xf32> -> vector<1x50xf32>
    %226 = arith.addf %221, %225 : vector<1x50xf32>
    %cst_210 = arith.constant 0.000000e+00 : f32
    %227 = vector.broadcast %cst_210 : f32 to vector<1x50xf32>
    %228 = arith.maximumf %226, %227 : vector<1x50xf32>
    %c0_211 = arith.constant 0 : index
    %c0_212 = arith.constant 0 : index
    %229 = vector.load %arg16[%c0_211, %c0_212] : memref<50x10xf32, #tpu.memory_space<vmem>>, vector<50x10xf32>
    %cst_213 = arith.constant dense<0.000000e+00> : vector<1x10xf32>
    %230 = tpu.matmul %228, %229, %cst_213 {dimension_numbers = #tpu.dot_dimension_numbers<[1], [0], [0], [1], [0, 0, 1, 1], [], []>} : vector<1x50xf32>, vector<50x10xf32>, vector<1x10xf32> -> vector<1x10xf32>
    %c0_214 = arith.constant 0 : index
    %c0_215 = arith.constant 0 : index
    %231 = vector.load %arg17[%c0_214, %c0_215] : memref<1x10xf32, #tpu.memory_space<vmem>>, vector<1x10xf32>
    %232 = arith.addf %230, %231 : vector<1x10xf32>
    %cst_216 = arith.constant dense<0xFF800000> : vector<1xf32>
    %233 = vector.multi_reduction <maximumf>, %232, %cst_216 [1] : vector<1x10xf32> to vector<1xf32>
    %234 = vector.shape_cast %233 : vector<1xf32> to vector<1x1xf32>
    %235 = vector.broadcast %234 : vector<1x1xf32> to vector<1x10xf32>
    %236 = arith.subf %232, %235 : vector<1x10xf32>
    %237 = math.exp %236 : vector<1x10xf32>
    %cst_217 = arith.constant dense<0.000000e+00> : vector<1xf32>
    %238 = vector.multi_reduction <add>, %237, %cst_217 [1] : vector<1x10xf32> to vector<1xf32>
    %239 = vector.shape_cast %238 : vector<1xf32> to vector<1x1xf32>
    %240 = math.log %239 : vector<1x1xf32>
    %241 = vector.broadcast %234 : vector<1x1xf32> to vector<1x10xf32>
    %242 = arith.subf %232, %241 : vector<1x10xf32>
    %243 = vector.broadcast %240 : vector<1x1xf32> to vector<1x10xf32>
    %244 = arith.subf %242, %243 : vector<1x10xf32>
    %c1_218 = arith.constant 1 : index
    %c0_219 = arith.constant 0 : index
    %245 = vector.load %arg18[%c1_218, %c0_219] : memref<2x10xf32, #tpu.memory_space<vmem>>, vector<1x10xf32>
    tpu.vector_store %arg18[%c1_218, %c0_219], %244 {strides = array<i32>} : memref<2x10xf32, #tpu.memory_space<vmem>>, vector<1x10xf32>,
    return
  }
  func.func @transform_0(%arg0: i32) -> (i32, i32, i32) {
    %c0_i32 = arith.constant 0 : i32
    %c0_i32_0 = arith.constant 0 : i32
    %c0_i32_1 = arith.constant 0 : i32
    return %arg0, %c0_i32, %c0_i32_0 : i32, i32, i32
  }
  func.func @transform_1(%arg0: i32) -> (i32, i32, i32) {
    %c0_i32 = arith.constant 0 : i32
    %c0_i32_0 = arith.constant 0 : i32
    %c0_i32_1 = arith.constant 0 : i32
    %c0_i32_2 = arith.constant 0 : i32
    return %c0_i32, %c0_i32_0, %c0_i32_1 : i32, i32, i32
  }
  func.func @transform_2(%arg0: i32) -> (i32, i32) {
    %c0_i32 = arith.constant 0 : i32
    %c0_i32_0 = arith.constant 0 : i32
    %c0_i32_1 = arith.constant 0 : i32
    return %c0_i32, %c0_i32_0 : i32, i32
  }
  func.func @transform_3(%arg0: i32) -> (i32, i32) {
    %c0_i32 = arith.constant 0 : i32
    %c0_i32_0 = arith.constant 0 : i32
    %c0_i32_1 = arith.constant 0 : i32
    return %c0_i32, %c0_i32_0 : i32, i32
  }
  func.func @transform_4(%arg0: i32) -> (i32, i32) {
    %c0_i32 = arith.constant 0 : i32
    %c0_i32_0 = arith.constant 0 : i32
    %c0_i32_1 = arith.constant 0 : i32
    return %c0_i32, %c0_i32_0 : i32, i32
  }
  func.func @transform_5(%arg0: i32) -> (i32, i32) {
    %c0_i32 = arith.constant 0 : i32
    %c0_i32_0 = arith.constant 0 : i32
    %c0_i32_1 = arith.constant 0 : i32
    return %c0_i32, %c0_i32_0 : i32, i32
  }
  func.func @transform_6(%arg0: i32) -> (i32, i32) {
    %c0_i32 = arith.constant 0 : i32
    %c0_i32_0 = arith.constant 0 : i32
    %c0_i32_1 = arith.constant 0 : i32
    return %c0_i32, %c0_i32_0 : i32, i32
  }
  func.func @transform_7(%arg0: i32) -> (i32, i32, i32) {
    %c0_i32 = arith.constant 0 : i32
    %c0_i32_0 = arith.constant 0 : i32
    %c0_i32_1 = arith.constant 0 : i32
    %c0_i32_2 = arith.constant 0 : i32
    return %c0_i32, %c0_i32_0, %c0_i32_1 : i32, i32, i32
  }
  func.func @transform_8(%arg0: i32) -> (i32, i32) {
    %c0_i32 = arith.constant 0 : i32
    %c0_i32_0 = arith.constant 0 : i32
    %c0_i32_1 = arith.constant 0 : i32
    return %c0_i32, %c0_i32_0 : i32, i32
  }
  func.func @transform_9(%arg0: i32) -> (i32, i32) {
    %c0_i32 = arith.constant 0 : i32
    %c0_i32_0 = arith.constant 0 : i32
    %c0_i32_1 = arith.constant 0 : i32
    return %c0_i32, %c0_i32_0 : i32, i32
  }
  func.func @transform_10(%arg0: i32) -> (i32, i32) {
    %c0_i32 = arith.constant 0 : i32
    %c0_i32_0 = arith.constant 0 : i32
    %c0_i32_1 = arith.constant 0 : i32
    return %c0_i32, %c0_i32_0 : i32, i32
  }
  func.func @transform_11(%arg0: i32) -> (i32, i32) {
    %c0_i32 = arith.constant 0 : i32
    %c0_i32_0 = arith.constant 0 : i32
    %c0_i32_1 = arith.constant 0 : i32
    return %c0_i32, %c0_i32_0 : i32, i32
  }
  func.func @transform_12(%arg0: i32) -> (i32, i32) {
    %c0_i32 = arith.constant 0 : i32
    %c0_i32_0 = arith.constant 0 : i32
    %c0_i32_1 = arith.constant 0 : i32
    return %c0_i32, %c0_i32_0 : i32, i32
  }
  func.func @transform_13(%arg0: i32) -> (i32, i32, i32) {
    %c0_i32 = arith.constant 0 : i32
    %c0_i32_0 = arith.constant 0 : i32
    %c0_i32_1 = arith.constant 0 : i32
    %c0_i32_2 = arith.constant 0 : i32
    return %c0_i32, %c0_i32_0, %c0_i32_1 : i32, i32, i32
  }
  func.func @transform_14(%arg0: i32) -> (i32, i32) {
    %c0_i32 = arith.constant 0 : i32
    %c0_i32_0 = arith.constant 0 : i32
    %c0_i32_1 = arith.constant 0 : i32
    return %c0_i32, %c0_i32_0 : i32, i32
  }
  func.func @transform_15(%arg0: i32) -> (i32, i32) {
    %c0_i32 = arith.constant 0 : i32
    %c0_i32_0 = arith.constant 0 : i32
    %c0_i32_1 = arith.constant 0 : i32
    return %c0_i32, %c0_i32_0 : i32, i32
  }
  func.func @transform_16(%arg0: i32) -> (i32, i32) {
    %c0_i32 = arith.constant 0 : i32
    %c0_i32_0 = arith.constant 0 : i32
    %c0_i32_1 = arith.constant 0 : i32
    return %c0_i32, %c0_i32_0 : i32, i32
  }
  func.func @transform_17(%arg0: i32) -> (i32, i32) {
    %c0_i32 = arith.constant 0 : i32
    %c0_i32_0 = arith.constant 0 : i32
    return %arg0, %c0_i32 : i32, i32
  }
}

</mosaic_0001>

<bundles_post_ra>
// kernel: net_forward.1
= control target key start
LH: loop header
LB: loop body
LE: loop exit
PB: predicated region body
PF: predicated region fallthrough
CT: control target
= control target key end

     0   :  { %s9255_s0 = inlined_call_operand.vmem [shape: f32[2,28,28], index: 0, kind: input, shape index: {}]   ;;  %s9256_s1 = inlined_call_operand.vmem [shape: f32[5,28,240], index: 1, kind: input, shape index: {}]   ;;  %s9257_s2 = inlined_call_operand.vmem [shape: f32[1,240], index: 2, kind: input, shape index: {}]   ;;  %s9258_s3 = inlined_call_operand.vmem [shape: f32[240,120], index: 3, kind: input, shape index: {}]   ;;  %s9259_s4 = inlined_call_operand.vmem [shape: f32[240,120], index: 4, kind: input, shape index: {}]   ;;  %s9260_s5 = inlined_call_operand.vmem [shape: f32[12,24], index: 5, kind: input, shape index: {}]   ;;  %s9261_s6 = inlined_call_operand.vmem [shape: f32[12,24], index: 6, kind: input, shape index: {}]   ;;  %s9262_s7 = inlined_call_operand.vmem [shape: f32[5,120,160], index: 7, kind: input, shape index: {}]   ;;  %s9263_s8 = inlined_call_operand.vmem [shape: f32[1,160], index: 8, kind: input, shape index: {}]   ;;  %s9264_s9 = inlined_call_operand.vmem [shape: f32[160,80], index: 9, kind: input, shape index: {}]   ;;  %s9265_s10 = inlined_call_operand.vmem [shape: f32[160,80], index: 10, kind: input, shape index: {}]   ;;  %s9266_s11 = inlined_call_operand.vmem [shape: f32[4,8], index: 11, kind: input, shape index: {}]   ;;  %s9267_s12 = inlined_call_operand.vmem [shape: f32[4,8], index: 12, kind: input, shape index: {}]   ;;  %s9268_s13 = inlined_call_operand.vmem [shape: f32[4,80,50], index: 13, kind: input, shape index: {}]   ;;  %s9269_s14 = inlined_call_operand.vmem [shape: f32[1,50], index: 14, kind: input, shape index: {}]   ;;  %s9270_s15 = inlined_call_operand.vmem [shape: f32[50,10], index: 15, kind: input, shape index: {}]   ;;  %s9271_s16 = inlined_call_operand.vmem [shape: f32[1,10], index: 16, kind: input, shape index: {}]   ;;  %s9272_s17 = inlined_call_operand.hbm [shape: f32[2,10], index: 17, kind: output, shape index: {}]  }
   0x1   :  { %9275 = sst [smem:[#allocation5_spill]] %s9255_s0 }
   0x2   :  { %9276 = sst [smem:[#allocation6_spill]] %s9256_s1 }
   0x3   :  { %s9277_s26 = sld [smem:[#allocation6_spill]]  ;;  %vm79_vm0 = vcmask 1043456   ;;  %v6565_v7 = vmov 0.0   ;;  %vm6566_vm1 = vmmov 1   ;;  %v6567_v13 = vmov 0.0|0.0   ;;  %s9280_s27 = sld [smem:[#allocation5_spill]] }
   0x4   :  { %150 = vmatprep.mubr.f32.mxu0 %v6565_v7  ;;  %vm6680_vm2 = vmpackc.low %vm79_vm0, %vm6566_vm1  ;;  %5650 = vmatprep.subr.bf16.mxu1 %v6567_v13  ;;  %vm69_vm3 = vcmask 228352   ;;  %v650_v37 = vld [vmem:[%s9258_s3] sm:$0xff]  ;;  %v651_v38 = vld [vmem:[%s9258_s3 + $0x8] sm:$0xff] }
   0x5   :  { %v5651_v41 = vpack.c.bf16 %v651_v38, %v650_v37  ;;  %v652_v42 = vld [vmem:[%s9258_s3 + $0x10] sm:$0xff]  ;;  %v653_v43 = vld [vmem:[%s9258_s3 + $0x18] sm:$0xff]  ;;  %v654_v50 = vld [vmem:[%s9258_s3 + $0x20] sm:$0xff] }
   0x6   :  { %v5654_v49 = vpack.c.bf16 %v653_v43, %v652_v42  ;;  %v655_v51 = vld [vmem:[%s9258_s3 + $0x28] sm:$0xff]  ;;  %v656_v56 = vld [vmem:[%s9258_s3 + $0x30] sm:$0xff]  ;;  %v657_v57 = vld [vmem:[%s9258_s3 + $0x38] sm:$0xff] }
   0x7   :  { %5652 = vmatpush1.bf16.msra.mxu1 %v5651_v41  ;;  %v5657_v55 = vpack.c.bf16 %v655_v51, %v654_v50  ;;  %v5660_v63 = vpack.c.bf16 %v657_v57, %v656_v56 }
   0x8   :  { %5653 = vmatprep.subr.bf16.mxu1 %v6567_v13 }
   0x9   :  { %v62_v0 = vld [vmem:[%s9277_s26 + $0x8] sm:$0xff]  ;;  %v64_v1 = vld [vmem:[%s9277_s26 + $0x18] sm:$0xff]  ;;  %v61_v2 = vld [vmem:[%s9277_s26] sm:$0xff] }
   0xa   :  { %v5600_v3 = vpack.c.bf16 %v64_v1, %v62_v0  ;;  %v63_v4 = vld [vmem:[%s9277_s26 + $0x10] sm:$0xff]  ;;  %v66_v5 = vld [vmem:[%s9277_s26 + $0x28] sm:$0xff]  ;;  %v68_v6 = vld [vmem:[%s9277_s26 + $0x38] sm:$0xf] }
   0xb   :  { %v5602_v8 = vpack.c.bf16 %v63_v4, %v61_v2  ;;  %v5604_v9 = vpack.c.bf16 %v68_v6, %v66_v5  ;;  %v65_v11 = vld [vmem:[%s9277_s26 + $0x20] sm:$0xff]  ;;  %v67_v12 = vld [vmem:[%s9277_s26 + $0x30] sm:$0xf]  ;;  %v4721_v14 = vld [vmem:[%s9277_s26 + $0x48] sm:$0xff]  ;;  %5655 = vmatpush1.bf16.msra.mxu1 %v5654_v49 }
   0xc   :  { %5601 = vmatprep.subr.bf16.mxu0 %v5600_v3  ;;  %v5607_v15 = vpack.c.bf16 %v67_v12, %v65_v11  ;;  %v4723_v16 = vld [vmem:[%s9277_s26 + $0x58] sm:$0xff]  ;;  %v4720_v18 = vld [vmem:[%s9277_s26 + $0x40] sm:$0xff]  ;;  %v4722_v19 = vld [vmem:[%s9277_s26 + $0x50] sm:$0xff]  ;;  %5656 = vmatprep.subr.bf16.mxu1 %v6567_v13 }
   0xd   :  { %5603 = vmatpush1.bf16.msra.mxu0 %v5602_v8  ;;  %v5610_v17 = vpack.c.bf16 %v4723_v16, %v4721_v14  ;;  %v4725_v20 = vld [vmem:[%s9277_s26 + $0x68] sm:$0xff]  ;;  %v4727_v21 = vld [vmem:[%s9277_s26 + $0x78] sm:$0xf]  ;;  %v58_v22 = vld [vmem:[%s9280_s27] sm:$0xff]  ;;  %v5612_v23 = vpack.c.bf16 %v4722_v19, %v4720_v18 }
   0xe   :  { %5606 = vmatprep.subr.msk.bf16.mxu0 %vm6680_vm2, %v5604_v9  ;;  %v5614_v24 = vpack.c.bf16 %v4727_v21, %v4725_v20  ;;  %v4724_v25 = vld [vmem:[%s9277_s26 + $0x60] sm:$0xff]  ;;  %v4726_v26 = vld [vmem:[%s9277_s26 + $0x70] sm:$0xf]  ;;  %v4734_v27 = vld [vmem:[%s9277_s26 + $0x88] sm:$0xff] }
   0xf   :  { %v4736_v28 = vld [vmem:[%s9277_s26 + $0x98] sm:$0xff]  ;;  %v59_v29 = vld [vmem:[%s9280_s27 + $0x8] sm:$0xff]  ;;  %v5617_v30 = vpack.c.bf16 %v4726_v26, %v4724_v25  ;;  %v60_v32 = vld [vmem:[%s9280_s27 + $0x10] sm:$0xff]  ;;  %5658 = vmatpush1.bf16.msra.mxu1 %v5657_v55 }
  0x10   :  { %v5620_v31 = vpack.c.bf16 %v4736_v28, %v4734_v27  ;;  %v4733_v33 = vld [vmem:[%s9277_s26 + $0x80] sm:$0xff]  ;;  %v4735_v34 = vld [vmem:[%s9277_s26 + $0x90] sm:$0xff]  ;;  %v4738_v35 = vld [vmem:[%s9277_s26 + $0xa8] sm:$0xff]  ;;  %5659 = vmatprep.subr.bf16.mxu1 %v6567_v13 }
  0x11   :  { %5609 = vmatpush1.bf16.msk.msra.mxu0 %vm6680_vm2, %v5607_v15  ;;  %v4740_v36 = vld [vmem:[%s9277_s26 + $0xb8] sm:$0xf]  ;;  %v186_v39 = vld [vmem:[%s9280_s27 + $0x1] sm:$0xff]  ;;  %v5622_v40 = vpack.c.bf16 %v4735_v34, %v4733_v33  ;;  %v4739_v46 = vld [vmem:[%s9277_s26 + $0xb0] sm:$0xf] }
  0x12   :  { %5611 = vmatprep.subr.bf16.mxu0 %v5610_v17  ;;  %v5624_v44 = vpack.c.bf16 %v4740_v36, %v4738_v35  ;;  %v4737_v45 = vld [vmem:[%s9277_s26 + $0xa0] sm:$0xff]  ;;  %v4747_v47 = vld [vmem:[%s9277_s26 + $0xc8] sm:$0xff]  ;;  %v4749_v48 = vld [vmem:[%s9277_s26 + $0xd8] sm:$0xff] }
  0x13   :  { %v187_v52 = vld [vmem:[%s9280_s27 + $0x9] sm:$0xff]  ;;  %v5627_v53 = vpack.c.bf16 %v4739_v46, %v4737_v45  ;;  %v5630_v54 = vpack.c.bf16 %v4749_v48, %v4747_v47  ;;  %v188_v58 = vld [vmem:[%s9280_s27 + $0x11] sm:$0xff]  ;;  %v4746_v59 = vld [vmem:[%s9277_s26 + $0xc0] sm:$0xff]  ;;  %5661 = vmatpush1.bf16.msra.mxu1 %v5660_v63 }
  0x14   :  { %4717 = vmatmul.mubr.msk.f32.vlgmr.msra.gmra.mrb[0].mxu0 %vm69_vm3, %v58_v22  ;;  %v4748_v60 = vld [vmem:[%s9277_s26 + $0xd0] sm:$0xff]  ;;  %v4751_v61 = vld [vmem:[%s9277_s26 + $0xe8] sm:$0xff]  ;;  %v4753_v62 = vld [vmem:[%s9277_s26 + $0xf8] sm:$0xf]  ;;  %5662 = vmatprep.subr.bf16.mxu1 %v6567_v13 }
  0x15   :  { %156 = vmatprep.mubr.f32.mxu0 %v6565_v7  ;;  %5613 = vmatpush1.bf16.msra.mxu0 %v5612_v23  ;;  %v658_v0 = vld [vmem:[%s9258_s3 + $0x40] sm:$0xff]  ;;  %v659_v1 = vld [vmem:[%s9258_s3 + $0x48] sm:$0xff]  ;;  %v5632_v3 = vpack.c.bf16 %v4748_v60, %v4746_v59  ;;  %v5634_v4 = vpack.c.bf16 %v4753_v62, %v4751_v61  ;;  %v4752_v6 = vld [vmem:[%s9277_s26 + $0xf0] sm:$0xf] }
  0x16   :  { %5616 = vmatprep.subr.msk.bf16.mxu0 %vm6680_vm2, %v5614_v24  ;;  %v302_v2 = vld [vmem:[%s9280_s27 + $0x2] sm:$0xff]  ;;  %v4762_v9 = vld [vmem:[%s9277_s26 + $0x118] sm:$0xff]  ;;  %v5663_v11 = vpack.c.bf16 %v659_v1, %v658_v0  ;;  %v660_v12 = vld [vmem:[%s9258_s3 + $0x50] sm:$0xff] }
  0x17   :  { %v4750_v5 = vld [vmem:[%s9277_s26 + $0xe0] sm:$0xff]  ;;  %v4760_v8 = vld [vmem:[%s9277_s26 + $0x108] sm:$0xff]  ;;  %v661_v14 = vld [vmem:[%s9258_s3 + $0x58] sm:$0xff] }
  0x18   :  { %4718 = vmatmul.mubr.msk.f32.gmra.mrb[2].mxu0 %vm69_vm3, %v59_v29  ;;  %v303_v15 = vld [vmem:[%s9280_s27 + $0xa] sm:$0xff]  ;;  %v5637_v16 = vpack.c.bf16 %v4752_v6, %v4750_v5  ;;  %v5640_v17 = vpack.c.bf16 %v4762_v9, %v4760_v8 }
  0x19   :  { %162 = vmatprep.mubr.f32.mxu0 %v6565_v7  ;;  %5619 = vmatpush1.bf16.msk.msra.mxu0 %vm6680_vm2, %v5617_v30 }
  0x1a   :  { %5621 = vmatprep.subr.bf16.mxu0 %v5620_v31 }
  0x1c   :  { %4719 = vmatmul.mubr.msk.f32.gmra.mrb[4].mxu0 %vm69_vm3, %v60_v32 }
  0x1d   :  { %277 = vmatprep.mubr.f32.mxu0 %v6565_v7 }
  0x20   :  { %4730 = vmatmul.mubr.msk.f32.vlgmr.msra.gmra.mrb[0].mxu0 %vm69_vm3, %v186_v39 }
  0x21   :  { %283 = vmatprep.mubr.f32.mxu0 %v6565_v7  ;;  %5623 = vmatpush1.bf16.msra.mxu0 %v5622_v40 }
  0x22   :  { %5626 = vmatprep.subr.msk.bf16.mxu0 %vm6680_vm2, %v5624_v44 }
  0x24   :  { %4731 = vmatmul.mubr.msk.f32.gmra.mrb[2].mxu0 %vm69_vm3, %v187_v52 }
  0x25   :  { %289 = vmatprep.mubr.f32.mxu0 %v6565_v7  ;;  %5629 = vmatpush1.bf16.msk.msra.mxu0 %vm6680_vm2, %v5627_v53 }
  0x26   :  { %5631 = vmatprep.subr.bf16.mxu0 %v5630_v54 }
  0x28   :  { %4732 = vmatmul.mubr.msk.f32.gmra.mrb[4].mxu0 %vm69_vm3, %v188_v58 }
  0x29   :  { %393 = vmatprep.mubr.f32.mxu0 %v6565_v7 }
  0x2c   :  { %4743 = vmatmul.mubr.msk.f32.vlgmr.msra.gmra.mrb[0].mxu0 %vm69_vm3, %v302_v2 }
  0x2d   :  { %399 = vmatprep.mubr.f32.mxu0 %v6565_v7  ;;  %5633 = vmatpush1.bf16.msra.mxu0 %v5632_v3 }
  0x2e   :  { %5636 = vmatprep.subr.msk.bf16.mxu0 %vm6680_vm2, %v5634_v4 }
  0x2f   :  { %22 = vsyncpa [#allocation3], 0  ;;  %5664 = vmatpush1.bf16.msra.mxu1 %v5663_v11  ;;  %v5666_v18 = vpack.c.bf16 %v661_v14, %v660_v12  ;;  %v662_v19 = vld [vmem:[%s9258_s3 + $0x60] sm:$0xff]  ;;  %v663_v20 = vld [vmem:[%s9258_s3 + $0x68] sm:$0xff]  ;;  %vm680_vm4 = vcmask 916480   ;;  %vm885_vm5 = vcmask 195584  }
  0x30   :  { %4744 = vmatmul.mubr.msk.f32.gmra.mrb[2].mxu0 %vm69_vm3, %v303_v15  ;;  %5665 = vmatprep.subr.bf16.mxu1 %v6567_v13  ;;  %v304_v21 = vld [vmem:[%s9280_s27 + $0x12] sm:$0xff]  ;;  %v4759_v22 = vld [vmem:[%s9277_s26 + $0x100] sm:$0xff]  ;;  %v4764_v24 = vld [vmem:[%s9277_s26 + $0x128] sm:$0xff]  ;;  %v5669_v26 = vpack.c.bf16 %v663_v20, %v662_v19  ;;  %vm1085_vm6 = vcmask 982016   ;;  %vm1205_vm7 = vcmask 1046528   ;;  %vm1315_vm8 = vcmask 1045504  }
  0x31   :  { %405 = vmatprep.mubr.f32.mxu0 %v6565_v7  ;;  %5639 = vmatpush1.bf16.msk.msra.mxu0 %vm6680_vm2, %v5637_v16  ;;  %v4761_v23 = vld [vmem:[%s9277_s26 + $0x110] sm:$0xff]  ;;  %v4766_v25 = vld [vmem:[%s9277_s26 + $0x138] sm:$0xf]  ;;  %v418_v29 = vld [vmem:[%s9280_s27 + $0x3] sm:$0xff]  ;;  %vm1425_vm9 = vcmask 1044480   ;;  %vm1633_vm10 = vcmask 261120  }
  0x32   :  { %5641 = vmatprep.subr.bf16.mxu0 %v5640_v17  ;;  %v664_v27 = vld [vmem:[%s9258_s3 + $0x70] sm:$0xff]  ;;  %v665_v28 = vld [vmem:[%s9258_s3 + $0x78] sm:$0xff]  ;;  %v5642_v30 = vpack.c.bf16 %v4761_v23, %v4759_v22  ;;  %v5644_v31 = vpack.c.bf16 %v4766_v25, %v4764_v24  ;;  %v4763_v32 = vld [vmem:[%s9277_s26 + $0x120] sm:$0xff]  ;;  %vm6568_vm11 = vmmov 0   ;;  %vm1799_vm12 = vcmask 64512  }
  0x33   :  { %5667 = vmatpush1.bf16.msra.mxu1 %v5666_v18  ;;  %v4765_v33 = vld [vmem:[%s9277_s26 + $0x130] sm:$0xf]  ;;  %v5672_v34 = vpack.c.bf16 %v665_v28, %v664_v27  ;;  %v666_v35 = vld [vmem:[%s9258_s3 + $0x80] sm:$0xff]  ;;  %v667_v36 = vld [vmem:[%s9258_s3 + $0x88] sm:$0xff]  ;;  %vm1960_vm13 = vcmask 654336   ;;  %vm2303_vm14 = vcmask 1041408  }
  0x34   :  { %4745 = vmatmul.mubr.msk.f32.gmra.mrb[4].mxu0 %vm69_vm3, %v304_v21  ;;  %5668 = vmatprep.subr.bf16.mxu1 %v6567_v13  ;;  %v419_v37 = vld [vmem:[%s9280_s27 + $0xb] sm:$0xff]  ;;  %v5647_v38 = vpack.c.bf16 %v4765_v33, %v4763_v32  ;;  %v5675_v39 = vpack.c.bf16 %v667_v36, %v666_v35  ;;  %v669_v41 = vld [vmem:[%s9258_s3 + $0x98] sm:$0xff]  ;;  %v770_v43 = vld [vmem:[%s9259_s4] sm:$0xff]  ;;  %vm2299_vm15 = vcmask 408576   ;;  %vm2377_vm1 = vcmask 73728  }
  0x35   :  { %509 = vmatprep.mubr.f32.mxu0 %v6565_v7  ;;  %v668_v40 = vld [vmem:[%s9258_s3 + $0x90] sm:$0xff]  ;;  %v771_v44 = vld [vmem:[%s9259_s4 + $0x8] sm:$0xff]  ;;  %v670_v46 = vld [vmem:[%s9258_s3 + $0xa0] sm:$0xff] }
  0x36   :  { %v420_v42 = vld [vmem:[%s9280_s27 + $0x13] sm:$0xff]  ;;  %v5678_v45 = vpack.c.bf16 %v669_v41, %v668_v40  ;;  %v671_v47 = vld [vmem:[%s9258_s3 + $0xa8] sm:$0xff]  ;;  %v5696_v49 = vpack.c.bf16 %v771_v44, %v770_v43  ;;  %v774_v57 = vld [vmem:[%s9259_s4 + $0x20] sm:$0xff] }
  0x37   :  { %5670 = vmatpush1.bf16.msra.mxu1 %v5669_v26  ;;  %v534_v48 = vld [vmem:[%s9280_s27 + $0x4] sm:$0xff]  ;;  %v772_v50 = vld [vmem:[%s9259_s4 + $0x10] sm:$0xff]  ;;  %v773_v51 = vld [vmem:[%s9259_s4 + $0x18] sm:$0xff]  ;;  %v5681_v52 = vpack.c.bf16 %v671_v47, %v670_v46  ;;  %v170_v46 = vlaneseq }
  0x38   :  { %4756 = vmatmul.mubr.msk.f32.vlgmr.msra.gmra.mrb[0].mxu0 %vm69_vm3, %v418_v29  ;;  %5671 = vmatprep.subr.bf16.mxu1 %v6567_v13  ;;  %v672_v53 = vld [vmem:[%s9258_s3 + $0xb0] sm:$0xff]  ;;  %v673_v54 = vld [vmem:[%s9258_s3 + $0xb8] sm:$0xff]  ;;  %v5699_v56 = vpack.c.bf16 %v773_v51, %v772_v50  ;;  %v775_v58 = vld [vmem:[%s9259_s4 + $0x28] sm:$0xff] }
  0x39   :  { %515 = vmatprep.mubr.f32.mxu0 %v6565_v7  ;;  %5643 = vmatpush1.bf16.msra.mxu0 %v5642_v30  ;;  %v535_v55 = vld [vmem:[%s9280_s27 + $0xc] sm:$0xff]  ;;  %v5684_v59 = vpack.c.bf16 %v673_v54, %v672_v53  ;;  %v674_v60 = vld [vmem:[%s9258_s3 + $0xc0] sm:$0xff]  ;;  %v536_v62 = vld [vmem:[%s9280_s27 + $0x14] sm:$0xff]  ;;  %v5702_v63 = vpack.c.bf16 %v775_v58, %v774_v57  ;;  %v171_v47 = vshrl.u32 %v170_v46, 7 }
  0x3a   :  { %5646 = vmatprep.subr.msk.bf16.mxu0 %vm6680_vm2, %v5644_v31  ;;  %v675_v61 = vld [vmem:[%s9258_s3 + $0xc8] sm:$0xff]  ;;  %v776_v0 = vld [vmem:[%s9259_s4 + $0x30] sm:$0xff]  ;;  %v777_v1 = vld [vmem:[%s9259_s4 + $0x38] sm:$0xff] }
  0x3b   :  { %5673 = vmatpush1.bf16.msra.mxu1 %v5672_v34  ;;  %v5687_v2 = vpack.c.bf16 %v675_v61, %v674_v60  ;;  %v676_v3 = vld [vmem:[%s9258_s3 + $0xd0] sm:$0xff]  ;;  %v677_v4 = vld [vmem:[%s9258_s3 + $0xd8] sm:$0xff]  ;;  %v5705_v5 = vpack.c.bf16 %v777_v1, %v776_v0  ;;  %v778_v6 = vld [vmem:[%s9259_s4 + $0x40] sm:$0xff]  ;;  %v7096_v50 = vsub.s32 0, %v171_v47 }
  0x3c   :  { %4757 = vmatmul.mubr.msk.f32.gmra.mrb[2].mxu0 %vm69_vm3, %v419_v37  ;;  %5674 = vmatprep.subr.bf16.mxu1 %v6567_v13  ;;  %v779_v8 = vld [vmem:[%s9259_s4 + $0x48] sm:$0xff]  ;;  %v5690_v9 = vpack.c.bf16 %v677_v4, %v676_v3  ;;  %v780_v12 = vld [vmem:[%s9259_s4 + $0x50] sm:$0xff]  ;;  %v781_v14 = vld [vmem:[%s9259_s4 + $0x58] sm:$0xff] }
  0x3d   :  { %521 = vmatprep.mubr.f32.mxu0 %v6565_v7  ;;  %5649 = vmatpush1.bf16.msk.msra.mxu0 %vm6680_vm2, %v5647_v38  ;;  %v5708_v11 = vpack.c.bf16 %v779_v8, %v778_v6  ;;  %v5711_v15 = vpack.c.bf16 %v781_v14, %v780_v12  ;;  %v782_v16 = vld [vmem:[%s9259_s4 + $0x60] sm:$0xff]  ;;  %v783_v17 = vld [vmem:[%s9259_s4 + $0x68] sm:$0xff]  ;;  %v784_v19 = vld [vmem:[%s9259_s4 + $0x70] sm:$0xff] }
  0x3e   :  { %5695 = vmatprep.subr.bf16.mxu0 %v6567_v13  ;;  %v5714_v18 = vpack.c.bf16 %v783_v17, %v782_v16  ;;  %v785_v20 = vld [vmem:[%s9259_s4 + $0x78] sm:$0xff]  ;;  %v786_v22 = vld [vmem:[%s9259_s4 + $0x80] sm:$0xff]  ;;  %v787_v23 = vld [vmem:[%s9259_s4 + $0x88] sm:$0xff] }
  0x3f   :  { %5676 = vmatpush1.bf16.msra.mxu1 %v5675_v39  ;;  %v5717_v21 = vpack.c.bf16 %v785_v20, %v784_v19  ;;  %v5720_v24 = vpack.c.bf16 %v787_v23, %v786_v22  ;;  %v788_v25 = vld [vmem:[%s9259_s4 + $0x90] sm:$0xff]  ;;  %v789_v26 = vld [vmem:[%s9259_s4 + $0x98] sm:$0xff]  ;;  %v790_v28 = vld [vmem:[%s9259_s4 + $0xa0] sm:$0xff] }
  0x40   :  { %4758 = vmatmul.mubr.msk.f32.gmra.mrb[4].mxu0 %vm69_vm3, %v420_v42  ;;  %5677 = vmatprep.subr.bf16.mxu1 %v6567_v13  ;;  %v5723_v27 = vpack.c.bf16 %v789_v26, %v788_v25  ;;  %v791_v29 = vld [vmem:[%s9259_s4 + $0xa8] sm:$0xff]  ;;  %v792_v31 = vld [vmem:[%s9259_s4 + $0xb0] sm:$0xff]  ;;  %v793_v32 = vld [vmem:[%s9259_s4 + $0xb8] sm:$0xff] }
  0x41   :  { %625 = vmatprep.mubr.f32.mxu0 %v6565_v7  ;;  %v5726_v30 = vpack.c.bf16 %v791_v29, %v790_v28  ;;  %v5729_v33 = vpack.c.bf16 %v793_v32, %v792_v31  ;;  %v794_v34 = vld [vmem:[%s9259_s4 + $0xc0] sm:$0xff]  ;;  %v795_v35 = vld [vmem:[%s9259_s4 + $0xc8] sm:$0xff]  ;;  %v796_v37 = vld [vmem:[%s9259_s4 + $0xd0] sm:$0xff] }
  0x42   :  { %v5732_v36 = vpack.c.bf16 %v795_v35, %v794_v34  ;;  %v797_v38 = vld [vmem:[%s9259_s4 + $0xd8] sm:$0xff]  ;;  %v678_v40 = vld [vmem:[%s9258_s3 + $0xe0] sm:$0xff]  ;;  %v679_v41 = vld [vmem:[%s9258_s3 + $0xe8] sm:$0xff] }
  0x43   :  { %5679 = vmatpush1.bf16.msra.mxu1 %v5678_v45  ;;  %v5735_v39 = vpack.c.bf16 %v797_v38, %v796_v37  ;;  %v798_v42 = vld [vmem:[%s9259_s4 + $0xe0] sm:$0xff]  ;;  %v5693_v43 = vpack.c.bf16 %v679_v41, %v678_v40  ;;  %v799_v44 = vld [vmem:[%s9259_s4 + $0xe8] sm:$0xff]  ;;  %v1057_v26 = vld [vmem:[%s9262_s7 + $0x10] sm:$0xff] }
  0x44   :  { %4769 = vmatmul.mubr.msk.f32.vlgmr.msra.gmra.mrb[0].mxu0 %vm69_vm3, %v534_v48  ;;  %5680 = vmatprep.subr.bf16.mxu1 %v6567_v13  ;;  %v5738_v45 = vpack.c.bf16 %v799_v44, %v798_v42  ;;  %v7091_v48 = vsub.s32 1, %v171_v47  ;;  %v883_v1 = vld [vmem:[%s9260_s5] sm:$0xff]  ;;  %v1056_v23 = vld [vmem:[%s9262_s7 + $0x8] sm:$0xff]  ;;  %v1062_v28 = vld [vmem:[%s9262_s7 + $0x38] sm:$0xff] }
  0x45   :  { %631 = vmatprep.mubr.f32.mxu0 %v6565_v7  ;;  %5697 = vmatpush1.bf16.msra.mxu0 %v5696_v49  ;;  %v57_v49 = vld [vmem:[%s9257_s2] sm:$0x3]  ;;  %v1061_v34 = vld [vmem:[%s9262_s7 + $0x30] sm:$0xff]  ;;  %v1064_v35 = vld [vmem:[%s9262_s7 + $0x48] sm:$0xff] }
  0x46   :  { %5698 = vmatprep.subr.bf16.mxu0 %v6567_v13  ;;  %v177_v51 = vrot.slane %v57_v49, %v7091_v48  ;;  %v967_v22 = vld [vmem:[%s9261_s6] sm:$0xff]  ;;  %v1065_v40 = vld [vmem:[%s9262_s7 + $0x50] sm:$0xff]  ;;  %v1068_v41 = vld [vmem:[%s9262_s7 + $0x68] sm:$0xff] }
  0x47   :  { %5682 = vmatpush1.bf16.msra.mxu1 %v5681_v52  ;;  %v173_v52 = vrot.slane %v57_v49, %v7096_v50  ;;  %v1055_v25 = vld [vmem:[%s9262_s7] sm:$0xff]  ;;  %v1070_v42 = vld [vmem:[%s9262_s7 + $0x78] sm:$0xff]  ;;  %v1069_v46 = vld [vmem:[%s9262_s7 + $0x70] sm:$0xff] }
  0x48   :  { %4770 = vmatmul.mubr.msk.f32.gmra.mrb[2].mxu0 %vm69_vm3, %v535_v55  ;;  %5683 = vmatprep.subr.bf16.mxu1 %v6567_v13  ;;  %v5750_v31 = vpack.c.bf16 %v1057_v26, %v1055_v25  ;;  %v5760_v44 = vpack.c.bf16 %v1070_v42, %v1068_v41  ;;  %v1072_v47 = vld [vmem:[%s9262_s7 + $0x88] sm:$0xff]  ;;  %v1074_v49 = vld [vmem:[%s9262_s7 + $0x98] sm:$0xff] }
  0x49   :  { %637 = vmatprep.mubr.f32.mxu0 %v6565_v7  ;;  %5700 = vmatpush1.bf16.msra.mxu0 %v5699_v56  ;;  %v5005_v10 = vld [vmem:[%s9280_s27 + $0x34] sm:$0xff] }
  0x4a   :  { %5701 = vmatprep.subr.bf16.mxu0 %v6567_v13 }
  0x4b   :  { %5685 = vmatpush1.bf16.msra.mxu1 %v5684_v59 }
  0x4c   :  { %4771 = vmatmul.mubr.msk.f32.gmra.mrb[4].mxu0 %vm69_vm3, %v536_v62  ;;  %5686 = vmatprep.subr.bf16.mxu1 %v6567_v13 }
  0x4d   :  { %5703 = vmatpush1.bf16.msra.mxu0 %v5702_v63 }
  0x4e   :  { %5704 = vmatprep.subr.bf16.mxu0 %v6567_v13 }
  0x4f   :  { %5688 = vmatpush1.bf16.msra.mxu1 %v5687_v2 }
  0x50   :  { %5689 = vmatprep.subr.bf16.mxu1 %v6567_v13 }
  0x51   :  { %5706 = vmatpush1.bf16.msra.mxu0 %v5705_v5 }
  0x52   :  { %5707 = vmatprep.subr.bf16.mxu0 %v6567_v13 }
  0x53   :  { %5691 = vmatpush1.bf16.msra.mxu1 %v5690_v9 }
  0x54   :  { %5692 = vmatprep.subr.bf16.mxu1 %v6567_v13 }
  0x55   :  { %5709 = vmatpush1.bf16.msra.mxu0 %v5708_v11 }
  0x56   :  { %5710 = vmatprep.subr.bf16.mxu0 %v6567_v13 }
  0x57   :  { %5694 = vmatpush1.bf16.msra.mxu1 %v5693_v43 }
  0x59   :  { %5712 = vmatpush1.bf16.msra.mxu0 %v5711_v15 }
  0x5a   :  { %5713 = vmatprep.subr.bf16.mxu0 %v6567_v13 }
  0x5d   :  { %5715 = vmatpush1.bf16.msra.mxu0 %v5714_v18 }
  0x5e   :  { %5716 = vmatprep.subr.bf16.mxu0 %v6567_v13 }
  0x61   :  { %5718 = vmatpush1.bf16.msra.mxu0 %v5717_v21  ;;  %v884_v21 = vld [vmem:[%s9260_s5 + $0x8] sm:$0xf] }
  0x62   :  { %5719 = vmatprep.subr.bf16.mxu0 %v6567_v13 }
  0x65   :  { %5721 = vmatpush1.bf16.msra.mxu0 %v5720_v24  ;;  %v1058_v24 = vld [vmem:[%s9262_s7 + $0x18] sm:$0xff] }
  0x66   :  { %5722 = vmatprep.subr.bf16.mxu0 %v6567_v13  ;;  %v5748_v29 = vpack.c.bf16 %v1058_v24, %v1056_v23  ;;  %v4790_v23 = vld [vmem:[%s9262_s7 + $0x128] sm:$0xff] }
  0x69   :  { %5724 = vmatpush1.bf16.msra.mxu0 %v5723_v27  ;;  %v1060_v27 = vld [vmem:[%s9262_s7 + $0x28] sm:$0xff] }
  0x6a   :  { %5725 = vmatprep.subr.bf16.mxu0 %v6567_v13  ;;  %v5752_v32 = vpack.c.bf16 %v1062_v28, %v1060_v27  ;;  %v1617_v27 = vld [vmem:[%s9264_s9 + $0x20] sm:$0xff]  ;;  %v1618_v28 = vld [vmem:[%s9264_s9 + $0x28] sm:$0xff] }
  0x6d   :  { %5727 = vmatpush1.bf16.msra.mxu0 %v5726_v30  ;;  %v968_v30 = vld [vmem:[%s9261_s6 + $0x8] sm:$0xf] }
  0x6e   :  { %5728 = vmatprep.subr.bf16.mxu0 %v6567_v13 }
  0x71   :  { %5730 = vmatpush1.bf16.msra.mxu0 %v5729_v33  ;;  %v1059_v33 = vld [vmem:[%s9262_s7 + $0x20] sm:$0xff] }
  0x72   :  { %5731 = vmatprep.subr.bf16.mxu0 %v6567_v13  ;;  %v5754_v37 = vpack.c.bf16 %v1061_v34, %v1059_v33  ;;  %v4787_v33 = vld [vmem:[%s9262_s7 + $0x110] sm:$0xff] }
  0x75   :  { %5733 = vmatpush1.bf16.msra.mxu0 %v5732_v36  ;;  %v1066_v36 = vld [vmem:[%s9262_s7 + $0x58] sm:$0xff] }
  0x76   :  { %5734 = vmatprep.subr.bf16.mxu0 %v6567_v13  ;;  %v5756_v38 = vpack.c.bf16 %v1066_v36, %v1064_v35  ;;  %v4789_v35 = vld [vmem:[%s9262_s7 + $0x120] sm:$0xff]  ;;  %v4792_v36 = vld [vmem:[%s9262_s7 + $0x138] sm:$0xff] }
  0x79   :  { %5736 = vmatpush1.bf16.msra.mxu0 %v5735_v39  ;;  %v1063_v39 = vld [vmem:[%s9262_s7 + $0x40] sm:$0xff] }
  0x7a   :  { %5737 = vmatprep.subr.bf16.mxu0 %v6567_v13  ;;  %v5758_v43 = vpack.c.bf16 %v1065_v40, %v1063_v39 }
  0x7d   :  { %5739 = vmatpush1.bf16.msra.mxu0 %v5738_v45  ;;  %v1067_v45 = vld [vmem:[%s9262_s7 + $0x60] sm:$0xff] }
  0x7e   :  { %5888 = vmatprep.subr.bf16.mxu0 %v6567_v13 }
 0x117   :  { %v627_v53 = vpop.f32.mrb[0].mxu0 }
 0x118   :  { %v629_v54 = vpop.f32.mrb[1].mxu0  ;;  %v6434_v56 = vadd.f32 %v627_v53, %v173_v52  ;;  %v1071_v53 = vld [vmem:[%s9262_s7 + $0x80] sm:$0xff] }
 0x119   :  { %v6435_v55 = vadd.f32 %v629_v54, %v177_v51  ;;  %v1073_v54 = vld [vmem:[%s9262_s7 + $0x90] sm:$0xff] }
 0x11b   :  { %v633_v57 = vpop.f32.mrb[2].mxu0  ;;  %4772 = vmatprep.mubr.msk.f32.mxu1 %vm680_vm4, %v6435_v55  ;;  %4775 = vmatprep.mubr.msk.f32.mxu0 %vm680_vm4, %v6435_v55  ;;  %v5766_v55 = vpack.c.bf16 %v1073_v54, %v1071_v53  ;;  %v4791_v53 = vld [vmem:[%s9262_s7 + $0x130] sm:$0xff]  ;;  %v4793_v54 = vld [vmem:[%s9262_s7 + $0x140] sm:$0xff] }
 0x11c   :  { %v635_v58 = vpop.f32.mrb[3].mxu0  ;;  %755 = vmatmul.mubr.f32.vlgmr.msra.gmra.mrb[0].mxu1 %v6434_v56  ;;  %865 = vmatmul.mubr.f32.vlgmr.msra.gmra.mrb[6].mxu0 %v6434_v56  ;;  %v6436_v60 = vadd.f32 %v633_v57, %v173_v52  ;;  %v1076_v56 = vld [vmem:[%s9262_s7 + $0xa8] sm:$0xff]  ;;  %v1078_v57 = vld [vmem:[%s9262_s7 + $0xb8] sm:$0xff] }
 0x11d   :  { %v6437_v59 = vadd.f32 %v635_v58, %v177_v51  ;;  %v5768_v58 = vpack.c.bf16 %v1078_v57, %v1076_v56 }
 0x11f   :  { %v639_v61 = vpop.f32.mrb[4].mxu0  ;;  %4773 = vmatprep.mubr.msk.f32.mxu1 %vm680_vm4, %v6437_v59  ;;  %4776 = vmatprep.mubr.msk.f32.mxu0 %vm680_vm4, %v6437_v59  ;;  %v1075_v59 = vld [vmem:[%s9262_s7 + $0xa0] sm:$0xff] }
 0x120   :  { %v641_v62 = vpop.f32.mrb[5].mxu0  ;;  %760 = vmatmul.mubr.f32.gmra.mrb[2].mxu1 %v6436_v60  ;;  %870 = vmatmul.mubr.f32.gmra.mrb[8].mxu0 %v6436_v60  ;;  %v6438_v0 = vadd.f32 %v639_v61, %v173_v52  ;;  %v5764_v52 = vpack.c.bf16 %v1074_v49, %v1072_v47  ;;  %v1077_v60 = vld [vmem:[%s9262_s7 + $0xb0] sm:$0xff]  ;;  %v1620_v49 = vld [vmem:[%s9264_s9 + $0x38] sm:$0xff] }
 0x121   :  { %v6439_v63 = vadd.f32 %v641_v62, %v177_v51  ;;  %v5762_v51 = vpack.c.bf16 %v1069_v46, %v1067_v45  ;;  %v5770_v61 = vpack.c.bf16 %v1077_v60, %v1075_v59  ;;  %v1080_v62 = vld [vmem:[%s9262_s7 + $0xc8] sm:$0xff]  ;;  %v1619_v47 = vld [vmem:[%s9264_s9 + $0x30] sm:$0xff]  ;;  %v4796_v59 = vld [vmem:[%s9262_s7 + $0x158] sm:$0xff] }
 0x122   :  { %v4798_v60 = vld [vmem:[%s9262_s7 + $0x168] sm:$0xff] }
 0x123   :  { %4774 = vmatprep.mubr.msk.f32.mxu1 %vm680_vm4, %v6439_v63  ;;  %4777 = vmatprep.mubr.msk.f32.mxu0 %vm680_vm4, %v6439_v63  ;;  %v1082_v63 = vld [vmem:[%s9262_s7 + $0xd8] sm:$0xff] }
 0x124   :  { %765 = vmatmul.mubr.f32.gmra.mrb[4].mxu1 %v6438_v0  ;;  %875 = vmatmul.mubr.f32.gmra.mrb[10].mxu0 %v6438_v0  ;;  %v5772_v0 = vpack.c.bf16 %v1082_v63, %v1080_v62  ;;  %v1621_v62 = vld [vmem:[%s9264_s9 + $0x40] sm:$0xff]  ;;  %v1622_v63 = vld [vmem:[%s9264_s9 + $0x48] sm:$0xff] }
 0x125   :  { %5332 = vmatprep.mubr.msk.f32.mxu1 %vm885_vm5, %v883_v1  ;;  %v1079_v1 = vld [vmem:[%s9262_s7 + $0xc0] sm:$0xff] }
 0x1ef   :  { %v756_v2 = vpop.f32.mrb[0].mxu1  ;;  %v866_v3 = vpop.f32.mrb[6].mxu0 }
 0x1f0   :  { %v880_v4 = vmax.f32 %v756_v2, %v866_v3  ;;  %v758_v5 = vpop.f32.mrb[1].mxu1  ;;  %v868_v6 = vpop.f32.mrb[7].mxu0  ;;  %v1081_v2 = vld [vmem:[%s9262_s7 + $0xd0] sm:$0xff] }
 0x1f1   :  { %v5774_v3 = vpack.c.bf16 %v1081_v2, %v1079_v1  ;;  %v4784_v5 = vld [vmem:[%s9262_s7 + $0xf8] sm:$0xff]  ;;  %v4786_v6 = vld [vmem:[%s9262_s7 + $0x108] sm:$0xff]  ;;  %v5788_v1 = vpack.c.bf16 %v4798_v60, %v4796_v59  ;;  %v4795_v2 = vld [vmem:[%s9262_s7 + $0x150] sm:$0xff] }
 0x1f2   :  { %v4825_v59 = vld [vmem:[%s9262_s7 + $0x238] sm:$0xff] }
 0x1f3   :  { %v761_v8 = vpop.f32.mrb[2].mxu1  ;;  %v871_v9 = vpop.f32.mrb[8].mxu0 }
 0x1f4   :  { %v881_v11 = vmax.f32 %v761_v8, %v871_v9  ;;  %v763_v12 = vpop.f32.mrb[3].mxu1  ;;  %v873_v14 = vpop.f32.mrb[9].mxu0  ;;  %v1083_v8 = vld [vmem:[%s9262_s7 + $0xe0] sm:$0xff]  ;;  %v5776_v9 = vpack.c.bf16 %v4786_v6, %v4784_v5  ;;  %v4802_v5 = vld [vmem:[%s9262_s7 + $0x188] sm:$0xff]  ;;  %v5901_v6 = vpack.c.bf16 %v1622_v63, %v1621_v62  ;;  %v4824_v63 = vld [vmem:[%s9262_s7 + $0x230] sm:$0xff] }
 0x1f5   :  { %v1613_v14 = vld [vmem:[%s9264_s9] sm:$0xff] }
 0x1f6   :  { %v5740_v15 = vpack.c.bf16 %v881_v11, %v880_v4  ;;  %v1084_v4 = vld [vmem:[%s9262_s7 + $0xe8] sm:$0xff]  ;;  %v4822_v62 = vld [vmem:[%s9262_s7 + $0x220] sm:$0xff] }
 0x1f7   :  { %v766_v16 = vpop.f32.mrb[4].mxu1  ;;  %v876_v17 = vpop.f32.mrb[10].mxu0 }
 0x1f8   :  { %v882_v18 = vmax.f32 %v766_v16, %v876_v17  ;;  %v768_v19 = vpop.f32.mrb[5].mxu1  ;;  %v878_v20 = vpop.f32.mrb[11].mxu0  ;;  %5741 = vmatprep.subr.bf16.mxu1 %v5740_v15  ;;  %v1615_v16 = vld [vmem:[%s9264_s9 + $0x10] sm:$0xff] }
 0x1f9   :  { %5743 = vmatpush3.bf16.msra.mxu1 %v5740_v15  ;;  %v4783_v17 = vld [vmem:[%s9262_s7 + $0xf0] sm:$0xff]  ;;  %v1616_v20 = vld [vmem:[%s9264_s9 + $0x18] sm:$0xff] }
 0x1fa   :  { %5330 = vmatprep.subr.mxu1 %v882_v18  ;;  %v5892_v26 = vpack.c.bf16 %v1616_v20, %v1615_v16  ;;  %v4804_v16 = vld [vmem:[%s9262_s7 + $0x198] sm:$0xff]  ;;  %v1626_v20 = vld [vmem:[%s9264_s9 + $0x68] sm:$0xff] }
 0x1fd   :  { %5331 = vmatpush3.msra.mxu1 %v882_v18 }
 0x1fe   :  { %5333 = vmatmul.mubr.msk.f32.vlgmr.msra.gmra.mrb[6].mxu1 %vm885_vm5, %v884_v21  ;;  %5745 = vmatprep.subr.bf16.mxu1 %v5740_v15 }
 0x1ff   :  { %5747 = vmatpush3.bf16.msra.mxu1 %v5740_v15  ;;  %5341 = vmatprep.mubr.msk.f32.mxu1 %vm885_vm5, %v967_v22  ;;  %v1614_v15 = vld [vmem:[%s9264_s9 + $0x8] sm:$0xff]  ;;  %v4788_v22 = vld [vmem:[%s9262_s7 + $0x118] sm:$0xff] }
 0x200   :  { %5339 = vmatprep.subr.mxu1 %v882_v18  ;;  %v5889_v19 = vpack.c.bf16 %v1614_v15, %v1613_v14  ;;  %v4799_v14 = vld [vmem:[%s9262_s7 + $0x170] sm:$0xff]  ;;  %v4801_v15 = vld [vmem:[%s9262_s7 + $0x180] sm:$0xff] }
 0x202   :  { %5890 = vmatpush1.bf16.msra.mxu0 %v5889_v19  ;;  %v1625_v19 = vld [vmem:[%s9264_s9 + $0x60] sm:$0xff] }
 0x203   :  { %5340 = vmatpush3.msra.mxu1 %v882_v18  ;;  %v4785_v18 = vld [vmem:[%s9262_s7 + $0x100] sm:$0xff]  ;;  %5891 = vmatprep.subr.bf16.mxu0 %v6567_v13 }
 0x204   :  { %5342 = vmatmul.mubr.msk.f32.vlgmr.msra.gmra.mrb[8].mxu1 %vm885_vm5, %v968_v30  ;;  %5749 = vmatprep.subr.bf16.mxu1 %v5748_v29  ;;  %v5778_v30 = vpack.c.bf16 %v4785_v18, %v4783_v17  ;;  %v4806_v17 = vld [vmem:[%s9262_s7 + $0x1a8] sm:$0xff] }
 0x205   :  { %5751 = vmatpush1.bf16.msra.mxu1 %v5750_v31  ;;  %1153 = vmatprep.mubr.f32.mxu1 %v6565_v7 }
 0x206   :  { %5753 = vmatprep.subr.bf16.mxu1 %v5752_v32  ;;  %v5780_v32 = vpack.c.bf16 %v4790_v23, %v4788_v22  ;;  %5893 = vmatpush1.bf16.msra.mxu0 %v5892_v26  ;;  %v5796_v22 = vpack.c.bf16 %v4806_v17, %v4804_v16  ;;  %v4803_v23 = vld [vmem:[%s9262_s7 + $0x190] sm:$0xff]  ;;  %v4810_v26 = vld [vmem:[%s9262_s7 + $0x1c8] sm:$0xff] }
 0x207   :  { %5894 = vmatprep.subr.bf16.mxu0 %v6567_v13 }
 0x209   :  { %5755 = vmatpush1.bf16.msra.mxu1 %v5754_v37  ;;  %v4794_v37 = vld [vmem:[%s9262_s7 + $0x148] sm:$0xff] }
 0x20a   :  { %5757 = vmatprep.subr.bf16.mxu1 %v5756_v38  ;;  %v5895_v38 = vpack.c.bf16 %v1618_v28, %v1617_v27  ;;  %v5907_v27 = vpack.c.bf16 %v1626_v20, %v1625_v19  ;;  %v1627_v28 = vld [vmem:[%s9264_s9 + $0x70] sm:$0xff]  ;;  %v4839_v20 = vld [vmem:[%s9262_s7 + $0x2a8] sm:$0xff] }
 0x20b   :  { %v4836_v19 = vld [vmem:[%s9262_s7 + $0x290] sm:$0xff] }
 0x20c   :  { %5896 = vmatpush1.bf16.msra.mxu0 %v5895_v38  ;;  %v4812_v38 = vld [vmem:[%s9262_s7 + $0x1d8] sm:$0xff] }
 0x20d   :  { %5759 = vmatpush1.bf16.msra.mxu1 %v5758_v43  ;;  %5897 = vmatprep.subr.bf16.mxu0 %v6567_v13 }
 0x20e   :  { %5761 = vmatprep.subr.bf16.mxu1 %v5760_v44 }
 0x211   :  { %5763 = vmatpush1.bf16.msra.mxu1 %v5762_v51  ;;  %v5782_v51 = vpack.c.bf16 %v4789_v35, %v4787_v33  ;;  %v4809_v33 = vld [vmem:[%s9262_s7 + $0x1c0] sm:$0xff] }
 0x212   :  { %5765 = vmatprep.subr.bf16.mxu1 %v5764_v52  ;;  %v5784_v52 = vpack.c.bf16 %v4794_v37, %v4792_v36  ;;  %v1629_v35 = vld [vmem:[%s9264_s9 + $0x80] sm:$0xff]  ;;  %v1630_v36 = vld [vmem:[%s9264_s9 + $0x88] sm:$0xff] }
 0x215   :  { %5767 = vmatpush1.bf16.msra.mxu1 %v5766_v55 }
 0x216   :  { %5769 = vmatprep.subr.bf16.mxu1 %v5768_v58 }
 0x219   :  { %5771 = vmatpush1.bf16.msra.mxu1 %v5770_v61  ;;  %v5898_v61 = vpack.c.bf16 %v1620_v49, %v1619_v47 }
 0x21a   :  { %5773 = vmatprep.subr.bf16.mxu1 %v5772_v0  ;;  %v5786_v0 = vpack.c.bf16 %v4793_v54, %v4791_v53  ;;  %v4820_v53 = vld [vmem:[%s9262_s7 + $0x210] sm:$0xff]  ;;  %v4823_v54 = vld [vmem:[%s9262_s7 + $0x228] sm:$0xff] }
 0x21b   :  { %5899 = vmatpush1.bf16.msra.mxu0 %v5898_v61  ;;  %v5812_v61 = vpack.c.bf16 %v4825_v59, %v4823_v54  ;;  %v4864_v54 = vld [vmem:[%s9262_s7 + $0x368] sm:$0xff] }
 0x21c   :  { %5900 = vmatprep.subr.bf16.mxu0 %v6567_v13 }
 0x21d   :  { %5775 = vmatpush1.bf16.msra.mxu1 %v5774_v3  ;;  %v4797_v3 = vld [vmem:[%s9262_s7 + $0x160] sm:$0xff] }
 0x21e   :  { %1117 = vmatprep.subr.mxu1 %v1084_v4  ;;  %v4800_v4 = vld [vmem:[%s9262_s7 + $0x178] sm:$0xff] }
 0x21f   :  { %5902 = vmatpush1.bf16.msra.mxu0 %v5901_v6  ;;  %v4833_v6 = vld [vmem:[%s9262_s7 + $0x278] sm:$0xff] }
 0x220   :  { %5903 = vmatprep.subr.bf16.mxu0 %v6567_v13 }
 0x221   :  { %1118 = vmatpush1.msra.mxu1 %v1083_v8  ;;  %v1623_v8 = vld [vmem:[%s9264_s9 + $0x50] sm:$0xff] }
 0x222   :  { %5777 = vmatprep.subr.bf16.mxu1 %v5776_v9  ;;  %v1624_v9 = vld [vmem:[%s9264_s9 + $0x58] sm:$0xff] }
 0x223   :  { %v5904_v18 = vpack.c.bf16 %v1624_v9, %v1623_v8 }
 0x225   :  { %5905 = vmatpush1.bf16.msra.mxu0 %v5904_v18  ;;  %v4834_v18 = vld [vmem:[%s9262_s7 + $0x280] sm:$0xff] }
 0x226   :  { %5906 = vmatprep.subr.bf16.mxu0 %v6567_v13 }
 0x229   :  { %5908 = vmatpush1.bf16.msra.mxu0 %v5907_v27  ;;  %v4843_v27 = vld [vmem:[%s9262_s7 + $0x2c8] sm:$0xff] }
 0x22a   :  { %5909 = vmatprep.subr.bf16.mxu0 %v6567_v13 }
 0x2d1   :  { %v5334_v11 = vpop.f32.mrb[6].mxu1 }
 0x2d2   :  { %v958_v12 = vpop.f32.mrb[7].mxu1 }
 0x2d7   :  { %v5343_v21 = vpop.f32.mrb[8].mxu1 }
 0x2d8   :  { %v1051_v24 = vmax.f32 %v5334_v11, %v5343_v21  ;;  %v1041_v25 = vpop.f32.mrb[9].mxu1  ;;  %v5790_v11 = vpack.c.bf16 %v4797_v3, %v4795_v2  ;;  %v5794_v21 = vpack.c.bf16 %v4801_v15, %v4799_v14  ;;  %v4826_v3 = vld [vmem:[%s9262_s7 + $0x240] sm:$0xff]  ;;  %v4835_v14 = vld [vmem:[%s9262_s7 + $0x288] sm:$0xff]  ;;  %v4837_v15 = vld [vmem:[%s9262_s7 + $0x298] sm:$0xff] }
 0x2d9   :  { %v1050_v29 = vmax.f32 %v958_v12, %v1041_v25  ;;  %v5792_v12 = vpack.c.bf16 %v4802_v5, %v4800_v4  ;;  %v4808_v25 = vld [vmem:[%s9262_s7 + $0x1b8] sm:$0xff]  ;;  %v4828_v4 = vld [vmem:[%s9262_s7 + $0x250] sm:$0xff]  ;;  %v4831_v5 = vld [vmem:[%s9262_s7 + $0x268] sm:$0xff]  ;;  %v5824_v17 = vpack.c.bf16 %v4837_v15, %v4835_v14 }
 0x2da   :  { %v1053_v31 = vmax.f32 %v1051_v24, 0.0  ;;  %v4805_v24 = vld [vmem:[%s9262_s7 + $0x1a0] sm:$0xff]  ;;  %v5818_v8 = vpack.c.bf16 %v4828_v4, %v4826_v3  ;;  %v5820_v9 = vpack.c.bf16 %v4833_v6, %v4831_v5  ;;  %v4870_v4 = vld [vmem:[%s9262_s7 + $0x398] sm:$0xff]  ;;  %v4872_v5 = vld [vmem:[%s9262_s7 + $0x3a8] sm:$0xff] }
 0x2db   :  { %v1052_v34 = vmax.f32 %v1050_v29, 0.0  ;;  %v1628_v29 = vld [vmem:[%s9264_s9 + $0x78] sm:$0xff]  ;;  %v4867_v3 = vld [vmem:[%s9262_s7 + $0x380] sm:$0xff]  ;;  %v4877_v15 = vld [vmem:[%s9262_s7 + $0x3c8] sm:$0xff] }
 0x2dc   :  { %v1207_v39 = vrot.slane %v1053_v31, 1  ;;  %v1317_v40 = vrot.slane %v1053_v31, 2  ;;  %v1427_v41 = vrot.slane %v1053_v31, 3  ;;  %v1536_v42 = vrot.slane %v1053_v31, 4  ;;  %v4874_v14 = vld [vmem:[%s9262_s7 + $0x3b8] sm:$0xff] }
 0x2dd   :  { %4782 = vmatmul.mubr.msk.f32.vlgmr.msra.gmra.mrb[10].mxu1 %vm1085_vm6, %v1052_v34  ;;  %v1206_v43 = vrot.slane %v1052_v34, 1  ;;  %v1316_v44 = vrot.slane %v1052_v34, 2  ;;  %v1426_v45 = vrot.slane %v1052_v34, 3  ;;  %v1535_v46 = vrot.slane %v1052_v34, 4 }
 0x2de   :  { %5779 = vmatpush1.bf16.msra.mxu1 %v5778_v30  ;;  %1275 = vmatprep.mubr.f32.mxu1 %v6565_v7  ;;  %v5798_v30 = vpack.c.bf16 %v4805_v24, %v4803_v23  ;;  %v5800_v31 = vpack.c.bf16 %v4810_v26, %v4808_v25  ;;  %v5910_v34 = vpack.c.bf16 %v1628_v29, %v1627_v28  ;;  %v4838_v24 = vld [vmem:[%s9262_s7 + $0x2a0] sm:$0xff]  ;;  %v4840_v25 = vld [vmem:[%s9262_s7 + $0x2b0] sm:$0xff]  ;;  %v4846_v28 = vld [vmem:[%s9262_s7 + $0x2d8] sm:$0xff] }
 0x2df   :  { %5781 = vmatprep.subr.bf16.mxu1 %v5780_v32  ;;  %v7278_v55 = vsel %vm1205_vm7, %v1206_v43, %v1207_v39  ;;  %v7281_v56 = vsel %vm1315_vm8, %v1316_v44, %v1317_v40  ;;  %v7284_v57 = vsel %vm1425_vm9, %v1426_v45, %v1427_v41  ;;  %v7287_v58 = vsel %vm79_vm0, %v1535_v46, %v1536_v42  ;;  %v4807_v32 = vld [vmem:[%s9262_s7 + $0x1b0] sm:$0xff]  ;;  %v4815_v39 = vld [vmem:[%s9262_s7 + $0x1e8] sm:$0xff]  ;;  %v4817_v40 = vld [vmem:[%s9262_s7 + $0x1f8] sm:$0xff] }
 0x2e0   :  { %v5802_v37 = vpack.c.bf16 %v4809_v33, %v4807_v32  ;;  %5911 = vmatpush1.bf16.msra.mxu0 %v5910_v34  ;;  %v5913_v41 = vpack.c.bf16 %v1630_v36, %v1629_v35  ;;  %v4814_v42 = vld [vmem:[%s9262_s7 + $0x1e0] sm:$0xff]  ;;  %v4816_v43 = vld [vmem:[%s9262_s7 + $0x1f0] sm:$0xff]  ;;  %v4819_v44 = vld [vmem:[%s9262_s7 + $0x208] sm:$0xff]  ;;  %v5804_v47 = vpack.c.bf16 %v4817_v40, %v4815_v39  ;;  %v5830_v26 = vpack.c.bf16 %v4840_v25, %v4838_v24 }
 0x2e1   :  { %5912 = vmatprep.subr.bf16.mxu0 %v6567_v13  ;;  %v4821_v45 = vld [vmem:[%s9262_s7 + $0x218] sm:$0xff]  ;;  %v4811_v46 = vld [vmem:[%s9262_s7 + $0x1d0] sm:$0xff]  ;;  %v5806_v49 = vpack.c.bf16 %v4816_v43, %v4814_v42  ;;  %v4848_v29 = vld [vmem:[%s9262_s7 + $0x2e8] sm:$0xff] }
 0x2e2   :  { %5783 = vmatpush1.bf16.msra.mxu1 %v5782_v51  ;;  %v5808_v51 = vpack.c.bf16 %v4821_v45, %v4819_v44  ;;  %v4850_v32 = vld [vmem:[%s9262_s7 + $0x2f8] sm:$0xff]  ;;  %v4852_v33 = vld [vmem:[%s9262_s7 + $0x308] sm:$0xff]  ;;  %v4842_v34 = vld [vmem:[%s9262_s7 + $0x2c0] sm:$0xff]  ;;  %v5832_v35 = vpack.c.bf16 %v4848_v29, %v4846_v28 }
 0x2e3   :  { %5785 = vmatprep.subr.bf16.mxu1 %v5784_v52  ;;  %v4818_v52 = vld [vmem:[%s9262_s7 + $0x200] sm:$0xff]  ;;  %v4854_v40 = vld [vmem:[%s9262_s7 + $0x318] sm:$0xff]  ;;  %v4853_v44 = vld [vmem:[%s9262_s7 + $0x310] sm:$0xff] }
 0x2e4   :  { %5914 = vmatpush1.bf16.msra.mxu0 %v5913_v41  ;;  %v5810_v60 = vpack.c.bf16 %v4820_v53, %v4818_v52  ;;  %v4851_v39 = vld [vmem:[%s9262_s7 + $0x300] sm:$0xff]  ;;  %v4856_v41 = vld [vmem:[%s9262_s7 + $0x328] sm:$0xff]  ;;  %v4862_v53 = vld [vmem:[%s9262_s7 + $0x358] sm:$0xff] }
 0x2e5   :  { %5915 = vmatprep.subr.bf16.mxu0 %v6567_v13  ;;  %v5840_v43 = vpack.c.bf16 %v4856_v41, %v4854_v40  ;;  %v4855_v45 = vld [vmem:[%s9262_s7 + $0x320] sm:$0xff]  ;;  %v4887_v28 = vld [vmem:[%s9262_s7 + $0x418] sm:$0xff] }
 0x2e6   :  { %5787 = vmatpush1.bf16.msra.mxu1 %v5786_v0  ;;  %v4827_v0 = vld [vmem:[%s9262_s7 + $0x248] sm:$0xff]  ;;  %v4859_v52 = vld [vmem:[%s9262_s7 + $0x340] sm:$0xff] }
 0x2e7   :  { %5789 = vmatprep.subr.bf16.mxu1 %v5788_v1  ;;  %v5814_v1 = vpack.c.bf16 %v4824_v63, %v4822_v62  ;;  %v4863_v62 = vld [vmem:[%s9262_s7 + $0x360] sm:$0xff]  ;;  %v4866_v63 = vld [vmem:[%s9262_s7 + $0x378] sm:$0xff] }
 0x2e8   :  { %v4880_v25 = vld [vmem:[%s9262_s7 + $0x3e0] sm:$0xff] }
 0x2ea   :  { %5791 = vmatpush1.bf16.msra.mxu1 %v5790_v11  ;;  %v4830_v11 = vld [vmem:[%s9262_s7 + $0x260] sm:$0xff] }
 0x2eb   :  { %5793 = vmatprep.subr.bf16.mxu1 %v5792_v12  ;;  %v4832_v12 = vld [vmem:[%s9262_s7 + $0x270] sm:$0xff] }
 0x2ec   :  { %v5822_v16 = vpack.c.bf16 %v4832_v12, %v4830_v11  ;;  %v4871_v11 = vld [vmem:[%s9262_s7 + $0x3a0] sm:$0xff] }
 0x2ee   :  { %5795 = vmatpush1.bf16.msra.mxu1 %v5794_v21  ;;  %v4841_v21 = vld [vmem:[%s9262_s7 + $0x2b8] sm:$0xff] }
 0x2ef   :  { %5797 = vmatprep.subr.bf16.mxu1 %v5796_v22  ;;  %v5826_v22 = vpack.c.bf16 %v4836_v19, %v4834_v18  ;;  %v5828_v23 = vpack.c.bf16 %v4841_v21, %v4839_v20  ;;  %v4878_v18 = vld [vmem:[%s9262_s7 + $0x3d0] sm:$0xff]  ;;  %v4881_v19 = vld [vmem:[%s9262_s7 + $0x3e8] sm:$0xff]  ;;  %v4883_v20 = vld [vmem:[%s9262_s7 + $0x3f8] sm:$0xff] }
 0x2f0   :  { %v4873_v21 = vld [vmem:[%s9262_s7 + $0x3b0] sm:$0xff]  ;;  %v5864_v24 = vpack.c.bf16 %v4883_v20, %v4881_v19 }
 0x2f1   :  { %v1713_v20 = vld [vmem:[%s9265_s10 + $0x30] sm:$0xff] }
 0x2f2   :  { %5799 = vmatpush1.bf16.msra.mxu1 %v5798_v30  ;;  %v4845_v30 = vld [vmem:[%s9262_s7 + $0x2d0] sm:$0xff] }
 0x2f3   :  { %5801 = vmatprep.subr.bf16.mxu1 %v5800_v31  ;;  %v4847_v31 = vld [vmem:[%s9262_s7 + $0x2e0] sm:$0xff] }
 0x2f4   :  { %v5834_v36 = vpack.c.bf16 %v4847_v31, %v4845_v30  ;;  %v4884_v31 = vld [vmem:[%s9262_s7 + $0x400] sm:$0xff] }
 0x2f6   :  { %5803 = vmatpush1.bf16.msra.mxu1 %v5802_v37  ;;  %v5836_v37 = vpack.c.bf16 %v4852_v33, %v4850_v32  ;;  %v4886_v32 = vld [vmem:[%s9262_s7 + $0x410] sm:$0xff]  ;;  %v4889_v33 = vld [vmem:[%s9262_s7 + $0x428] sm:$0xff] }
 0x2f7   :  { %1239 = vmatprep.subr.mxu1 %v4812_v38  ;;  %v4849_v38 = vld [vmem:[%s9262_s7 + $0x2f0] sm:$0xff] }
 0x2f8   :  { %v5838_v42 = vpack.c.bf16 %v4851_v39, %v4849_v38  ;;  %v4893_v38 = vld [vmem:[%s9262_s7 + $0x448] sm:$0xff]  ;;  %v4895_v39 = vld [vmem:[%s9262_s7 + $0x458] sm:$0xff] }
 0x2f9   :  { %v5876_v41 = vpack.c.bf16 %v4895_v39, %v4893_v38  ;;  %v1726_v38 = vld [vmem:[%s9265_s10 + $0x98] sm:$0xff] }
 0x2fa   :  { %1240 = vmatpush1.msra.mxu1 %v4811_v46  ;;  %v4858_v46 = vld [vmem:[%s9262_s7 + $0x338] sm:$0xff] }
 0x2fb   :  { %4813 = vmatmul.mubr.msk.f32.vlgmr.msra.gmra.mrb[10].mxu1 %vm1085_vm6, %v7278_v55  ;;  %5805 = vmatprep.subr.bf16.mxu1 %v5804_v47  ;;  %v4829_v55 = vld [vmem:[%s9262_s7 + $0x258] sm:$0xff]  ;;  %v5842_v47 = vpack.c.bf16 %v4855_v45, %v4853_v44  ;;  %v4897_v44 = vld [vmem:[%s9262_s7 + $0x468] sm:$0xff] }
 0x2fc   :  { %5807 = vmatpush1.bf16.msra.mxu1 %v5806_v49  ;;  %1385 = vmatprep.mubr.f32.mxu1 %v6565_v7  ;;  %v5816_v2 = vpack.c.bf16 %v4829_v55, %v4827_v0  ;;  %v4868_v0 = vld [vmem:[%s9262_s7 + $0x388] sm:$0xff]  ;;  %v4899_v45 = vld [vmem:[%s9262_s7 + $0x478] sm:$0xff] }
 0x2fd   :  { %5809 = vmatprep.subr.bf16.mxu1 %v5808_v51  ;;  %v4857_v51 = vld [vmem:[%s9262_s7 + $0x330] sm:$0xff] }
 0x2fe   :  { %v5846_v59 = vpack.c.bf16 %v4859_v52, %v4857_v51  ;;  %v4901_v51 = vld [vmem:[%s9262_s7 + $0x488] sm:$0xff]  ;;  %v4903_v52 = vld [vmem:[%s9262_s7 + $0x498] sm:$0xff] }
 0x300   :  { %5811 = vmatpush1.bf16.msra.mxu1 %v5810_v60  ;;  %v5848_v60 = vpack.c.bf16 %v4864_v54, %v4862_v53  ;;  %v5884_v54 = vpack.c.bf16 %v4903_v52, %v4901_v51  ;;  %v1952_v51 = vld [vmem:[%s9268_s13 + $0x10] sm:$0xff]  ;;  %v1953_v52 = vld [vmem:[%s9268_s13 + $0x18] sm:$0xff] }
 0x301   :  { %5813 = vmatprep.subr.bf16.mxu1 %v5812_v61  ;;  %v4861_v61 = vld [vmem:[%s9262_s7 + $0x350] sm:$0xff] }
 0x302   :  { %v5850_v55 = vpack.c.bf16 %v4863_v62, %v4861_v61  ;;  %v4905_v62 = vld [vmem:[%s9262_s7 + $0x4a8] sm:$0xff] }
 0x304   :  { %5815 = vmatpush1.bf16.msra.mxu1 %v5814_v1  ;;  %v5852_v1 = vpack.c.bf16 %v4868_v0, %v4866_v63  ;;  %v4904_v63 = vld [vmem:[%s9262_s7 + $0x4a0] sm:$0xff]  ;;  %v1631_v0 = vld [vmem:[%s9264_s9 + $0x90] sm:$0xff] }
 0x305   :  { %5817 = vmatprep.subr.bf16.mxu1 %v5816_v2  ;;  %v4865_v2 = vld [vmem:[%s9262_s7 + $0x370] sm:$0xff] }
 0x306   :  { %v5854_v6 = vpack.c.bf16 %v4867_v3, %v4865_v2  ;;  %v1054_v2 = vld [vmem:[%s9263_s8] sm:$0x3] }
 0x307   :  { %v1164_v3 = vrot.slane %v1054_v2, %v7096_v50 }
 0x308   :  { %5819 = vmatpush1.bf16.msra.mxu1 %v5818_v8  ;;  %v5856_v8 = vpack.c.bf16 %v4872_v5, %v4870_v4  ;;  %v1707_v4 = vld [vmem:[%s9265_s10] sm:$0xff]  ;;  %v1708_v5 = vld [vmem:[%s9265_s10 + $0x8] sm:$0xff] }
 0x309   :  { %5821 = vmatprep.subr.bf16.mxu1 %v5820_v9  ;;  %v4869_v9 = vld [vmem:[%s9262_s7 + $0x390] sm:$0xff] }
 0x30a   :  { %v5858_v12 = vpack.c.bf16 %v4871_v11, %v4869_v9  ;;  %v5919_v11 = vpack.c.bf16 %v1708_v5, %v1707_v4  ;;  %v2294_v5 = vld [vmem:[%s9270_s15 + $0x18] sm:$0xff] }
 0x30c   :  { %5823 = vmatpush1.bf16.msra.mxu1 %v5822_v16  ;;  %v4879_v16 = vld [vmem:[%s9262_s7 + $0x3d8] sm:$0xff] }
 0x30d   :  { %5825 = vmatprep.subr.bf16.mxu1 %v5824_v17  ;;  %v4876_v17 = vld [vmem:[%s9262_s7 + $0x3c0] sm:$0xff] }
 0x310   :  { %5827 = vmatpush1.bf16.msra.mxu1 %v5826_v22  ;;  %v5860_v22 = vpack.c.bf16 %v4879_v16, %v4877_v15  ;;  %v1710_v15 = vld [vmem:[%s9265_s10 + $0x18] sm:$0xff] }
 0x311   :  { %5829 = vmatprep.subr.bf16.mxu1 %v5828_v23  ;;  %v5862_v23 = vpack.c.bf16 %v4878_v18, %v4876_v17  ;;  %v1711_v17 = vld [vmem:[%s9265_s10 + $0x20] sm:$0xff]  ;;  %v1712_v18 = vld [vmem:[%s9265_s10 + $0x28] sm:$0xff] }
 0x312   :  { %v5925_v19 = vpack.c.bf16 %v1712_v18, %v1711_v17 }
 0x314   :  { %5831 = vmatpush1.bf16.msra.mxu1 %v5830_v26  ;;  %v4882_v26 = vld [vmem:[%s9262_s7 + $0x3f0] sm:$0xff] }
 0x315   :  { %1349 = vmatprep.subr.mxu1 %v4843_v27  ;;  %v4885_v27 = vld [vmem:[%s9262_s7 + $0x408] sm:$0xff]  ;;  %v5866_v29 = vpack.c.bf16 %v4882_v26, %v4880_v25  ;;  %v1717_v26 = vld [vmem:[%s9265_s10 + $0x50] sm:$0xff] }
 0x316   :  { %v5868_v30 = vpack.c.bf16 %v4887_v28, %v4885_v27  ;;  %v1718_v27 = vld [vmem:[%s9265_s10 + $0x58] sm:$0xff] }
 0x317   :  { %v5934_v28 = vpack.c.bf16 %v1718_v27, %v1717_v26  ;;  %v4917_v26 = vld [vmem:[%s9268_s13 + $0x78] sm:$0xff] }
 0x318   :  { %1350 = vmatpush1.msra.mxu1 %v4842_v34  ;;  %v5870_v34 = vpack.c.bf16 %v4886_v32, %v4884_v31  ;;  %v1721_v32 = vld [vmem:[%s9265_s10 + $0x70] sm:$0xff] }
 0x319   :  { %4844 = vmatmul.mubr.msk.f32.vlgmr.msra.gmra.mrb[10].mxu1 %vm1085_vm6, %v7281_v56  ;;  %5833 = vmatprep.subr.bf16.mxu1 %v5832_v35  ;;  %v4860_v56 = vld [vmem:[%s9262_s7 + $0x348] sm:$0xff] }
 0x31a   :  { %5835 = vmatpush1.bf16.msra.mxu1 %v5834_v36  ;;  %1495 = vmatprep.mubr.f32.mxu1 %v6565_v7  ;;  %v5844_v49 = vpack.c.bf16 %v4860_v56, %v4858_v46  ;;  %v4888_v36 = vld [vmem:[%s9262_s7 + $0x420] sm:$0xff]  ;;  %v5880_v56 = vpack.c.bf16 %v4899_v45, %v4897_v44 }
 0x31b   :  { %5837 = vmatprep.subr.bf16.mxu1 %v5836_v37  ;;  %v4890_v37 = vld [vmem:[%s9262_s7 + $0x430] sm:$0xff] }
 0x31c   :  { %v5874_v40 = vpack.c.bf16 %v4890_v37, %v4888_v36  ;;  %v1725_v37 = vld [vmem:[%s9265_s10 + $0x90] sm:$0xff] }
 0x31d   :  { %v5946_v39 = vpack.c.bf16 %v1726_v38, %v1725_v37  ;;  %v4925_v37 = vld [vmem:[%s9268_s13 + $0xb0] sm:$0xff]  ;;  %v4926_v38 = vld [vmem:[%s9268_s13 + $0xb8] sm:$0xff] }
 0x31e   :  { %5839 = vmatpush1.bf16.msra.mxu1 %v5838_v42  ;;  %v4892_v42 = vld [vmem:[%s9262_s7 + $0x440] sm:$0xff] }
 0x31f   :  { %5841 = vmatprep.subr.bf16.mxu1 %v5840_v43  ;;  %v4894_v43 = vld [vmem:[%s9262_s7 + $0x450] sm:$0xff] }
 0x320   :  { %v5878_v46 = vpack.c.bf16 %v4894_v43, %v4892_v42  ;;  %v1950_v42 = vld [vmem:[%s9268_s13] sm:$0xff]  ;;  %v1951_v43 = vld [vmem:[%s9268_s13 + $0x8] sm:$0xff] }
 0x322   :  { %5843 = vmatpush1.bf16.msra.mxu1 %v5842_v47  ;;  %v4896_v47 = vld [vmem:[%s9262_s7 + $0x460] sm:$0xff] }
 0x323   :  { %5845 = vmatprep.subr.bf16.mxu1 %v5844_v49  ;;  %v4898_v49 = vld [vmem:[%s9262_s7 + $0x470] sm:$0xff] }
 0x324   :  { %v5882_v53 = vpack.c.bf16 %v4898_v49, %v4896_v47  ;;  %v1873_v47 = vld [vmem:[%s9267_s12] sm:$0xf]  ;;  %v5949_v49 = vpack.c.bf16 %v1951_v43, %v1950_v42  ;;  %v4929_v43 = vld [vmem:[%s9268_s13 + $0xd0] sm:$0xff] }
 0x326   :  { %5847 = vmatpush1.bf16.msra.mxu1 %v5846_v59  ;;  %v4900_v59 = vld [vmem:[%s9262_s7 + $0x480] sm:$0xff] }
 0x327   :  { %5849 = vmatprep.subr.bf16.mxu1 %v5848_v60  ;;  %v4902_v60 = vld [vmem:[%s9262_s7 + $0x490] sm:$0xff] }
 0x328   :  { %v5886_v61 = vpack.c.bf16 %v4902_v60, %v4900_v59  ;;  %v1955_v59 = vld [vmem:[%s9268_s13 + $0x28] sm:$0xff] }
 0x32a   :  { %5851 = vmatpush1.bf16.msra.mxu1 %v5850_v55  ;;  %v1632_v55 = vld [vmem:[%s9264_s9 + $0x98] sm:$0xff] }
 0x32b   :  { %5853 = vmatprep.subr.bf16.mxu1 %v5852_v1  ;;  %v5916_v1 = vpack.c.bf16 %v1632_v55, %v1631_v0  ;;  %v1958_v0 = vld [vmem:[%s9268_s13 + $0x40] sm:$0xff]  ;;  %v1959_v55 = vld [vmem:[%s9268_s13 + $0x48] sm:$0xff] }
 0x32d   :  { %5917 = vmatpush1.bf16.msra.mxu0 %v5916_v1  ;;  %v5961_v1 = vpack.c.bf16 %v1959_v55, %v1958_v0  ;;  %v4940_v0 = vld [vmem:[%s9268_s13 + $0x120] sm:$0xff]  ;;  %v4941_v55 = vld [vmem:[%s9268_s13 + $0x128] sm:$0xff] }
 0x32e   :  { %5855 = vmatpush1.bf16.msra.mxu1 %v5854_v6  ;;  %5918 = vmatprep.subr.bf16.mxu0 %v6567_v13 }
 0x32f   :  { %5857 = vmatprep.subr.bf16.mxu1 %v5856_v8 }
 0x332   :  { %5859 = vmatpush1.bf16.msra.mxu1 %v5858_v12 }
 0x333   :  { %1459 = vmatprep.subr.mxu1 %v4874_v14  ;;  %v1709_v14 = vld [vmem:[%s9265_s10 + $0x10] sm:$0xff] }
 0x334   :  { %v5922_v16 = vpack.c.bf16 %v1710_v15, %v1709_v14  ;;  %v4913_v14 = vld [vmem:[%s9268_s13 + $0x58] sm:$0xff] }
 0x336   :  { %1460 = vmatpush1.msra.mxu1 %v4873_v21  ;;  %v1714_v21 = vld [vmem:[%s9265_s10 + $0x38] sm:$0xff] }
 0x337   :  { %4875 = vmatmul.mubr.msk.f32.vlgmr.msra.gmra.mrb[10].mxu1 %vm1085_vm6, %v7284_v57  ;;  %5861 = vmatprep.subr.bf16.mxu1 %v5860_v22  ;;  %v4891_v57 = vld [vmem:[%s9262_s7 + $0x438] sm:$0xff]  ;;  %v5928_v22 = vpack.c.bf16 %v1714_v21, %v1713_v20 }
 0x338   :  { %5863 = vmatpush1.bf16.msra.mxu1 %v5862_v23  ;;  %1604 = vmatprep.mubr.f32.mxu1 %v6565_v7  ;;  %v5872_v35 = vpack.c.bf16 %v4891_v57, %v4889_v33  ;;  %v1715_v23 = vld [vmem:[%s9265_s10 + $0x40] sm:$0xff]  ;;  %v1722_v33 = vld [vmem:[%s9265_s10 + $0x78] sm:$0xff] }
 0x339   :  { %5865 = vmatprep.subr.bf16.mxu1 %v5864_v24  ;;  %v1716_v24 = vld [vmem:[%s9265_s10 + $0x48] sm:$0xff]  ;;  %v5940_v57 = vpack.c.bf16 %v1722_v33, %v1721_v32  ;;  %v4921_v32 = vld [vmem:[%s9268_s13 + $0x98] sm:$0xff] }
 0x33a   :  { %v5931_v25 = vpack.c.bf16 %v1716_v24, %v1715_v23  ;;  %v4915_v23 = vld [vmem:[%s9268_s13 + $0x68] sm:$0xff] }
 0x33c   :  { %5867 = vmatpush1.bf16.msra.mxu1 %v5866_v29  ;;  %v1719_v29 = vld [vmem:[%s9265_s10 + $0x60] sm:$0xff] }
 0x33d   :  { %5869 = vmatprep.subr.bf16.mxu1 %v5868_v30  ;;  %v1720_v30 = vld [vmem:[%s9265_s10 + $0x68] sm:$0xff] }
 0x33e   :  { %v5937_v31 = vpack.c.bf16 %v1720_v30, %v1719_v29  ;;  %v4919_v29 = vld [vmem:[%s9268_s13 + $0x88] sm:$0xff] }
 0x340   :  { %5871 = vmatpush1.bf16.msra.mxu1 %v5870_v34  ;;  %v1723_v34 = vld [vmem:[%s9265_s10 + $0x80] sm:$0xff] }
 0x341   :  { %5873 = vmatprep.subr.bf16.mxu1 %v5872_v35  ;;  %v1724_v35 = vld [vmem:[%s9265_s10 + $0x88] sm:$0xff] }
 0x342   :  { %v5943_v36 = vpack.c.bf16 %v1724_v35, %v1723_v34  ;;  %v4924_v34 = vld [vmem:[%s9268_s13 + $0xa8] sm:$0xff] }
 0x344   :  { %5875 = vmatpush1.bf16.msra.mxu1 %v5874_v40 }
 0x345   :  { %5877 = vmatprep.subr.bf16.mxu1 %v5876_v41 }
 0x348   :  { %5879 = vmatpush1.bf16.msra.mxu1 %v5878_v46 }
 0x349   :  { %5881 = vmatprep.subr.bf16.mxu1 %v5880_v56  ;;  %v1798_v56 = vld [vmem:[%s9266_s11] sm:$0xf] }
 0x34c   :  { %5883 = vmatpush1.bf16.msra.mxu1 %v5882_v53  ;;  %v5952_v53 = vpack.c.bf16 %v1953_v52, %v1952_v51  ;;  %v4935_v51 = vld [vmem:[%s9268_s13 + $0xf8] sm:$0xff] }
 0x34d   :  { %5885 = vmatprep.subr.bf16.mxu1 %v5884_v54  ;;  %v1954_v54 = vld [vmem:[%s9268_s13 + $0x20] sm:$0xff] }
 0x34e   :  { %v5955_v60 = vpack.c.bf16 %v1955_v59, %v1954_v54  ;;  %v4936_v54 = vld [vmem:[%s9268_s13 + $0x100] sm:$0xff]  ;;  %v4937_v59 = vld [vmem:[%s9268_s13 + $0x108] sm:$0xff] }
 0x350   :  { %5887 = vmatpush1.bf16.msra.mxu1 %v5886_v61  ;;  %v1956_v61 = vld [vmem:[%s9268_s13 + $0x30] sm:$0xff] }
 0x351   :  { %1568 = vmatprep.subr.mxu1 %v4905_v62  ;;  %v1957_v62 = vld [vmem:[%s9268_s13 + $0x38] sm:$0xff] }
 0x354   :  { %1569 = vmatpush1.msra.mxu1 %v4904_v63  ;;  %v5958_v63 = vpack.c.bf16 %v1957_v62, %v1956_v61  ;;  %v4938_v61 = vld [vmem:[%s9268_s13 + $0x110] sm:$0xff]  ;;  %v4939_v62 = vld [vmem:[%s9268_s13 + $0x118] sm:$0xff] }
 0x355   :  { %4906 = vmatmul.mubr.msk.f32.vlgmr.msra.gmra.mrb[10].mxu1 %vm1085_vm6, %v7287_v58  ;;  %5344 = vmatprep.subr.mxu1 %v6565_v7  ;;  %v1168_v58 = vrot.slane %v1054_v2, %v7091_v48  ;;  %v2291_v2 = vld [vmem:[%s9270_s15] sm:$0xff] }
 0x356   :  { %5346 = vmatprep.mubr.msk.f32.mxu1 %vm6568_vm11, %v6565_v7 }
 0x428   :  { %v1606_v6 = vpop.f32.mrb[10].mxu1 }
 0x429   :  { %v1608_v8 = vpop.f32.mrb[11].mxu1  ;;  %v6440_v12 = vadd.f32 %v1606_v6, %v1164_v3  ;;  %v2293_v3 = vld [vmem:[%s9270_s15 + $0x10] sm:$0xff] }
 0x42a   :  { %v6441_v9 = vadd.f32 %v1608_v8, %v1168_v58  ;;  %v2292_v58 = vld [vmem:[%s9270_s15 + $0x8] sm:$0xff]  ;;  %v6012_v6 = vpack.c.bf16 %v2294_v5, %v2293_v3  ;;  %v2295_v8 = vld [vmem:[%s9270_s15 + $0x20] sm:$0xff] }
 0x42b   :  { %v6009_v4 = vpack.c.bf16 %v2292_v58, %v2291_v2  ;;  %v4942_v2 = vld [vmem:[%s9268_s13 + $0x130] sm:$0xff]  ;;  %v4943_v58 = vld [vmem:[%s9268_s13 + $0x138] sm:$0xff]  ;;  %v2397_v5 = vld [vmem:[%s9277_s26 + $0x8] sm:$0xff] }
 0x42c   :  { %4907 = vmatprep.mubr.msk.f32.mxu0 %vm1633_vm10, %v6441_v9  ;;  %v6006_v3 = vpack.c.bf16 %v4943_v58, %v4942_v2  ;;  %v4971_v2 = vld [vmem:[%s9280_s27 + $0x22] sm:$0xff] }
 0x42d   :  { %1702 = vmatmul.mubr.f32.vlgmr.msra.gmra.mrb[12].mxu0 %v6440_v12 }
 0x42e   :  { %5920 = vmatpush1.bf16.msra.mxu0 %v5919_v11  ;;  %4908 = vmatprep.mubr.msk.f32.mxu0 %vm1633_vm10, %v6441_v9  ;;  %v2296_v9 = vld [vmem:[%s9270_s15 + $0x28] sm:$0xff] }
 0x42f   :  { %5921 = vmatprep.subr.bf16.mxu0 %v6567_v13  ;;  %v6015_v11 = vpack.c.bf16 %v2296_v9, %v2295_v8  ;;  %v2297_v8 = vld [vmem:[%s9270_s15 + $0x30] sm:$0x3] }
 0x432   :  { %5923 = vmatpush1.bf16.msra.mxu0 %v5922_v16 }
 0x433   :  { %5924 = vmatprep.subr.bf16.mxu0 %v6567_v13 }
 0x436   :  { %5926 = vmatpush1.bf16.msra.mxu0 %v5925_v19 }
 0x437   :  { %5927 = vmatprep.subr.bf16.mxu0 %v6567_v13 }
 0x43a   :  { %5929 = vmatpush1.bf16.msra.mxu0 %v5928_v22  ;;  %v4914_v22 = vld [vmem:[%s9268_s13 + $0x60] sm:$0xff] }
 0x43b   :  { %5930 = vmatprep.subr.bf16.mxu0 %v6567_v13  ;;  %v5967_v24 = vpack.c.bf16 %v4915_v23, %v4914_v22  ;;  %v2400_v23 = vld [vmem:[%s9277_s26 + $0x20] sm:$0xff] }
 0x43e   :  { %5932 = vmatpush1.bf16.msra.mxu0 %v5931_v25  ;;  %v4916_v25 = vld [vmem:[%s9268_s13 + $0x70] sm:$0xff] }
 0x43f   :  { %5933 = vmatprep.subr.bf16.mxu0 %v6567_v13  ;;  %v5970_v27 = vpack.c.bf16 %v4917_v26, %v4916_v25  ;;  %v4959_v25 = vld [vmem:[%s9277_s26 + $0x48] sm:$0xff]  ;;  %v4961_v26 = vld [vmem:[%s9277_s26 + $0x58] sm:$0xff] }
 0x442   :  { %5935 = vmatpush1.bf16.msra.mxu0 %v5934_v28  ;;  %v4918_v28 = vld [vmem:[%s9268_s13 + $0x80] sm:$0xff] }
 0x443   :  { %5936 = vmatprep.subr.bf16.mxu0 %v6567_v13  ;;  %v5973_v30 = vpack.c.bf16 %v4919_v29, %v4918_v28  ;;  %v6027_v28 = vpack.c.bf16 %v4961_v26, %v4959_v25  ;;  %v4958_v29 = vld [vmem:[%s9277_s26 + $0x40] sm:$0xff]  ;;  %v4989_v26 = vld [vmem:[%s9280_s27 + $0x33] sm:$0xff] }
 0x446   :  { %5938 = vmatpush1.bf16.msra.mxu0 %v5937_v31  ;;  %v4920_v31 = vld [vmem:[%s9268_s13 + $0x90] sm:$0xff] }
 0x447   :  { %5939 = vmatprep.subr.bf16.mxu0 %v6567_v13  ;;  %v5976_v33 = vpack.c.bf16 %v4921_v32, %v4920_v31  ;;  %v4963_v31 = vld [vmem:[%s9277_s26 + $0x68] sm:$0xff]  ;;  %v4965_v32 = vld [vmem:[%s9277_s26 + $0x78] sm:$0xf] }
 0x44a   :  { %5941 = vmatpush1.bf16.msra.mxu0 %v5940_v57  ;;  %v4923_v57 = vld [vmem:[%s9268_s13 + $0xa0] sm:$0xff] }
 0x44b   :  { %5942 = vmatprep.subr.bf16.mxu0 %v6567_v13  ;;  %v5979_v35 = vpack.c.bf16 %v4924_v34, %v4923_v57  ;;  %v6031_v34 = vpack.c.bf16 %v4965_v32, %v4963_v31  ;;  %v3098_v31 = vld [vmem:[%s9259_s4] sm:$0xff] }
 0x44e   :  { %5944 = vmatpush1.bf16.msra.mxu0 %v5943_v36 }
 0x44f   :  { %5945 = vmatprep.subr.bf16.mxu0 %v6567_v13 }
 0x452   :  { %5947 = vmatpush1.bf16.msra.mxu0 %v5946_v39  ;;  %v5982_v39 = vpack.c.bf16 %v4926_v38, %v4925_v37  ;;  %v4975_v37 = vld [vmem:[%s9277_s26 + $0x88] sm:$0xff]  ;;  %v4977_v38 = vld [vmem:[%s9277_s26 + $0x98] sm:$0xff] }
 0x453   :  { %5349 = vmatprep.subr.mxu0 %v6565_v7 }
 0x455   :  { %1792 = vmatmul.mubr.f32.vlgmr.msra.gmra.mrb[14].mxu0 %v6440_v12  ;;  %v4912_v12 = vld [vmem:[%s9268_s13 + $0x50] sm:$0xff] }
 0x456   :  { %5351 = vmatprep.mubr.msk.f32.mxu0 %vm6568_vm11, %v6565_v7  ;;  %v5964_v20 = vpack.c.bf16 %v4913_v14, %v4912_v12  ;;  %v2396_v12 = vld [vmem:[%s9277_s26] sm:$0xff]  ;;  %v2398_v14 = vld [vmem:[%s9277_s26 + $0x10] sm:$0xff] }
 0x500   :  { %v1703_v40 = vpop.f32.mrb[12].mxu0 }
 0x501   :  { %v1705_v41 = vpop.f32.mrb[13].mxu0 }
 0x502   :  { %v4928_v41 = vld [vmem:[%s9268_s13 + $0xc8] sm:$0xff] }
 0x528   :  { %v1793_v44 = vpop.f32.mrb[14].mxu0 }
 0x529   :  { %v1797_v45 = vmax.f32 %v1703_v40, %v1793_v44  ;;  %v1795_v46 = vpop.f32.mrb[15].mxu0  ;;  %v4927_v40 = vld [vmem:[%s9268_s13 + $0xc0] sm:$0xff]  ;;  %v4930_v44 = vld [vmem:[%s9268_s13 + $0xd8] sm:$0xff] }
 0x52a   :  { %v5985_v42 = vpack.c.bf16 %v4928_v41, %v4927_v40  ;;  %v4931_v46 = vld [vmem:[%s9268_s13 + $0xe0] sm:$0xff]  ;;  %v6037_v41 = vpack.c.bf16 %v4977_v38, %v4975_v37  ;;  %v3101_v38 = vld [vmem:[%s9259_s4 + $0x18] sm:$0xff] }
 0x52b   :  { %5345 = vmatpush3.msra.mxu1 %v1797_v45  ;;  %5350 = vmatpush3.msra.mxu0 %v1797_v45  ;;  %v5988_v45 = vpack.c.bf16 %v4930_v44, %v4929_v43  ;;  %v4974_v43 = vld [vmem:[%s9277_s26 + $0x80] sm:$0xff]  ;;  %v4976_v44 = vld [vmem:[%s9277_s26 + $0x90] sm:$0xff] }
 0x52c   :  { %5347 = vmatmul.mubr.msk.f32.vlgmr.msra.gmra.mrb[12].mxu1 %vm1799_vm12, %v1798_v56  ;;  %5352 = vmatmul.mubr.msk.f32.vlgmr.msra.gmra.mrb[16].mxu0 %vm1799_vm12, %v1873_v47  ;;  %v4932_v56 = vld [vmem:[%s9268_s13 + $0xe8] sm:$0xff] }
 0x52d   :  { %5948 = vmatprep.subr.bf16.mxu0 %v6567_v13  ;;  %5374 = vmatprep.mubr.msk.f32.mxu0 %vm6568_vm11, %v6565_v7  ;;  %v5991_v47 = vpack.c.bf16 %v4932_v56, %v4931_v46  ;;  %v4981_v46 = vld [vmem:[%s9277_s26 + $0xb8] sm:$0xf]  ;;  %v4955_v56 = vld [vmem:[%s9280_s27 + $0x21] sm:$0xff] }
 0x52e   :  { %5950 = vmatpush3.bf16.msra.mxu0 %v5949_v49  ;;  %6008 = vmatprep.subr.bf16.mxu1 %v6567_v13  ;;  %v4934_v49 = vld [vmem:[%s9268_s13 + $0xf0] sm:$0xff] }
 0x52f   :  { %5951 = vmatprep.subr.bf16.mxu0 %v6567_v13  ;;  %5460 = vmatprep.mubr.msk.f32.mxu1 %vm6568_vm11, %v6565_v7  ;;  %v5994_v52 = vpack.c.bf16 %v4935_v51, %v4934_v49  ;;  %v4978_v51 = vld [vmem:[%s9277_s26 + $0xa0] sm:$0xff] }
 0x530   :  { %6010 = vmatpush3.bf16.msra.mxu1 %v6009_v4 }
 0x531   :  { %6011 = vmatprep.subr.bf16.mxu1 %v6567_v13 }
 0x532   :  { %5953 = vmatpush3.bf16.msra.mxu0 %v5952_v53 }
 0x533   :  { %5954 = vmatprep.subr.bf16.mxu0 %v6567_v13 }
 0x534   :  { %6013 = vmatpush3.bf16.msra.mxu1 %v6012_v6  ;;  %v2399_v6 = vld [vmem:[%s9277_s26 + $0x18] sm:$0xff] }
 0x535   :  { %6014 = vmatprep.subr.bf16.mxu1 %v6567_v13  ;;  %v6017_v9 = vpack.c.bf16 %v2399_v6, %v2397_v5  ;;  %v4996_v5 = vld [vmem:[%s9277_s26 + $0xf0] sm:$0xf]  ;;  %v5007_v6 = vld [vmem:[%s9277_s26 + $0x108] sm:$0xff] }
 0x536   :  { %5956 = vmatpush3.bf16.msra.mxu0 %v5955_v60  ;;  %v5997_v60 = vpack.c.bf16 %v4937_v59, %v4936_v54  ;;  %v4993_v54 = vld [vmem:[%s9277_s26 + $0xd8] sm:$0xff]  ;;  %v4956_v59 = vld [vmem:[%s9280_s27 + $0x29] sm:$0xff] }
 0x537   :  { %5957 = vmatprep.subr.bf16.mxu0 %v6567_v13 }
 0x538   :  { %6016 = vmatpush3.bf16.msra.mxu1 %v6015_v11  ;;  %v1949_v11 = vld [vmem:[%s9269_s14] sm:$0x1] }
 0x539   :  { %5458 = vmatprep.subr.mxu1 %v6565_v7 }
 0x53a   :  { %5959 = vmatpush3.bf16.msra.mxu0 %v5958_v63  ;;  %v6000_v63 = vpack.c.bf16 %v4939_v62, %v4938_v61  ;;  %v4957_v62 = vld [vmem:[%s9280_s27 + $0x31] sm:$0xff] }
 0x53b   :  { %5960 = vmatprep.subr.bf16.mxu0 %v6567_v13 }
 0x53c   :  { %5459 = vmatpush3.msk.msra.mxu1 %vm2303_vm14, %v2297_v8  ;;  %v5009_v8 = vld [vmem:[%s9277_s26 + $0x118] sm:$0xff] }
 0x53d   :  { %6018 = vmatprep.subr.bf16.mxu1 %v6017_v9  ;;  %v4972_v9 = vld [vmem:[%s9280_s27 + $0x2a] sm:$0xff] }
 0x53e   :  { %5962 = vmatpush3.bf16.msra.mxu0 %v5961_v1  ;;  %v6003_v1 = vpack.c.bf16 %v4941_v55, %v4940_v0  ;;  %v4992_v0 = vld [vmem:[%s9277_s26 + $0xd0] sm:$0xff]  ;;  %v4995_v55 = vld [vmem:[%s9277_s26 + $0xe8] sm:$0xff] }
 0x53f   :  { %5963 = vmatprep.subr.bf16.mxu0 %v6567_v13 }
 0x5ff   :  { %v1869_v15 = vpop.f32.mrb[12].mxu1  ;;  %v1943_v16 = vpop.f32.mrb[16].mxu0 }
 0x600   :  { %v1947_v17 = vmax.f32 %v1869_v15, %v1943_v16  ;;  %v5348_v18 = vpop.f32.mrb[13].mxu1  ;;  %v5353_v19 = vpop.f32.mrb[17].mxu0  ;;  %v2401_v16 = vld [vmem:[%s9277_s26 + $0x28] sm:$0xff] }
 0x602   :  { %v7826_v21 = vmax.f32 %v1947_v17, 0.0  ;;  %v2403_v17 = vld [vmem:[%s9277_s26 + $0x38] sm:$0xf] }
 0x603   :  { %v6021_v22 = vpack.c.bf16 %v2403_v17, %v2401_v16  ;;  %v5008_v16 = vld [vmem:[%s9277_s26 + $0x110] sm:$0xff]  ;;  %v5011_v17 = vld [vmem:[%s9277_s26 + $0x128] sm:$0xff] }
 0x604   :  { %5375 = vmatmul.mubr.msk.f32.vlgmr.msra.gmra.mrb[18].mxu0 %vm1960_vm13, %v7826_v21  ;;  %v2046_v36 = vrot.slane %v7826_v21, 1  ;;  %v2131_v53 = vrot.slane %v7826_v21, 2  ;;  %v2216_v4 = vrot.slane %v7826_v21, 3 }
 0x605   :  { %5965 = vmatpush3.bf16.msra.mxu0 %v5964_v20  ;;  %5397 = vmatprep.mubr.msk.f32.mxu0 %vm6568_vm11, %v6565_v7  ;;  %v6019_v20 = vpack.c.bf16 %v2398_v14, %v2396_v12  ;;  %v6057_v12 = vpack.c.bf16 %v5009_v8, %v5007_v6  ;;  %v4973_v14 = vld [vmem:[%s9280_s27 + $0x32] sm:$0xff]  ;;  %v3111_v6 = vld [vmem:[%s9259_s4 + $0x68] sm:$0xff] }
 0x606   :  { %5966 = vmatprep.subr.bf16.mxu0 %v6567_v13 }
 0x609   :  { %5968 = vmatpush3.bf16.msra.mxu0 %v5967_v24  ;;  %v2402_v24 = vld [vmem:[%s9277_s26 + $0x30] sm:$0xf] }
 0x60a   :  { %5969 = vmatprep.subr.bf16.mxu0 %v6567_v13 }
 0x60d   :  { %5971 = vmatpush3.bf16.msra.mxu0 %v5970_v27  ;;  %v6024_v27 = vpack.c.bf16 %v2402_v24, %v2400_v23  ;;  %v5012_v23 = vld [vmem:[%s9277_s26 + $0x130] sm:$0xf] }
 0x60e   :  { %5972 = vmatprep.subr.bf16.mxu0 %v6567_v13  ;;  %v4988_v24 = vld [vmem:[%s9280_s27 + $0x2b] sm:$0xff] }
 0x611   :  { %5974 = vmatpush3.bf16.msra.mxu0 %v5973_v30  ;;  %v4960_v30 = vld [vmem:[%s9277_s26 + $0x50] sm:$0xff] }
 0x612   :  { %5975 = vmatprep.subr.bf16.mxu0 %v6567_v13  ;;  %v6029_v57 = vpack.c.bf16 %v4960_v30, %v4958_v29  ;;  %v2979_v29 = vld [vmem:[%s9258_s3] sm:$0xff]  ;;  %v2980_v30 = vld [vmem:[%s9258_s3 + $0x8] sm:$0xff] }
 0x613   :  { %v6068_v32 = vpack.c.bf16 %v2980_v30, %v2979_v29  ;;  %v2999_v29 = vld [vmem:[%s9258_s3 + $0xa0] sm:$0xff]  ;;  %v3000_v30 = vld [vmem:[%s9258_s3 + $0xa8] sm:$0xff] }
 0x615   :  { %5977 = vmatpush3.bf16.msra.mxu0 %v5976_v33  ;;  %v4947_v33 = vld [vmem:[%s9280_s27 + $0x20] sm:$0xff] }
 0x616   :  { %5978 = vmatprep.subr.bf16.mxu0 %v6567_v13 }
 0x618   :  { %5398 = vmatmul.mubr.msk.f32.vlgmr.msra.gmra.mrb[18].mxu0 %vm1960_vm13, %v2046_v36  ;;  %v4964_v36 = vld [vmem:[%s9277_s26 + $0x70] sm:$0xf] }
 0x619   :  { %5980 = vmatpush3.bf16.msra.mxu0 %v5979_v35  ;;  %5420 = vmatprep.mubr.msk.f32.mxu0 %vm6568_vm11, %v6565_v7  ;;  %v4962_v35 = vld [vmem:[%s9277_s26 + $0x60] sm:$0xff] }
 0x61a   :  { %5981 = vmatprep.subr.bf16.mxu0 %v6567_v13  ;;  %v6034_v40 = vpack.c.bf16 %v4964_v36, %v4962_v35  ;;  %v2982_v35 = vld [vmem:[%s9258_s3 + $0x18] sm:$0xff]  ;;  %v3100_v36 = vld [vmem:[%s9259_s4 + $0x10] sm:$0xff] }
 0x61d   :  { %5983 = vmatpush3.bf16.msra.mxu0 %v5982_v39  ;;  %v4948_v39 = vld [vmem:[%s9280_s27 + $0x28] sm:$0xff] }
 0x61e   :  { %5984 = vmatprep.subr.bf16.mxu0 %v6567_v13 }
 0x621   :  { %5986 = vmatpush3.bf16.msra.mxu0 %v5985_v42  ;;  %v4949_v42 = vld [vmem:[%s9280_s27 + $0x30] sm:$0xff] }
 0x622   :  { %5987 = vmatprep.subr.bf16.mxu0 %v6567_v13 }
 0x625   :  { %5989 = vmatpush3.bf16.msra.mxu0 %v5988_v45  ;;  %v4979_v45 = vld [vmem:[%s9277_s26 + $0xa8] sm:$0xff] }
 0x626   :  { %5990 = vmatprep.subr.bf16.mxu0 %v6567_v13  ;;  %v6041_v49 = vpack.c.bf16 %v4981_v46, %v4979_v45  ;;  %v2985_v46 = vld [vmem:[%s9258_s3 + $0x30] sm:$0xff] }
 0x629   :  { %5992 = vmatpush3.bf16.msra.mxu0 %v5991_v47  ;;  %v6039_v47 = vpack.c.bf16 %v4976_v44, %v4974_v43  ;;  %v3103_v43 = vld [vmem:[%s9259_s4 + $0x28] sm:$0xff] }
 0x62a   :  { %5993 = vmatprep.subr.bf16.mxu0 %v6567_v13 }
 0x62c   :  { %5421 = vmatmul.mubr.msk.f32.vlgmr.msra.gmra.mrb[18].mxu0 %vm1960_vm13, %v2131_v53  ;;  %v4991_v53 = vld [vmem:[%s9277_s26 + $0xc8] sm:$0xff] }
 0x62d   :  { %5995 = vmatpush3.bf16.msra.mxu0 %v5994_v52  ;;  %5443 = vmatprep.mubr.msk.f32.mxu0 %vm6568_vm11, %v6565_v7  ;;  %v4980_v52 = vld [vmem:[%s9277_s26 + $0xb0] sm:$0xf]  ;;  %v6047_v61 = vpack.c.bf16 %v4993_v54, %v4991_v53  ;;  %v2987_v53 = vld [vmem:[%s9258_s3 + $0x40] sm:$0xff]  ;;  %v2988_v54 = vld [vmem:[%s9258_s3 + $0x48] sm:$0xff] }
 0x62e   :  { %5996 = vmatprep.subr.bf16.mxu0 %v6567_v13 }
 0x631   :  { %5998 = vmatpush3.bf16.msra.mxu0 %v5997_v60  ;;  %v6044_v60 = vpack.c.bf16 %v4980_v52, %v4978_v51 }
 0x632   :  { %5999 = vmatprep.subr.bf16.mxu0 %v6567_v13 }
 0x635   :  { %6001 = vmatpush3.bf16.msra.mxu0 %v6000_v63  ;;  %v4990_v63 = vld [vmem:[%s9277_s26 + $0xc0] sm:$0xff] }
 0x636   :  { %6002 = vmatprep.subr.bf16.mxu0 %v6567_v13  ;;  %v6049_v58 = vpack.c.bf16 %v4992_v0, %v4990_v63  ;;  %v2989_v63 = vld [vmem:[%s9258_s3 + $0x50] sm:$0xff]  ;;  %v2990_v0 = vld [vmem:[%s9258_s3 + $0x58] sm:$0xff] }
 0x639   :  { %6004 = vmatpush3.bf16.msra.mxu0 %v6003_v1  ;;  %v4997_v1 = vld [vmem:[%s9277_s26 + $0xf8] sm:$0xf] }
 0x63a   :  { %6005 = vmatprep.subr.bf16.mxu0 %v6567_v13 }
 0x63d   :  { %6007 = vmatpush3.bf16.msra.mxu0 %v6006_v3  ;;  %v6051_v3 = vpack.c.bf16 %v4997_v1, %v4995_v55  ;;  %v3108_v55 = vld [vmem:[%s9259_s4 + $0x50] sm:$0xff]  ;;  %v3109_v1 = vld [vmem:[%s9259_s4 + $0x58] sm:$0xff] }
 0x63e   :  { %6067 = vmatprep.subr.bf16.mxu0 %v6567_v13 }
 0x640   :  { %5444 = vmatmul.mubr.msk.f32.vlgmr.msra.gmra.mrb[18].mxu0 %vm1960_vm13, %v2216_v4  ;;  %v4994_v4 = vld [vmem:[%s9277_s26 + $0xe0] sm:$0xff] }
 0x641   :  { %6069 = vmatpush1.bf16.msra.mxu0 %v6068_v32  ;;  %v3119_v32 = vld [vmem:[%s9259_s4 + $0xa8] sm:$0xff] }
 0x642   :  { %6070 = vmatprep.subr.bf16.mxu0 %v6567_v13 }
 0x713   :  { %v2285_v15 = vpop.f32.mrb[18].mxu0 }
 0x714   :  { %v6442_v18 = vadd.f32 %v2285_v15, %v1949_v11  ;;  %v5445_v19 = vpop.f32.mrb[19].mxu0  ;;  %v6054_v11 = vpack.c.bf16 %v4996_v5, %v4994_v4  ;;  %v5006_v15 = vld [vmem:[%s9277_s26 + $0x100] sm:$0xff]  ;;  %v2992_v4 = vld [vmem:[%s9258_s3 + $0x68] sm:$0xff] }
 0x715   :  { %v4987_v19 = vld [vmem:[%s9280_s27 + $0x23] sm:$0xff] }
 0x716   :  { %v2290_v21 = vmax.f32 %v6442_v18, 0.0  ;;  %v5013_v18 = vld [vmem:[%s9277_s26 + $0x138] sm:$0xf]  ;;  %v3110_v5 = vld [vmem:[%s9259_s4 + $0x60] sm:$0xff] }
 0x718   :  { %5461 = vmatmul.mubr.msk.f32.vlgmr.msra.gmra.mrb[14].mxu1 %vm2299_vm15, %v2290_v21  ;;  %v6061_v21 = vpack.c.bf16 %v5013_v18, %v5011_v17  ;;  %v2995_v18 = vld [vmem:[%s9258_s3 + $0x80] sm:$0xff] }
 0x719   :  { %6020 = vmatpush1.bf16.msra.mxu1 %v6019_v20  ;;  %2483 = vmatprep.mubr.f32.mxu1 %v6565_v7  ;;  %v6059_v20 = vpack.c.bf16 %v5008_v16, %v5006_v15  ;;  %v3113_v15 = vld [vmem:[%s9259_s4 + $0x78] sm:$0xff] }
 0x71a   :  { %6023 = vmatprep.subr.msk.bf16.mxu1 %vm6680_vm2, %v6021_v22  ;;  %v5010_v22 = vld [vmem:[%s9277_s26 + $0x120] sm:$0xff] }
 0x71b   :  { %v6064_v25 = vpack.c.bf16 %v5012_v23, %v5010_v22 }
 0x71d   :  { %6026 = vmatpush1.bf16.msk.msra.mxu1 %vm6680_vm2, %v6024_v27  ;;  %v5003_v27 = vld [vmem:[%s9280_s27 + $0x24] sm:$0xff] }
 0x71e   :  { %6028 = vmatprep.subr.bf16.mxu1 %v6027_v28  ;;  %v5004_v28 = vld [vmem:[%s9280_s27 + $0x2c] sm:$0xff] }
 0x720   :  { %4952 = vmatmul.mubr.msk.f32.vlgmr.msra.gmra.mrb[16].mxu1 %vm69_vm3, %v4947_v33  ;;  %v3099_v33 = vld [vmem:[%s9259_s4 + $0x8] sm:$0xff] }
 0x721   :  { %2489 = vmatprep.mubr.f32.mxu1 %v6565_v7  ;;  %6030 = vmatpush1.bf16.msra.mxu1 %v6029_v57  ;;  %v6113_v57 = vpack.c.bf16 %v3099_v33, %v3098_v31  ;;  %v3118_v31 = vld [vmem:[%s9259_s4 + $0xa0] sm:$0xff]  ;;  %v6098_v33 = vpack.c.bf16 %v3000_v30, %v2999_v29  ;;  %v3384_v29 = vld [vmem:[%s9262_s7 + $0x10] sm:$0xff]  ;;  %v3387_v30 = vld [vmem:[%s9262_s7 + $0x28] sm:$0xff] }
 0x722   :  { %6033 = vmatprep.subr.msk.bf16.mxu1 %vm6680_vm2, %v6031_v34  ;;  %v2981_v34 = vld [vmem:[%s9258_s3 + $0x10] sm:$0xff] }
 0x723   :  { %v6071_v37 = vpack.c.bf16 %v2982_v35, %v2981_v34  ;;  %v3001_v34 = vld [vmem:[%s9258_s3 + $0xb0] sm:$0xff]  ;;  %v3002_v35 = vld [vmem:[%s9258_s3 + $0xb8] sm:$0xff] }
 0x724   :  { %4953 = vmatmul.mubr.msk.f32.gmra.mrb[18].mxu1 %vm69_vm3, %v4948_v39  ;;  %v2983_v39 = vld [vmem:[%s9258_s3 + $0x20] sm:$0xff] }
 0x725   :  { %2495 = vmatprep.mubr.f32.mxu1 %v6565_v7  ;;  %6036 = vmatpush1.bf16.msk.msra.mxu1 %vm6680_vm2, %v6034_v40  ;;  %v2984_v40 = vld [vmem:[%s9258_s3 + $0x28] sm:$0xff] }
 0x726   :  { %6038 = vmatprep.subr.bf16.mxu1 %v6037_v41  ;;  %v6116_v41 = vpack.c.bf16 %v3101_v38, %v3100_v36  ;;  %6072 = vmatpush1.bf16.msra.mxu0 %v6071_v37  ;;  %v6074_v44 = vpack.c.bf16 %v2984_v40, %v2983_v39  ;;  %v3120_v36 = vld [vmem:[%s9259_s4 + $0xb0] sm:$0xff]  ;;  %v3121_v37 = vld [vmem:[%s9259_s4 + $0xb8] sm:$0xff]  ;;  %v6101_v38 = vpack.c.bf16 %v3002_v35, %v3001_v34  ;;  %v3003_v40 = vld [vmem:[%s9258_s3 + $0xc0] sm:$0xff] }
 0x727   :  { %6073 = vmatprep.subr.bf16.mxu0 %v6567_v13  ;;  %v6146_v39 = vpack.c.bf16 %v3121_v37, %v3120_v36  ;;  %v3388_v34 = vld [vmem:[%s9262_s7 + $0x30] sm:$0xff]  ;;  %v3391_v35 = vld [vmem:[%s9262_s7 + $0x48] sm:$0xff]  ;;  %v3393_v36 = vld [vmem:[%s9262_s7 + $0x58] sm:$0xff] }
 0x728   :  { %4954 = vmatmul.mubr.msk.f32.gmra.mrb[20].mxu1 %vm69_vm3, %v4949_v42  ;;  %v3102_v42 = vld [vmem:[%s9259_s4 + $0x20] sm:$0xff] }
 0x729   :  { %2609 = vmatprep.mubr.f32.mxu1 %v6565_v7  ;;  %v6119_v45 = vpack.c.bf16 %v3103_v43, %v3102_v42  ;;  %v3122_v42 = vld [vmem:[%s9259_s4 + $0xc0] sm:$0xff]  ;;  %v3123_v43 = vld [vmem:[%s9259_s4 + $0xc8] sm:$0xff] }
 0x72a   :  { %6075 = vmatpush1.bf16.msra.mxu0 %v6074_v44 }
 0x72b   :  { %6076 = vmatprep.subr.bf16.mxu0 %v6567_v13 }
 0x72c   :  { %4968 = vmatmul.mubr.msk.f32.vlgmr.msra.gmra.mrb[16].mxu1 %vm69_vm3, %v4955_v56  ;;  %v2986_v56 = vld [vmem:[%s9258_s3 + $0x38] sm:$0xff] }
 0x72d   :  { %2615 = vmatprep.mubr.f32.mxu1 %v6565_v7  ;;  %6040 = vmatpush1.bf16.msra.mxu1 %v6039_v47  ;;  %v3104_v47 = vld [vmem:[%s9259_s4 + $0x30] sm:$0xff]  ;;  %v6077_v51 = vpack.c.bf16 %v2986_v56, %v2985_v46  ;;  %v3006_v56 = vld [vmem:[%s9258_s3 + $0xd8] sm:$0xff] }
 0x72e   :  { %6043 = vmatprep.subr.msk.bf16.mxu1 %vm6680_vm2, %v6041_v49  ;;  %v3105_v49 = vld [vmem:[%s9259_s4 + $0x38] sm:$0xff]  ;;  %v3005_v46 = vld [vmem:[%s9258_s3 + $0xd0] sm:$0xff] }
 0x72f   :  { %v6122_v52 = vpack.c.bf16 %v3105_v49, %v3104_v47  ;;  %6078 = vmatpush1.bf16.msra.mxu0 %v6077_v51  ;;  %v3124_v47 = vld [vmem:[%s9259_s4 + $0xd0] sm:$0xff]  ;;  %v3125_v49 = vld [vmem:[%s9259_s4 + $0xd8] sm:$0xff]  ;;  %v6107_v51 = vpack.c.bf16 %v3006_v56, %v3005_v46  ;;  %v3399_v56 = vld [vmem:[%s9262_s7 + $0x88] sm:$0xff] }
 0x730   :  { %4969 = vmatmul.mubr.msk.f32.gmra.mrb[18].mxu1 %vm69_vm3, %v4956_v59  ;;  %v3106_v59 = vld [vmem:[%s9259_s4 + $0x40] sm:$0xff]  ;;  %6079 = vmatprep.subr.bf16.mxu0 %v6567_v13  ;;  %v3396_v46 = vld [vmem:[%s9262_s7 + $0x70] sm:$0xff] }
 0x731   :  { %2621 = vmatprep.mubr.f32.mxu1 %v6565_v7  ;;  %6046 = vmatpush1.bf16.msk.msra.mxu1 %vm6680_vm2, %v6044_v60  ;;  %v3107_v60 = vld [vmem:[%s9259_s4 + $0x48] sm:$0xff] }
 0x732   :  { %6048 = vmatprep.subr.bf16.mxu1 %v6047_v61  ;;  %v6080_v61 = vpack.c.bf16 %v2988_v54, %v2987_v53  ;;  %v3007_v53 = vld [vmem:[%s9258_s3 + $0xe0] sm:$0xff]  ;;  %v3008_v54 = vld [vmem:[%s9258_s3 + $0xe8] sm:$0xff] }
 0x734   :  { %4970 = vmatmul.mubr.msk.f32.gmra.mrb[20].mxu1 %vm69_vm3, %v4957_v62  ;;  %v6125_v62 = vpack.c.bf16 %v3107_v60, %v3106_v59  ;;  %6081 = vmatpush1.bf16.msra.mxu0 %v6080_v61  ;;  %v3126_v59 = vld [vmem:[%s9259_s4 + $0xe0] sm:$0xff]  ;;  %v6110_v60 = vpack.c.bf16 %v3008_v54, %v3007_v53  ;;  %v3127_v61 = vld [vmem:[%s9259_s4 + $0xe8] sm:$0xff]  ;;  %v3400_v53 = vld [vmem:[%s9262_s7 + $0x90] sm:$0xff] }
 0x735   :  { %2724 = vmatprep.mubr.f32.mxu1 %v6565_v7  ;;  %6082 = vmatprep.subr.bf16.mxu0 %v6567_v13  ;;  %v3403_v54 = vld [vmem:[%s9262_s7 + $0xa8] sm:$0xff] }
 0x738   :  { %4984 = vmatmul.mubr.msk.f32.vlgmr.msra.gmra.mrb[16].mxu1 %vm69_vm3, %v4971_v2  ;;  %v6083_v2 = vpack.c.bf16 %v2990_v0, %v2989_v63  ;;  %v2298_v63 = vld [vmem:[%s9271_s16] sm:$0x1] }
 0x739   :  { %2730 = vmatprep.mubr.f32.mxu1 %v6565_v7  ;;  %6050 = vmatpush1.bf16.msra.mxu1 %v6049_v58  ;;  %v6128_v58 = vpack.c.bf16 %v3109_v1, %v3108_v55 }
 0x73a   :  { %6053 = vmatprep.subr.msk.bf16.mxu1 %vm6680_vm2, %v6051_v3  ;;  %v2991_v3 = vld [vmem:[%s9258_s3 + $0x60] sm:$0xff]  ;;  %6084 = vmatpush1.bf16.msra.mxu0 %v6083_v2 }
 0x73b   :  { %v6086_v8 = vpack.c.bf16 %v2992_v4, %v2991_v3  ;;  %6085 = vmatprep.subr.bf16.mxu0 %v6567_v13 }
 0x73c   :  { %4985 = vmatmul.mubr.msk.f32.gmra.mrb[18].mxu1 %vm69_vm3, %v4972_v9  ;;  %v6131_v9 = vpack.c.bf16 %v3111_v6, %v3110_v5 }
 0x73d   :  { %2736 = vmatprep.mubr.f32.mxu1 %v6565_v7  ;;  %6056 = vmatpush1.bf16.msk.msra.mxu1 %vm6680_vm2, %v6054_v11  ;;  %v2993_v11 = vld [vmem:[%s9258_s3 + $0x70] sm:$0xff] }
 0x73e   :  { %6058 = vmatprep.subr.bf16.mxu1 %v6057_v12  ;;  %v2994_v12 = vld [vmem:[%s9258_s3 + $0x78] sm:$0xff]  ;;  %6087 = vmatpush1.bf16.msra.mxu0 %v6086_v8 }
 0x73f   :  { %v6089_v16 = vpack.c.bf16 %v2994_v12, %v2993_v11  ;;  %6088 = vmatprep.subr.bf16.mxu0 %v6567_v13 }
 0x740   :  { %4986 = vmatmul.mubr.msk.f32.gmra.mrb[20].mxu1 %vm69_vm3, %v4973_v14  ;;  %v3112_v14 = vld [vmem:[%s9259_s4 + $0x70] sm:$0xff] }
 0x741   :  { %2839 = vmatprep.mubr.f32.mxu1 %v6565_v7  ;;  %v6134_v17 = vpack.c.bf16 %v3113_v15, %v3112_v14 }
 0x742   :  { %6090 = vmatpush1.bf16.msra.mxu0 %v6089_v16 }
 0x743   :  { %6091 = vmatprep.subr.bf16.mxu0 %v6567_v13 }
 0x744   :  { %5000 = vmatmul.mubr.msk.f32.vlgmr.msra.gmra.mrb[16].mxu1 %vm69_vm3, %v4987_v19  ;;  %v2996_v19 = vld [vmem:[%s9258_s3 + $0x88] sm:$0xff] }
 0x745   :  { %2845 = vmatprep.mubr.f32.mxu1 %v6565_v7  ;;  %6060 = vmatpush1.bf16.msra.mxu1 %v6059_v20  ;;  %v3114_v20 = vld [vmem:[%s9259_s4 + $0x80] sm:$0xff]  ;;  %v6092_v22 = vpack.c.bf16 %v2996_v19, %v2995_v18 }
 0x746   :  { %6063 = vmatprep.subr.msk.bf16.mxu1 %vm6680_vm2, %v6061_v21  ;;  %v3115_v21 = vld [vmem:[%s9259_s4 + $0x88] sm:$0xff] }
 0x747   :  { %v6137_v23 = vpack.c.bf16 %v3115_v21, %v3114_v20  ;;  %6093 = vmatpush1.bf16.msra.mxu0 %v6092_v22 }
 0x748   :  { %5001 = vmatmul.mubr.msk.f32.gmra.mrb[18].mxu1 %vm69_vm3, %v4988_v24  ;;  %v2997_v24 = vld [vmem:[%s9258_s3 + $0x90] sm:$0xff]  ;;  %6094 = vmatprep.subr.bf16.mxu0 %v6567_v13 }
 0x749   :  { %2851 = vmatprep.mubr.f32.mxu1 %v6565_v7  ;;  %6066 = vmatpush1.bf16.msk.msra.mxu1 %vm6680_vm2, %v6064_v25  ;;  %v2998_v25 = vld [vmem:[%s9258_s3 + $0x98] sm:$0xff] }
 0x74a   :  { %6112 = vmatprep.subr.bf16.mxu1 %v6567_v13 }
 0x74c   :  { %5002 = vmatmul.mubr.msk.f32.gmra.mrb[20].mxu1 %vm69_vm3, %v4989_v26  ;;  %v3116_v26 = vld [vmem:[%s9259_s4 + $0x90] sm:$0xff] }
 0x74d   :  { %2954 = vmatprep.mubr.f32.mxu1 %v6565_v7 }
 0x750   :  { %5016 = vmatmul.mubr.msk.f32.vlgmr.msra.gmra.mrb[16].mxu1 %vm69_vm3, %v5003_v27  ;;  %v3117_v27 = vld [vmem:[%s9259_s4 + $0x98] sm:$0xff] }
 0x751   :  { %2960 = vmatprep.mubr.f32.mxu1 %v6565_v7  ;;  %6114 = vmatpush1.bf16.msra.mxu1 %v6113_v57  ;;  %v6143_v57 = vpack.c.bf16 %v3119_v32, %v3118_v31  ;;  %v3389_v31 = vld [vmem:[%s9262_s7 + $0x38] sm:$0xff] }
 0x752   :  { %6115 = vmatprep.subr.bf16.mxu1 %v6567_v13 }
 0x754   :  { %5017 = vmatmul.mubr.msk.f32.gmra.mrb[18].mxu1 %vm69_vm3, %v5004_v28  ;;  %v6095_v28 = vpack.c.bf16 %v2998_v25, %v2997_v24 }
 0x755   :  { %2966 = vmatprep.mubr.f32.mxu1 %v6565_v7  ;;  %6117 = vmatpush1.bf16.msra.mxu1 %v6116_v41  ;;  %v3004_v41 = vld [vmem:[%s9258_s3 + $0xc8] sm:$0xff] }
 0x756   :  { %6118 = vmatprep.subr.bf16.mxu1 %v6567_v13  ;;  %6096 = vmatpush1.bf16.msra.mxu0 %v6095_v28  ;;  %v6104_v44 = vpack.c.bf16 %v3004_v41, %v3003_v40  ;;  %v3382_v28 = vld [vmem:[%s9262_s7] sm:$0xff]  ;;  %v3392_v40 = vld [vmem:[%s9262_s7 + $0x50] sm:$0xff]  ;;  %v3395_v41 = vld [vmem:[%s9262_s7 + $0x68] sm:$0xff] }
 0x757   :  { %6097 = vmatprep.subr.bf16.mxu0 %v6567_v13  ;;  %v6167_v32 = vpack.c.bf16 %v3384_v29, %v3382_v28  ;;  %v3408_v29 = vld [vmem:[%s9262_s7 + $0xd0] sm:$0xff] }
 0x758   :  { %5018 = vmatmul.mubr.msk.f32.gmra.mrb[20].mxu1 %vm69_vm3, %v5005_v10  ;;  %v6140_v10 = vpack.c.bf16 %v3117_v27, %v3116_v26  ;;  %v3383_v26 = vld [vmem:[%s9262_s7 + $0x8] sm:$0xff]  ;;  %v3385_v27 = vld [vmem:[%s9262_s7 + $0x18] sm:$0xff] }
 0x759   :  { %6120 = vmatpush1.bf16.msra.mxu1 %v6119_v45  ;;  %v6149_v45 = vpack.c.bf16 %v3123_v43, %v3122_v42  ;;  %v3397_v42 = vld [vmem:[%s9262_s7 + $0x78] sm:$0xff] }
 0x75a   :  { %6121 = vmatprep.subr.bf16.mxu1 %v6567_v13  ;;  %6099 = vmatpush1.bf16.msra.mxu0 %v6098_v33  ;;  %v6169_v33 = vpack.c.bf16 %v3389_v31, %v3387_v30  ;;  %v3411_v30 = vld [vmem:[%s9262_s7 + $0xe8] sm:$0xff]  ;;  %v5031_v31 = vld [vmem:[%s9262_s7 + $0xf8] sm:$0xff] }
 0x75b   :  { %6100 = vmatprep.subr.bf16.mxu0 %v6567_v13 }
 0x75d   :  { %6123 = vmatpush1.bf16.msra.mxu1 %v6122_v52  ;;  %v6152_v52 = vpack.c.bf16 %v3125_v49, %v3124_v47  ;;  %v3401_v47 = vld [vmem:[%s9262_s7 + $0x98] sm:$0xff] }
 0x75e   :  { %6124 = vmatprep.subr.bf16.mxu1 %v6567_v13  ;;  %6102 = vmatpush1.bf16.msra.mxu0 %v6101_v38  ;;  %v6173_v38 = vpack.c.bf16 %v3393_v36, %v3391_v35  ;;  %v3932_v36 = vld [vmem:[%s9264_s9] sm:$0xff] }
 0x75f   :  { %6103 = vmatprep.subr.bf16.mxu0 %v6567_v13 }
 0x761   :  { %6126 = vmatpush1.bf16.msra.mxu1 %v6125_v62  ;;  %v6155_v62 = vpack.c.bf16 %v3127_v61, %v3126_v59  ;;  %v3405_v59 = vld [vmem:[%s9262_s7 + $0xb8] sm:$0xff] }
 0x762   :  { %6127 = vmatprep.subr.bf16.mxu1 %v6567_v13  ;;  %6105 = vmatpush1.bf16.msra.mxu0 %v6104_v44  ;;  %v6177_v44 = vpack.c.bf16 %v3397_v42, %v3395_v41  ;;  %v6185_v61 = vpack.c.bf16 %v3405_v59, %v3403_v54  ;;  %v5030_v42 = vld [vmem:[%s9262_s7 + $0xf0] sm:$0xff] }
 0x763   :  { %6106 = vmatprep.subr.bf16.mxu0 %v6567_v13  ;;  %v5034_v59 = vld [vmem:[%s9262_s7 + $0x110] sm:$0xff] }
 0x765   :  { %6129 = vmatpush1.bf16.msra.mxu1 %v6128_v58  ;;  %v2391_v58 = vld [vmem:[%s9257_s2] sm:$0x3] }
 0x766   :  { %6130 = vmatprep.subr.bf16.mxu1 %v6567_v13  ;;  %6108 = vmatpush1.bf16.msra.mxu0 %v6107_v51  ;;  %v2510_v3 = vrot.slane %v2391_v58, %v7091_v48  ;;  %v2506_v4 = vrot.slane %v2391_v58, %v7096_v50  ;;  %v6181_v51 = vpack.c.bf16 %v3401_v47, %v3399_v56  ;;  %v5037_v56 = vld [vmem:[%s9262_s7 + $0x128] sm:$0xff] }
 0x767   :  { %6109 = vmatprep.subr.bf16.mxu0 %v6567_v13 }
 0x769   :  { %6132 = vmatpush1.bf16.msra.mxu1 %v6131_v9 }
 0x76a   :  { %6133 = vmatprep.subr.bf16.mxu1 %v6567_v13  ;;  %6111 = vmatpush1.bf16.msra.mxu0 %v6110_v60 }
 0x76d   :  { %6135 = vmatpush1.bf16.msra.mxu1 %v6134_v17 }
 0x76e   :  { %6136 = vmatprep.subr.bf16.mxu1 %v6567_v13 }
 0x771   :  { %6138 = vmatpush1.bf16.msra.mxu1 %v6137_v23  ;;  %v3211_v23 = vld [vmem:[%s9260_s5] sm:$0xff] }
 0x772   :  { %6139 = vmatprep.subr.bf16.mxu1 %v6567_v13 }
 0x775   :  { %6141 = vmatpush1.bf16.msra.mxu1 %v6140_v10  ;;  %v6165_v10 = vpack.c.bf16 %v3385_v27, %v3383_v26  ;;  %v3407_v26 = vld [vmem:[%s9262_s7 + $0xc8] sm:$0xff]  ;;  %v3409_v27 = vld [vmem:[%s9262_s7 + $0xd8] sm:$0xff] }
 0x776   :  { %6142 = vmatprep.subr.bf16.mxu1 %v6567_v13  ;;  %v6189_v28 = vpack.c.bf16 %v3409_v27, %v3407_v26  ;;  %v3941_v26 = vld [vmem:[%s9264_s9 + $0x48] sm:$0xff] }
 0x779   :  { %6144 = vmatpush1.bf16.msra.mxu1 %v6143_v57  ;;  %v3386_v57 = vld [vmem:[%s9262_s7 + $0x20] sm:$0xff] }
 0x77a   :  { %6145 = vmatprep.subr.bf16.mxu1 %v6567_v13  ;;  %v6171_v37 = vpack.c.bf16 %v3388_v34, %v3386_v57 }
 0x77d   :  { %6147 = vmatpush1.bf16.msra.mxu1 %v6146_v39  ;;  %v3390_v39 = vld [vmem:[%s9262_s7 + $0x40] sm:$0xff] }
 0x77e   :  { %6148 = vmatprep.subr.bf16.mxu1 %v6567_v13  ;;  %v6175_v43 = vpack.c.bf16 %v3392_v40, %v3390_v39  ;;  %v3935_v40 = vld [vmem:[%s9264_s9 + $0x18] sm:$0xff] }
 0x781   :  { %6150 = vmatpush1.bf16.msra.mxu1 %v6149_v45  ;;  %v3394_v45 = vld [vmem:[%s9262_s7 + $0x60] sm:$0xff] }
 0x782   :  { %6151 = vmatprep.subr.bf16.mxu1 %v6567_v13  ;;  %v6179_v49 = vpack.c.bf16 %v3396_v46, %v3394_v45 }
 0x785   :  { %6153 = vmatpush1.bf16.msra.mxu1 %v6152_v52  ;;  %v3398_v52 = vld [vmem:[%s9262_s7 + $0x80] sm:$0xff] }
 0x786   :  { %6154 = vmatprep.subr.bf16.mxu1 %v6567_v13  ;;  %v6183_v60 = vpack.c.bf16 %v3400_v53, %v3398_v52 }
 0x789   :  { %6156 = vmatpush1.bf16.msra.mxu1 %v6155_v62  ;;  %v3402_v62 = vld [vmem:[%s9262_s7 + $0xa0] sm:$0xff] }
 0x78a   :  { %6166 = vmatprep.subr.bf16.mxu1 %v6165_v10  ;;  %v3406_v10 = vld [vmem:[%s9262_s7 + $0xc0] sm:$0xff] }
 0x7eb   :  { %v2373_v0 = vpop.f32.mrb[14].mxu1 }
 0x7ec   :  { %v2374_v55 = vadd.f32 %v2373_v0, %v2298_v63  ;;  %v5462_v1 = vpop.f32.mrb[15].mxu1  ;;  %v3404_v63 = vld [vmem:[%s9262_s7 + $0xb0] sm:$0xff] }
 0x7ed   :  { %v6187_v0 = vpack.c.bf16 %v3404_v63, %v3402_v62  ;;  %v5036_v62 = vld [vmem:[%s9262_s7 + $0x120] sm:$0xff]  ;;  %v5039_v63 = vld [vmem:[%s9262_s7 + $0x138] sm:$0xff] }
 0x7ee   :  { %v2378_v2 = vsel %vm2377_vm1, %v2374_v55, -inf }
 0x7ef   :  { %2379 = vmax.xlane.f32.xlu0 %v2378_v2 }
 0x823   :  { %v2956_v5 = vpop.f32.mrb[16].mxu1 }
 0x824   :  { %v2958_v6 = vpop.f32.mrb[17].mxu1  ;;  %v6443_v9 = vadd.f32 %v2956_v5, %v2506_v4 }
 0x825   :  { %v6444_v8 = vadd.f32 %v2958_v6, %v2510_v3 }
 0x827   :  { %v2962_v11 = vpop.f32.mrb[18].mxu1  ;;  %5019 = vmatprep.mubr.msk.f32.mxu0 %vm680_vm4, %v6444_v8  ;;  %5022 = vmatprep.mubr.msk.f32.mxu1 %vm680_vm4, %v6444_v8 }
 0x828   :  { %v2964_v12 = vpop.f32.mrb[19].mxu1  ;;  %3083 = vmatmul.mubr.f32.vlgmr.msra.gmra.mrb[20].mxu0 %v6443_v9  ;;  %3193 = vmatmul.mubr.f32.vlgmr.msra.gmra.mrb[22].mxu1 %v6443_v9  ;;  %v6445_v15 = vadd.f32 %v2962_v11, %v2506_v4 }
 0x829   :  { %v6446_v14 = vadd.f32 %v2964_v12, %v2510_v3  ;;  %6168 = vmatpush1.bf16.msra.mxu1 %v6167_v32  ;;  %v5033_v32 = vld [vmem:[%s9262_s7 + $0x108] sm:$0xff] }
 0x82a   :  { %6170 = vmatprep.subr.bf16.mxu1 %v6169_v33  ;;  %v3410_v33 = vld [vmem:[%s9262_s7 + $0xe0] sm:$0xff]  ;;  %v6193_v57 = vpack.c.bf16 %v5033_v32, %v5031_v31  ;;  %v3942_v32 = vld [vmem:[%s9264_s9 + $0x50] sm:$0xff] }
 0x82b   :  { %v2968_v16 = vpop.f32.mrb[20].mxu1  ;;  %5020 = vmatprep.mubr.msk.f32.mxu0 %vm680_vm4, %v6446_v14  ;;  %5023 = vmatprep.mubr.msk.f32.mxu1 %vm680_vm4, %v6446_v14 }
 0x82c   :  { %v2970_v17 = vpop.f32.mrb[21].mxu1  ;;  %3088 = vmatmul.mubr.f32.gmra.mrb[22].mxu0 %v6445_v15  ;;  %3198 = vmatmul.mubr.f32.gmra.mrb[24].mxu1 %v6445_v15  ;;  %v6447_v19 = vadd.f32 %v2968_v16, %v2506_v4 }
 0x82d   :  { %v6448_v18 = vadd.f32 %v2970_v17, %v2510_v3  ;;  %6172 = vmatpush1.bf16.msra.mxu1 %v6171_v37  ;;  %v3933_v37 = vld [vmem:[%s9264_s9 + $0x8] sm:$0xff] }
 0x82e   :  { %6174 = vmatprep.subr.bf16.mxu1 %v6173_v38  ;;  %v3934_v38 = vld [vmem:[%s9264_s9 + $0x10] sm:$0xff]  ;;  %v6306_v39 = vpack.c.bf16 %v3933_v37, %v3932_v36  ;;  %v5048_v36 = vld [vmem:[%s9262_s7 + $0x180] sm:$0xff]  ;;  %v5051_v37 = vld [vmem:[%s9262_s7 + $0x198] sm:$0xff] }
 0x82f   :  { %5021 = vmatprep.mubr.msk.f32.mxu0 %vm680_vm4, %v6448_v18  ;;  %5024 = vmatprep.mubr.msk.f32.mxu1 %vm680_vm4, %v6448_v18  ;;  %v3212_v18 = vld [vmem:[%s9260_s5 + $0x8] sm:$0xf]  ;;  %v6309_v47 = vpack.c.bf16 %v3935_v40, %v3934_v38  ;;  %v3944_v40 = vld [vmem:[%s9264_s9 + $0x60] sm:$0xff] }
 0x830   :  { %3093 = vmatmul.mubr.f32.gmra.mrb[24].mxu0 %v6447_v19  ;;  %3203 = vmatmul.mubr.f32.gmra.mrb[26].mxu1 %v6447_v19  ;;  %v3294_v19 = vld [vmem:[%s9261_s6] sm:$0xff]  ;;  %v5053_v38 = vld [vmem:[%s9262_s7 + $0x1a8] sm:$0xff] }
 0x831   :  { %3479 = vmatprep.mubr.f32.mxu1 %v6565_v7  ;;  %5469 = vmatprep.mubr.msk.f32.mxu0 %vm885_vm5, %v3211_v23 }
 0x832   :  { %6176 = vmatpush1.bf16.msra.mxu1 %v6175_v43  ;;  %v5032_v43 = vld [vmem:[%s9262_s7 + $0x100] sm:$0xff] }
 0x833   :  { %6178 = vmatprep.subr.bf16.mxu1 %v6177_v44  ;;  %v5035_v44 = vld [vmem:[%s9262_s7 + $0x118] sm:$0xff]  ;;  %v6195_v54 = vpack.c.bf16 %v5032_v43, %v5030_v42  ;;  %v6213_v43 = vpack.c.bf16 %v5053_v38, %v5051_v37  ;;  %v5081_v38 = vld [vmem:[%s9262_s7 + $0x280] sm:$0xff] }
 0x836   :  { %6180 = vmatpush1.bf16.msra.mxu1 %v6179_v49  ;;  %v3936_v49 = vld [vmem:[%s9264_s9 + $0x20] sm:$0xff] }
 0x837   :  { %6182 = vmatprep.subr.bf16.mxu1 %v6181_v51  ;;  %v3937_v51 = vld [vmem:[%s9264_s9 + $0x28] sm:$0xff] }
 0x83a   :  { %6184 = vmatpush1.bf16.msra.mxu1 %v6183_v60 }
 0x83b   :  { %6186 = vmatprep.subr.bf16.mxu1 %v6185_v61  ;;  %v6197_v61 = vpack.c.bf16 %v5037_v56, %v5035_v44  ;;  %v5050_v44 = vld [vmem:[%s9262_s7 + $0x190] sm:$0xff]  ;;  %v5057_v56 = vld [vmem:[%s9262_s7 + $0x1c8] sm:$0xff] }
 0x83e   :  { %6188 = vmatpush1.bf16.msra.mxu1 %v6187_v0  ;;  %v5041_v0 = vld [vmem:[%s9262_s7 + $0x148] sm:$0xff] }
 0x83f   :  { %6190 = vmatprep.subr.bf16.mxu1 %v6189_v28 }
 0x87c   :  { %v2380_v20 = vpop.xlane.xlu0 %2379 }
 0x87d   :  { %v8389_v21 = vsub.f32 %v2374_v55, %v2380_v20  ;;  %v3295_v20 = vld [vmem:[%s9261_s6 + $0x8] sm:$0xf] }
 0x87f   :  { %v2382_v22 = vmul.f32 1.442695, %v8389_v21 }
 0x881   :  { %6533 = vpow2.f32 %v2382_v22 }
 0x88b   :  { %v6534_v24 = vpop.eup %6533 }
 0x88c   :  { %v2384_v25 = vsel %vm2377_vm1, %v6534_v24, 0.0 }
 0x88d   :  { %2385 = vadd.xlane.f32.xlu1 %v2384_v25 }
 0x8fb   :  { %v3084_v55 = vpop.f32.mrb[20].mxu0  ;;  %v3194_v1 = vpop.f32.mrb[22].mxu1 }
 0x8fc   :  { %v3208_v2 = vmax.f32 %v3084_v55, %v3194_v1  ;;  %v3086_v58 = vpop.f32.mrb[21].mxu0  ;;  %v3196_v3 = vpop.f32.mrb[23].mxu1  ;;  %v6312_v55 = vpack.c.bf16 %v3937_v51, %v3936_v49  ;;  %v3946_v49 = vld [vmem:[%s9264_s9 + $0x70] sm:$0xff]  ;;  %v3947_v51 = vld [vmem:[%s9264_s9 + $0x78] sm:$0xff] }
 0x8ff   :  { %v3089_v4 = vpop.f32.mrb[22].mxu0  ;;  %v3199_v5 = vpop.f32.mrb[24].mxu1 }
 0x900   :  { %v3209_v6 = vmax.f32 %v3089_v4, %v3199_v5  ;;  %v3091_v8 = vpop.f32.mrb[23].mxu0  ;;  %v3201_v9 = vpop.f32.mrb[25].mxu1 }
 0x901   :  { %v3938_v9 = vld [vmem:[%s9264_s9 + $0x30] sm:$0xff] }
 0x902   :  { %v6157_v11 = vpack.c.bf16 %v3209_v6, %v3208_v2 }
 0x903   :  { %v3094_v12 = vpop.f32.mrb[24].mxu0  ;;  %v3204_v14 = vpop.f32.mrb[26].mxu1 }
 0x904   :  { %v3210_v15 = vmax.f32 %v3094_v12, %v3204_v14  ;;  %v3096_v16 = vpop.f32.mrb[25].mxu0  ;;  %v3206_v17 = vpop.f32.mrb[27].mxu1  ;;  %6158 = vmatprep.subr.bf16.mxu0 %v6157_v11  ;;  %v6199_v12 = vpack.c.bf16 %v5036_v62, %v5034_v59  ;;  %v6201_v14 = vpack.c.bf16 %v5041_v0, %v5039_v63  ;;  %v5056_v59 = vld [vmem:[%s9262_s7 + $0x1c0] sm:$0xff]  ;;  %v3949_v62 = vld [vmem:[%s9264_s9 + $0x88] sm:$0xff]  ;;  %v5059_v0 = vld [vmem:[%s9262_s7 + $0x1d8] sm:$0xff] }
 0x905   :  { %6160 = vmatpush3.bf16.msra.mxu0 %v6157_v11  ;;  %v5040_v16 = vld [vmem:[%s9262_s7 + $0x140] sm:$0xff] }
 0x906   :  { %5467 = vmatprep.subr.mxu0 %v3210_v15 }
 0x909   :  { %5468 = vmatpush3.msra.mxu0 %v3210_v15 }
 0x90a   :  { %6162 = vmatprep.subr.bf16.mxu0 %v6157_v11  ;;  %5470 = vmatmul.mubr.msk.f32.vlgmr.msra.gmra.mrb[26].mxu0 %vm885_vm5, %v3212_v18 }
 0x90b   :  { %6164 = vmatpush3.bf16.msra.mxu0 %v6157_v11  ;;  %5478 = vmatprep.mubr.msk.f32.mxu0 %vm885_vm5, %v3294_v19  ;;  %v3939_v11 = vld [vmem:[%s9264_s9 + $0x38] sm:$0xff] }
 0x90c   :  { %5476 = vmatprep.subr.mxu0 %v3210_v15 }
 0x90f   :  { %5477 = vmatpush3.msra.mxu0 %v3210_v15  ;;  %v5038_v15 = vld [vmem:[%s9262_s7 + $0x130] sm:$0xff] }
 0x910   :  { %5479 = vmatmul.mubr.msk.f32.vlgmr.msra.gmra.mrb[28].mxu0 %vm885_vm5, %v3295_v20  ;;  %6305 = vmatprep.subr.bf16.mxu0 %v6567_v13  ;;  %v6203_v27 = vpack.c.bf16 %v5040_v16, %v5038_v15  ;;  %v5070_v15 = vld [vmem:[%s9262_s7 + $0x228] sm:$0xff]  ;;  %v5072_v16 = vld [vmem:[%s9262_s7 + $0x238] sm:$0xff] }
 0x911   :  { %6307 = vmatpush1.bf16.msra.mxu0 %v6306_v39 }
 0x912   :  { %6308 = vmatprep.subr.bf16.mxu0 %v6567_v13 }
 0x915   :  { %6310 = vmatpush1.bf16.msra.mxu0 %v6309_v47 }
 0x916   :  { %6311 = vmatprep.subr.bf16.mxu0 %v6567_v13 }
 0x919   :  { %6313 = vmatpush1.bf16.msra.mxu0 %v6312_v55  ;;  %v5062_v55 = vld [vmem:[%s9262_s7 + $0x1e8] sm:$0xff] }
 0x91a   :  { %v2386_v22 = vpop.xlane.xlu1 %2385  ;;  %6314 = vmatprep.subr.bf16.mxu0 %v6567_v13 }
 0x91b   :  { %6535 = vlog2.f32 %v2386_v22  ;;  %v5043_v22 = vld [vmem:[%s9262_s7 + $0x158] sm:$0xff] }
 0x925   :  { %v6536_v23 = vpop.eup %6535 }
 0x926   :  { %v2388_v24 = vmul.f32 0.6931472, %v6536_v23  ;;  %v5045_v23 = vld [vmem:[%s9262_s7 + $0x168] sm:$0xff] }
 0x927   :  { %v6205_v28 = vpack.c.bf16 %v5045_v23, %v5043_v22  ;;  %v6229_v23 = vpack.c.bf16 %v5072_v16, %v5070_v15 }
 0x928   :  { %v2389_v25 = vsub.f32 %v8389_v21, %v2388_v24  ;;  %v6191_v21 = vpack.c.bf16 %v3408_v29, %v3406_v10  ;;  %v6315_v24 = vpack.c.bf16 %v3939_v11, %v3938_v9  ;;  %v5042_v10 = vld [vmem:[%s9262_s7 + $0x150] sm:$0xff]  ;;  %v5044_v29 = vld [vmem:[%s9262_s7 + $0x160] sm:$0xff] }
 0x92a   :  { %2390 = vst.msk [vmem:[#allocation2] sm:$0x1] %vm2377_vm1, %v2389_v25  ;;  %6192 = vmatpush1.bf16.msra.mxu1 %v6191_v21  ;;  %v3940_v25 = vld [vmem:[%s9264_s9 + $0x40] sm:$0xff]  ;;  %v5047_v21 = vld [vmem:[%s9262_s7 + $0x178] sm:$0xff]  ;;  %6316 = vmatpush1.bf16.msra.mxu0 %v6315_v24 }
 0x92b   :  { %3443 = vmatprep.subr.mxu1 %v3411_v30  ;;  %v5049_v30 = vld [vmem:[%s9262_s7 + $0x188] sm:$0xff]  ;;  %v6318_v31 = vpack.c.bf16 %v3941_v26, %v3940_v25  ;;  %6317 = vmatprep.subr.bf16.mxu0 %v6567_v13  ;;  %v5069_v24 = vld [vmem:[%s9262_s7 + $0x220] sm:$0xff]  ;;  %v5071_v25 = vld [vmem:[%s9262_s7 + $0x230] sm:$0xff] }
 0x92c   :  { %v5074_v26 = vld [vmem:[%s9262_s7 + $0x248] sm:$0xff] }
 0x92e   :  { %3444 = vmatpush1.msra.mxu1 %v3410_v33  ;;  %v3943_v33 = vld [vmem:[%s9264_s9 + $0x58] sm:$0xff]  ;;  %6319 = vmatpush1.bf16.msra.mxu0 %v6318_v31 }
 0x92f   :  { %6194 = vmatprep.subr.bf16.mxu1 %v6193_v57  ;;  %v6207_v57 = vpack.c.bf16 %v5044_v29, %v5042_v10  ;;  %v6321_v39 = vpack.c.bf16 %v3943_v33, %v3942_v32  ;;  %6320 = vmatprep.subr.bf16.mxu0 %v6567_v13  ;;  %v5073_v10 = vld [vmem:[%s9262_s7 + $0x240] sm:$0xff]  ;;  %v5075_v29 = vld [vmem:[%s9262_s7 + $0x250] sm:$0xff] }
 0x930   :  { %v6235_v31 = vpack.c.bf16 %v5075_v29, %v5073_v10  ;;  %v5077_v33 = vld [vmem:[%s9262_s7 + $0x260] sm:$0xff]  ;;  %v5117_v10 = vld [vmem:[%s9262_s7 + $0x398] sm:$0xff]  ;;  %v5119_v29 = vld [vmem:[%s9262_s7 + $0x3a8] sm:$0xff] }
 0x932   :  { %6322 = vmatpush1.bf16.msra.mxu0 %v6321_v39  ;;  %v5083_v39 = vld [vmem:[%s9262_s7 + $0x290] sm:$0xff] }
 0x933   :  { %6323 = vmatprep.subr.bf16.mxu0 %v6567_v13 }
 0x9dd   :  { %v5471_v34 = vpop.f32.mrb[26].mxu0 }
 0x9de   :  { %v3285_v35 = vpop.f32.mrb[27].mxu0 }
 0x9e3   :  { %v5480_v41 = vpop.f32.mrb[28].mxu0 }
 0x9e4   :  { %v3378_v45 = vmax.f32 %v5471_v34, %v5480_v41  ;;  %v3368_v46 = vpop.f32.mrb[29].mxu0  ;;  %v6209_v34 = vpack.c.bf16 %v5049_v30, %v5047_v21  ;;  %v3945_v41 = vld [vmem:[%s9264_s9 + $0x68] sm:$0xff]  ;;  %v5080_v30 = vld [vmem:[%s9262_s7 + $0x278] sm:$0xff] }
 0x9e5   :  { %v3377_v52 = vmax.f32 %v3285_v35, %v3368_v46  ;;  %v5046_v35 = vld [vmem:[%s9262_s7 + $0x170] sm:$0xff]  ;;  %v5055_v46 = vld [vmem:[%s9262_s7 + $0x1b8] sm:$0xff]  ;;  %v6324_v47 = vpack.c.bf16 %v3945_v41, %v3944_v40  ;;  %v5078_v21 = vld [vmem:[%s9262_s7 + $0x268] sm:$0xff] }
 0x9e6   :  { %v3380_v53 = vmax.f32 %v3378_v45, 0.0  ;;  %v6211_v42 = vpack.c.bf16 %v5048_v36, %v5046_v35  ;;  %v5052_v45 = vld [vmem:[%s9262_s7 + $0x1a0] sm:$0xff]  ;;  %v6237_v32 = vpack.c.bf16 %v5080_v30, %v5078_v21  ;;  %v5084_v35 = vld [vmem:[%s9262_s7 + $0x298] sm:$0xff]  ;;  %v5086_v40 = vld [vmem:[%s9262_s7 + $0x2a8] sm:$0xff]  ;;  %v6273_v30 = vpack.c.bf16 %v5119_v29, %v5117_v10 }
 0x9e7   :  { %v3379_v60 = vmax.f32 %v3377_v52, 0.0  ;;  %v6215_v52 = vpack.c.bf16 %v5052_v45, %v5050_v44  ;;  %6325 = vmatpush1.bf16.msra.mxu0 %v6324_v47  ;;  %v5088_v41 = vld [vmem:[%s9262_s7 + $0x2b8] sm:$0xff]  ;;  %v5085_v44 = vld [vmem:[%s9262_s7 + $0x2a0] sm:$0xff]  ;;  %v5087_v45 = vld [vmem:[%s9262_s7 + $0x2b0] sm:$0xff] }
 0x9e8   :  { %v3531_v1 = vrot.slane %v3380_v53, 1  ;;  %v3639_v2 = vrot.slane %v3380_v53, 2  ;;  %v3747_v58 = vrot.slane %v3380_v53, 3  ;;  %v3855_v3 = vrot.slane %v3380_v53, 4  ;;  %6326 = vmatprep.subr.bf16.mxu0 %v6567_v13  ;;  %v5093_v47 = vld [vmem:[%s9262_s7 + $0x2d8] sm:$0xff]  ;;  %v4026_v10 = vld [vmem:[%s9265_s10 + $0x8] sm:$0xff] }
 0x9e9   :  { %5029 = vmatmul.mubr.msk.f32.vlgmr.msra.gmra.mrb[28].mxu1 %vm1085_vm6, %v3379_v60  ;;  %v3530_v4 = vrot.slane %v3379_v60, 1  ;;  %v3638_v5 = vrot.slane %v3379_v60, 2  ;;  %v3746_v6 = vrot.slane %v3379_v60, 3  ;;  %v3854_v8 = vrot.slane %v3379_v60, 4 }
 0x9ea   :  { %6196 = vmatpush1.bf16.msra.mxu1 %v6195_v54  ;;  %3599 = vmatprep.mubr.f32.mxu1 %v6565_v7  ;;  %v6217_v53 = vpack.c.bf16 %v5057_v56, %v5055_v46  ;;  %v5054_v54 = vld [vmem:[%s9262_s7 + $0x1b0] sm:$0xff]  ;;  %v6327_v60 = vpack.c.bf16 %v3947_v51, %v3946_v49  ;;  %v6247_v46 = vpack.c.bf16 %v5087_v45, %v5085_v44  ;;  %v5090_v56 = vld [vmem:[%s9262_s7 + $0x2c8] sm:$0xff]  ;;  %v5127_v44 = vld [vmem:[%s9262_s7 + $0x3e0] sm:$0xff] }
 0x9eb   :  { %6198 = vmatprep.subr.bf16.mxu1 %v6197_v61  ;;  %v8567_v17 = vsel %vm1205_vm7, %v3530_v4, %v3531_v1  ;;  %v8570_v18 = vsel %vm1315_vm8, %v3638_v5, %v3639_v2  ;;  %v8573_v19 = vsel %vm1425_vm9, %v3746_v6, %v3747_v58  ;;  %v8576_v20 = vsel %vm79_vm0, %v3854_v8, %v3855_v3  ;;  %v3948_v61 = vld [vmem:[%s9264_s9 + $0x80] sm:$0xff]  ;;  %v5064_v1 = vld [vmem:[%s9262_s7 + $0x1f8] sm:$0xff]  ;;  %v5063_v3 = vld [vmem:[%s9262_s7 + $0x1f0] sm:$0xff] }
 0x9ec   :  { %v6219_v63 = vpack.c.bf16 %v5056_v59, %v5054_v54  ;;  %6328 = vmatpush1.bf16.msra.mxu0 %v6327_v60  ;;  %v6330_v2 = vpack.c.bf16 %v3949_v62, %v3948_v61  ;;  %v5061_v58 = vld [vmem:[%s9262_s7 + $0x1e0] sm:$0xff]  ;;  %v5066_v4 = vld [vmem:[%s9262_s7 + $0x208] sm:$0xff]  ;;  %v5068_v5 = vld [vmem:[%s9262_s7 + $0x218] sm:$0xff]  ;;  %v6221_v8 = vpack.c.bf16 %v5064_v1, %v5062_v55 }
 0x9ed   :  { %6329 = vmatprep.subr.bf16.mxu0 %v6567_v13  ;;  %v5058_v6 = vld [vmem:[%s9262_s7 + $0x1d0] sm:$0xff]  ;;  %v6223_v9 = vpack.c.bf16 %v5063_v3, %v5061_v58  ;;  %v6225_v11 = vpack.c.bf16 %v5068_v5, %v5066_v4  ;;  %v5095_v49 = vld [vmem:[%s9262_s7 + $0x2e8] sm:$0xff]  ;;  %v5089_v59 = vld [vmem:[%s9262_s7 + $0x2c0] sm:$0xff] }
 0x9ee   :  { %6200 = vmatpush1.bf16.msra.mxu1 %v6199_v12  ;;  %v5065_v12 = vld [vmem:[%s9262_s7 + $0x200] sm:$0xff]  ;;  %v5092_v51 = vld [vmem:[%s9262_s7 + $0x2d0] sm:$0xff]  ;;  %v5099_v54 = vld [vmem:[%s9262_s7 + $0x308] sm:$0xff]  ;;  %v6249_v60 = vpack.c.bf16 %v5095_v49, %v5093_v47 }
 0x9ef   :  { %6202 = vmatprep.subr.bf16.mxu1 %v6201_v14  ;;  %v5067_v14 = vld [vmem:[%s9262_s7 + $0x210] sm:$0xff]  ;;  %v5101_v55 = vld [vmem:[%s9262_s7 + $0x318] sm:$0xff]  ;;  %v5103_v1 = vld [vmem:[%s9262_s7 + $0x328] sm:$0xff] }
 0x9f0   :  { %6331 = vmatpush1.bf16.msra.mxu0 %v6330_v2  ;;  %v6227_v22 = vpack.c.bf16 %v5067_v14, %v5065_v12  ;;  %v6257_v58 = vpack.c.bf16 %v5103_v1, %v5101_v55  ;;  %v5100_v3 = vld [vmem:[%s9262_s7 + $0x310] sm:$0xff]  ;;  %v5102_v4 = vld [vmem:[%s9262_s7 + $0x320] sm:$0xff]  ;;  %v5105_v5 = vld [vmem:[%s9262_s7 + $0x338] sm:$0xff] }
 0x9f1   :  { %6332 = vmatprep.subr.bf16.mxu0 %v6567_v13  ;;  %v5109_v12 = vld [vmem:[%s9262_s7 + $0x358] sm:$0xff]  ;;  %v5111_v14 = vld [vmem:[%s9262_s7 + $0x368] sm:$0xff]  ;;  %v5129_v45 = vld [vmem:[%s9262_s7 + $0x3f0] sm:$0xff] }
 0x9f2   :  { %6204 = vmatpush1.bf16.msra.mxu1 %v6203_v27  ;;  %v6231_v27 = vpack.c.bf16 %v5071_v25, %v5069_v24  ;;  %v6265_v16 = vpack.c.bf16 %v5111_v14, %v5109_v12  ;;  %v5113_v24 = vld [vmem:[%s9262_s7 + $0x378] sm:$0xff]  ;;  %v5115_v25 = vld [vmem:[%s9262_s7 + $0x388] sm:$0xff]  ;;  %v6283_v47 = vpack.c.bf16 %v5129_v45, %v5127_v44  ;;  %v5139_v1 = vld [vmem:[%s9262_s7 + $0x440] sm:$0xff] }
 0x9f3   :  { %6206 = vmatprep.subr.bf16.mxu1 %v6205_v28  ;;  %v5147_v14 = vld [vmem:[%s9262_s7 + $0x480] sm:$0xff] }
 0x9f4   :  { %v4037_v45 = vld [vmem:[%s9265_s10 + $0x60] sm:$0xff] }
 0x9f6   :  { %6208 = vmatpush1.bf16.msra.mxu1 %v6207_v57  ;;  %v5079_v57 = vld [vmem:[%s9262_s7 + $0x270] sm:$0xff] }
 0x9f7   :  { %6210 = vmatprep.subr.bf16.mxu1 %v6209_v34  ;;  %v5082_v34 = vld [vmem:[%s9262_s7 + $0x288] sm:$0xff]  ;;  %v6239_v36 = vpack.c.bf16 %v5079_v57, %v5077_v33  ;;  %v5121_v57 = vld [vmem:[%s9262_s7 + $0x3b8] sm:$0xff] }
 0x9f8   :  { %v6241_v37 = vpack.c.bf16 %v5084_v35, %v5082_v34  ;;  %v5124_v34 = vld [vmem:[%s9262_s7 + $0x3c8] sm:$0xff]  ;;  %v5126_v35 = vld [vmem:[%s9262_s7 + $0x3d8] sm:$0xff] }
 0x9fa   :  { %6212 = vmatpush1.bf16.msra.mxu1 %v6211_v42  ;;  %v6243_v42 = vpack.c.bf16 %v5083_v39, %v5081_v38  ;;  %v5128_v38 = vld [vmem:[%s9262_s7 + $0x3e8] sm:$0xff]  ;;  %v5130_v39 = vld [vmem:[%s9262_s7 + $0x3f8] sm:$0xff] }
 0x9fb   :  { %6214 = vmatprep.subr.bf16.mxu1 %v6213_v43  ;;  %v6245_v43 = vpack.c.bf16 %v5088_v41, %v5086_v40  ;;  %v5120_v40 = vld [vmem:[%s9262_s7 + $0x3b0] sm:$0xff]  ;;  %v6277_v41 = vpack.c.bf16 %v5126_v35, %v5124_v34  ;;  %v4030_v34 = vld [vmem:[%s9265_s10 + $0x28] sm:$0xff] }
 0x9fe   :  { %6216 = vmatpush1.bf16.msra.mxu1 %v6215_v52  ;;  %v5094_v52 = vld [vmem:[%s9262_s7 + $0x2e0] sm:$0xff] }
 0x9ff   :  { %6218 = vmatprep.subr.bf16.mxu1 %v6217_v53  ;;  %v5097_v53 = vld [vmem:[%s9262_s7 + $0x2f8] sm:$0xff]  ;;  %v6251_v61 = vpack.c.bf16 %v5094_v52, %v5092_v51  ;;  %v5131_v51 = vld [vmem:[%s9262_s7 + $0x400] sm:$0xff]  ;;  %v5133_v52 = vld [vmem:[%s9262_s7 + $0x410] sm:$0xff] }
 0xa00   :  { %v6253_v62 = vpack.c.bf16 %v5099_v54, %v5097_v53  ;;  %v5136_v53 = vld [vmem:[%s9262_s7 + $0x428] sm:$0xff]  ;;  %v6287_v54 = vpack.c.bf16 %v5133_v52, %v5131_v51  ;;  %v4041_v52 = vld [vmem:[%s9265_s10 + $0x80] sm:$0xff] }
 0xa02   :  { %6220 = vmatpush1.bf16.msra.mxu1 %v6219_v63  ;;  %v5096_v63 = vld [vmem:[%s9262_s7 + $0x2f0] sm:$0xff] }
 0xa03   :  { %3563 = vmatprep.subr.mxu1 %v5059_v0  ;;  %v5098_v0 = vld [vmem:[%s9262_s7 + $0x300] sm:$0xff] }
 0xa04   :  { %v6255_v2 = vpack.c.bf16 %v5098_v0, %v5096_v63  ;;  %v5142_v63 = vld [vmem:[%s9262_s7 + $0x458] sm:$0xff] }
 0xa06   :  { %3564 = vmatpush1.msra.mxu1 %v5058_v6  ;;  %v6259_v6 = vpack.c.bf16 %v5102_v4, %v5100_v3  ;;  %v5146_v3 = vld [vmem:[%s9262_s7 + $0x478] sm:$0xff] }
 0xa07   :  { %5060 = vmatmul.mubr.msk.f32.vlgmr.msra.gmra.mrb[28].mxu1 %vm1085_vm6, %v8567_v17  ;;  %6222 = vmatprep.subr.bf16.mxu1 %v6221_v8  ;;  %v5076_v17 = vld [vmem:[%s9262_s7 + $0x258] sm:$0xff] }
 0xa08   :  { %6224 = vmatpush1.bf16.msra.mxu1 %v6223_v9  ;;  %3707 = vmatprep.mubr.f32.mxu1 %v6565_v7  ;;  %v6233_v28 = vpack.c.bf16 %v5076_v17, %v5074_v26  ;;  %v5104_v9 = vld [vmem:[%s9262_s7 + $0x330] sm:$0xff]  ;;  %v6269_v17 = vpack.c.bf16 %v5115_v25, %v5113_v24  ;;  %v3951_v25 = vld [vmem:[%s9264_s9 + $0x98] sm:$0xff] }
 0xa09   :  { %6226 = vmatprep.subr.bf16.mxu1 %v6225_v11  ;;  %v5106_v11 = vld [vmem:[%s9262_s7 + $0x340] sm:$0xff]  ;;  %v3950_v24 = vld [vmem:[%s9264_s9 + $0x90] sm:$0xff] }
 0xa0a   :  { %v6263_v15 = vpack.c.bf16 %v5106_v11, %v5104_v9  ;;  %v5150_v9 = vld [vmem:[%s9262_s7 + $0x498] sm:$0xff] }
 0xa0c   :  { %6228 = vmatpush1.bf16.msra.mxu1 %v6227_v22  ;;  %v5108_v22 = vld [vmem:[%s9262_s7 + $0x350] sm:$0xff] }
 0xa0d   :  { %6230 = vmatprep.subr.bf16.mxu1 %v6229_v23  ;;  %v5110_v23 = vld [vmem:[%s9262_s7 + $0x360] sm:$0xff] }
 0xa0e   :  { %v6267_v26 = vpack.c.bf16 %v5110_v23, %v5108_v22  ;;  %v5152_v22 = vld [vmem:[%s9262_s7 + $0x4a8] sm:$0xff]  ;;  %v5151_v23 = vld [vmem:[%s9262_s7 + $0x4a0] sm:$0xff] }
 0xa10   :  { %6232 = vmatpush1.bf16.msra.mxu1 %v6231_v27  ;;  %v5112_v27 = vld [vmem:[%s9262_s7 + $0x370] sm:$0xff] }
 0xa11   :  { %6234 = vmatprep.subr.bf16.mxu1 %v6233_v28  ;;  %v5114_v28 = vld [vmem:[%s9262_s7 + $0x380] sm:$0xff] }
 0xa12   :  { %v6271_v21 = vpack.c.bf16 %v5114_v28, %v5112_v27  ;;  %v4025_v28 = vld [vmem:[%s9265_s10] sm:$0xff] }
 0xa14   :  { %6236 = vmatpush1.bf16.msra.mxu1 %v6235_v31  ;;  %v5116_v31 = vld [vmem:[%s9262_s7 + $0x390] sm:$0xff] }
 0xa15   :  { %6238 = vmatprep.subr.bf16.mxu1 %v6237_v32  ;;  %v5118_v32 = vld [vmem:[%s9262_s7 + $0x3a0] sm:$0xff] }
 0xa16   :  { %v6275_v33 = vpack.c.bf16 %v5118_v32, %v5116_v31  ;;  %v6336_v31 = vpack.c.bf16 %v4026_v10, %v4025_v28 }
 0xa18   :  { %6240 = vmatpush1.bf16.msra.mxu1 %v6239_v36  ;;  %v5123_v36 = vld [vmem:[%s9262_s7 + $0x3c0] sm:$0xff] }
 0xa19   :  { %6242 = vmatprep.subr.bf16.mxu1 %v6241_v37  ;;  %v5125_v37 = vld [vmem:[%s9262_s7 + $0x3d0] sm:$0xff] }
 0xa1c   :  { %6244 = vmatpush1.bf16.msra.mxu1 %v6243_v42  ;;  %v6279_v42 = vpack.c.bf16 %v5125_v37, %v5123_v36  ;;  %v4031_v36 = vld [vmem:[%s9265_s10 + $0x30] sm:$0xff]  ;;  %v4032_v37 = vld [vmem:[%s9265_s10 + $0x38] sm:$0xff] }
 0xa1d   :  { %6246 = vmatprep.subr.bf16.mxu1 %v6245_v43  ;;  %v6281_v43 = vpack.c.bf16 %v5130_v39, %v5128_v38  ;;  %v6345_v38 = vpack.c.bf16 %v4032_v37, %v4031_v36  ;;  %v4033_v39 = vld [vmem:[%s9265_s10 + $0x40] sm:$0xff]  ;;  %v5164_v36 = vld [vmem:[%s9268_s13 + $0x78] sm:$0xff] }
 0xa20   :  { %6248 = vmatpush1.bf16.msra.mxu1 %v6247_v46  ;;  %v5132_v46 = vld [vmem:[%s9262_s7 + $0x408] sm:$0xff] }
 0xa21   :  { %3671 = vmatprep.subr.mxu1 %v5090_v56  ;;  %v5134_v56 = vld [vmem:[%s9262_s7 + $0x418] sm:$0xff] }
 0xa22   :  { %v6285_v49 = vpack.c.bf16 %v5134_v56, %v5132_v46  ;;  %v4038_v46 = vld [vmem:[%s9265_s10 + $0x68] sm:$0xff] }
 0xa23   :  { %v6354_v56 = vpack.c.bf16 %v4038_v46, %v4037_v45  ;;  %v5171_v45 = vld [vmem:[%s9268_s13 + $0xa8] sm:$0xff] }
 0xa24   :  { %3672 = vmatpush1.msra.mxu1 %v5089_v59 }
 0xa25   :  { %5091 = vmatmul.mubr.msk.f32.vlgmr.msra.gmra.mrb[28].mxu1 %vm1085_vm6, %v8570_v18  ;;  %6250 = vmatprep.subr.bf16.mxu1 %v6249_v60  ;;  %v5107_v18 = vld [vmem:[%s9262_s7 + $0x348] sm:$0xff]  ;;  %v5135_v60 = vld [vmem:[%s9262_s7 + $0x420] sm:$0xff] }
 0xa26   :  { %6252 = vmatpush1.bf16.msra.mxu1 %v6251_v61  ;;  %3815 = vmatprep.mubr.f32.mxu1 %v6565_v7  ;;  %v6261_v8 = vpack.c.bf16 %v5107_v18, %v5105_v5  ;;  %v5137_v61 = vld [vmem:[%s9262_s7 + $0x430] sm:$0xff]  ;;  %v5143_v18 = vld [vmem:[%s9262_s7 + $0x460] sm:$0xff] }
 0xa27   :  { %6254 = vmatprep.subr.bf16.mxu1 %v6253_v62  ;;  %v5140_v62 = vld [vmem:[%s9262_s7 + $0x448] sm:$0xff]  ;;  %v6291_v0 = vpack.c.bf16 %v5137_v61, %v5135_v60 }
 0xa28   :  { %v6293_v55 = vpack.c.bf16 %v5142_v63, %v5140_v62 }
 0xa2a   :  { %6256 = vmatpush1.bf16.msra.mxu1 %v6255_v2  ;;  %v5141_v2 = vld [vmem:[%s9262_s7 + $0x450] sm:$0xff] }
 0xa2b   :  { %6258 = vmatprep.subr.bf16.mxu1 %v6257_v58  ;;  %v5144_v58 = vld [vmem:[%s9262_s7 + $0x468] sm:$0xff]  ;;  %v6295_v4 = vpack.c.bf16 %v5141_v2, %v5139_v1  ;;  %v4116_v1 = vld [vmem:[%s9266_s11] sm:$0xf] }
 0xa2c   :  { %v6297_v5 = vpack.c.bf16 %v5146_v3, %v5144_v58  ;;  %v4267_v2 = vld [vmem:[%s9268_s13] sm:$0xff]  ;;  %v4268_v58 = vld [vmem:[%s9268_s13 + $0x8] sm:$0xff] }
 0xa2d   :  { %v4190_v3 = vld [vmem:[%s9267_s12] sm:$0xf] }
 0xa2e   :  { %6260 = vmatpush1.bf16.msra.mxu1 %v6259_v6  ;;  %v5145_v6 = vld [vmem:[%s9262_s7 + $0x470] sm:$0xff] }
 0xa2f   :  { %6262 = vmatprep.subr.bf16.mxu1 %v6261_v8  ;;  %v5148_v8 = vld [vmem:[%s9262_s7 + $0x488] sm:$0xff]  ;;  %v6299_v11 = vpack.c.bf16 %v5145_v6, %v5143_v18  ;;  %v4270_v18 = vld [vmem:[%s9268_s13 + $0x18] sm:$0xff] }
 0xa30   :  { %v6301_v12 = vpack.c.bf16 %v5150_v9, %v5148_v8  ;;  %v4271_v8 = vld [vmem:[%s9268_s13 + $0x20] sm:$0xff]  ;;  %v4272_v9 = vld [vmem:[%s9268_s13 + $0x28] sm:$0xff] }
 0xa32   :  { %6264 = vmatpush1.bf16.msra.mxu1 %v6263_v15  ;;  %v5149_v15 = vld [vmem:[%s9262_s7 + $0x490] sm:$0xff] }
 0xa33   :  { %6266 = vmatprep.subr.bf16.mxu1 %v6265_v16  ;;  %v6303_v16 = vpack.c.bf16 %v5149_v15, %v5147_v14  ;;  %v4274_v14 = vld [vmem:[%s9268_s13 + $0x38] sm:$0xff] }
 0xa36   :  { %6268 = vmatpush1.bf16.msra.mxu1 %v6267_v26  ;;  %v6333_v26 = vpack.c.bf16 %v3951_v25, %v3950_v24  ;;  %v4604_v24 = vld [vmem:[%s9270_s15] sm:$0xff]  ;;  %v4605_v25 = vld [vmem:[%s9270_s15 + $0x8] sm:$0xff] }
 0xa37   :  { %6270 = vmatprep.subr.bf16.mxu1 %v6269_v17 }
 0xa38   :  { %6334 = vmatpush1.bf16.msra.mxu0 %v6333_v26  ;;  %v4606_v26 = vld [vmem:[%s9270_s15 + $0x10] sm:$0xff] }
 0xa39   :  { %6335 = vmatprep.subr.bf16.mxu0 %v6567_v13 }
 0xa3a   :  { %6272 = vmatpush1.bf16.msra.mxu1 %v6271_v21 }
 0xa3b   :  { %6274 = vmatprep.subr.bf16.mxu1 %v6273_v30 }
 0xa3e   :  { %6276 = vmatpush1.bf16.msra.mxu1 %v6275_v33  ;;  %v4027_v33 = vld [vmem:[%s9265_s10 + $0x10] sm:$0xff] }
 0xa3f   :  { %3779 = vmatprep.subr.mxu1 %v5121_v57  ;;  %v4029_v57 = vld [vmem:[%s9265_s10 + $0x20] sm:$0xff] }
 0xa40   :  { %v6342_v35 = vpack.c.bf16 %v4030_v34, %v4029_v57  ;;  %v5162_v57 = vld [vmem:[%s9268_s13 + $0x68] sm:$0xff] }
 0xa42   :  { %3780 = vmatpush1.msra.mxu1 %v5120_v40  ;;  %v4034_v40 = vld [vmem:[%s9265_s10 + $0x48] sm:$0xff] }
 0xa43   :  { %5122 = vmatmul.mubr.msk.f32.vlgmr.msra.gmra.mrb[28].mxu1 %vm1085_vm6, %v8573_v19  ;;  %6278 = vmatprep.subr.bf16.mxu1 %v6277_v41  ;;  %v5138_v19 = vld [vmem:[%s9262_s7 + $0x438] sm:$0xff]  ;;  %v6348_v41 = vpack.c.bf16 %v4034_v40, %v4033_v39  ;;  %v5166_v39 = vld [vmem:[%s9268_s13 + $0x88] sm:$0xff] }
 0xa44   :  { %6280 = vmatpush1.bf16.msra.mxu1 %v6279_v42  ;;  %3923 = vmatprep.mubr.f32.mxu1 %v6565_v7  ;;  %v6289_v59 = vpack.c.bf16 %v5138_v19, %v5136_v53  ;;  %v4035_v42 = vld [vmem:[%s9265_s10 + $0x50] sm:$0xff]  ;;  %v4042_v53 = vld [vmem:[%s9265_s10 + $0x88] sm:$0xff] }
 0xa45   :  { %6282 = vmatprep.subr.bf16.mxu1 %v6281_v43  ;;  %v4036_v43 = vld [vmem:[%s9265_s10 + $0x58] sm:$0xff]  ;;  %v6360_v19 = vpack.c.bf16 %v4042_v53, %v4041_v52  ;;  %v5174_v52 = vld [vmem:[%s9268_s13 + $0xc0] sm:$0xff]  ;;  %v5175_v53 = vld [vmem:[%s9268_s13 + $0xc8] sm:$0xff] }
 0xa46   :  { %v6351_v44 = vpack.c.bf16 %v4036_v43, %v4035_v42  ;;  %v5168_v42 = vld [vmem:[%s9268_s13 + $0x98] sm:$0xff] }
 0xa48   :  { %6284 = vmatpush1.bf16.msra.mxu1 %v6283_v47  ;;  %v4039_v47 = vld [vmem:[%s9265_s10 + $0x70] sm:$0xff] }
 0xa49   :  { %6286 = vmatprep.subr.bf16.mxu1 %v6285_v49  ;;  %v4040_v49 = vld [vmem:[%s9265_s10 + $0x78] sm:$0xff] }
 0xa4a   :  { %v6357_v51 = vpack.c.bf16 %v4040_v49, %v4039_v47  ;;  %v5172_v47 = vld [vmem:[%s9268_s13 + $0xb0] sm:$0xff]  ;;  %v5173_v49 = vld [vmem:[%s9268_s13 + $0xb8] sm:$0xff] }
 0xa4c   :  { %6288 = vmatpush1.bf16.msra.mxu1 %v6287_v54  ;;  %v4043_v54 = vld [vmem:[%s9265_s10 + $0x90] sm:$0xff] }
 0xa4d   :  { %6290 = vmatprep.subr.bf16.mxu1 %v6289_v59  ;;  %v4044_v59 = vld [vmem:[%s9265_s10 + $0x98] sm:$0xff] }
 0xa4e   :  { %v6363_v60 = vpack.c.bf16 %v4044_v59, %v4043_v54  ;;  %v5176_v54 = vld [vmem:[%s9268_s13 + $0xd0] sm:$0xff]  ;;  %v5177_v59 = vld [vmem:[%s9268_s13 + $0xd8] sm:$0xff] }
 0xa50   :  { %6292 = vmatpush1.bf16.msra.mxu1 %v6291_v0 }
 0xa51   :  { %6294 = vmatprep.subr.bf16.mxu1 %v6293_v55 }
 0xa54   :  { %6296 = vmatpush1.bf16.msra.mxu1 %v6295_v4  ;;  %v6366_v4 = vpack.c.bf16 %v4268_v58, %v4267_v2  ;;  %v5183_v58 = vld [vmem:[%s9268_s13 + $0x100] sm:$0xff] }
 0xa55   :  { %6298 = vmatprep.subr.bf16.mxu1 %v6297_v5  ;;  %v4269_v5 = vld [vmem:[%s9268_s13 + $0x10] sm:$0xff] }
 0xa56   :  { %v6369_v6 = vpack.c.bf16 %v4270_v18, %v4269_v5  ;;  %v5185_v5 = vld [vmem:[%s9268_s13 + $0x110] sm:$0xff]  ;;  %v5186_v18 = vld [vmem:[%s9268_s13 + $0x118] sm:$0xff] }
 0xa58   :  { %6300 = vmatpush1.bf16.msra.mxu1 %v6299_v11  ;;  %v6372_v11 = vpack.c.bf16 %v4272_v9, %v4271_v8  ;;  %v5187_v8 = vld [vmem:[%s9268_s13 + $0x120] sm:$0xff]  ;;  %v5188_v9 = vld [vmem:[%s9268_s13 + $0x128] sm:$0xff] }
 0xa59   :  { %6302 = vmatprep.subr.bf16.mxu1 %v6301_v12  ;;  %v4273_v12 = vld [vmem:[%s9268_s13 + $0x30] sm:$0xff] }
 0xa5a   :  { %v6375_v15 = vpack.c.bf16 %v4274_v14, %v4273_v12  ;;  %v5189_v12 = vld [vmem:[%s9268_s13 + $0x130] sm:$0xff]  ;;  %v5190_v14 = vld [vmem:[%s9268_s13 + $0x138] sm:$0xff] }
 0xa5c   :  { %6304 = vmatpush1.bf16.msra.mxu1 %v6303_v16  ;;  %v4275_v16 = vld [vmem:[%s9268_s13 + $0x40] sm:$0xff] }
 0xa5d   :  { %3887 = vmatprep.subr.mxu1 %v5152_v22  ;;  %v4276_v22 = vld [vmem:[%s9268_s13 + $0x48] sm:$0xff] }
 0xa60   :  { %3888 = vmatpush1.msra.mxu1 %v5151_v23  ;;  %v6378_v23 = vpack.c.bf16 %v4276_v22, %v4275_v16  ;;  %v4608_v22 = vld [vmem:[%s9270_s15 + $0x20] sm:$0xff] }
 0xa61   :  { %5153 = vmatmul.mubr.msk.f32.vlgmr.msra.gmra.mrb[28].mxu1 %vm1085_vm6, %v8576_v20  ;;  %6425 = vmatprep.subr.bf16.mxu1 %v6567_v13  ;;  %v3381_v20 = vld [vmem:[%s9263_s8] sm:$0x3] }
 0xa62   :  { %5597 = vmatprep.mubr.msk.f32.mxu1 %vm6568_vm11, %v6565_v7  ;;  %v3494_v17 = vrot.slane %v3381_v20, %v7091_v48  ;;  %v3490_v27 = vrot.slane %v3381_v20, %v7096_v50  ;;  %v4028_v48 = vld [vmem:[%s9265_s10 + $0x18] sm:$0xff]  ;;  %v6426_v20 = vpack.c.bf16 %v4605_v25, %v4604_v24  ;;  %v4266_v25 = vld [vmem:[%s9269_s14] sm:$0x1]  ;;  %s6569_s14 = smov [#allocation2]  }
 0xa63   :  { %v6339_v50 = vpack.c.bf16 %v4028_v48, %v4027_v33 }
 0xa64   :  { %6427 = vmatpush3.bf16.msra.mxu1 %v6426_v20 }
 0xa65   :  { %6428 = vmatprep.subr.bf16.mxu1 %v6567_v13 }
 0xb34   :  { %v3925_v29 = vpop.f32.mrb[28].mxu1 }
 0xb35   :  { %v3927_v21 = vpop.f32.mrb[29].mxu1  ;;  %v6449_v32 = vadd.f32 %v3925_v29, %v3490_v27  ;;  %v5159_v29 = vld [vmem:[%s9268_s13 + $0x50] sm:$0xff] }
 0xb36   :  { %v6450_v30 = vadd.f32 %v3927_v21, %v3494_v17  ;;  %v4607_v17 = vld [vmem:[%s9270_s15 + $0x18] sm:$0xff] }
 0xb37   :  { %v6429_v27 = vpack.c.bf16 %v4607_v17, %v4606_v26  ;;  %v5160_v21 = vld [vmem:[%s9268_s13 + $0x58] sm:$0xff] }
 0xb38   :  { %5154 = vmatprep.mubr.msk.f32.mxu0 %vm1633_vm10, %v6450_v30  ;;  %v6381_v33 = vpack.c.bf16 %v5160_v21, %v5159_v29 }
 0xb39   :  { %4020 = vmatmul.mubr.f32.vlgmr.msra.gmra.mrb[30].mxu0 %v6449_v32  ;;  %6430 = vmatpush3.bf16.msra.mxu1 %v6429_v27 }
 0xb3a   :  { %6337 = vmatpush1.bf16.msra.mxu0 %v6336_v31  ;;  %5155 = vmatprep.mubr.msk.f32.mxu0 %vm1633_vm10, %v6450_v30 }
 0xb3b   :  { %6338 = vmatprep.subr.bf16.mxu0 %v6567_v13  ;;  %6431 = vmatprep.subr.bf16.mxu1 %v6567_v13 }
 0xb3e   :  { %6340 = vmatpush1.bf16.msra.mxu0 %v6339_v50  ;;  %v5161_v50 = vld [vmem:[%s9268_s13 + $0x60] sm:$0xff] }
 0xb3f   :  { %6341 = vmatprep.subr.bf16.mxu0 %v6567_v13  ;;  %v6384_v34 = vpack.c.bf16 %v5162_v57, %v5161_v50 }
 0xb42   :  { %6343 = vmatpush1.bf16.msra.mxu0 %v6342_v35  ;;  %v5163_v35 = vld [vmem:[%s9268_s13 + $0x70] sm:$0xff] }
 0xb43   :  { %6344 = vmatprep.subr.bf16.mxu0 %v6567_v13  ;;  %v6387_v37 = vpack.c.bf16 %v5164_v36, %v5163_v35 }
 0xb46   :  { %6346 = vmatpush1.bf16.msra.mxu0 %v6345_v38  ;;  %v5165_v38 = vld [vmem:[%s9268_s13 + $0x80] sm:$0xff] }
 0xb47   :  { %6347 = vmatprep.subr.bf16.mxu0 %v6567_v13  ;;  %v6390_v40 = vpack.c.bf16 %v5166_v39, %v5165_v38 }
 0xb4a   :  { %6349 = vmatpush1.bf16.msra.mxu0 %v6348_v41  ;;  %v5167_v41 = vld [vmem:[%s9268_s13 + $0x90] sm:$0xff] }
 0xb4b   :  { %6350 = vmatprep.subr.bf16.mxu0 %v6567_v13  ;;  %v6393_v43 = vpack.c.bf16 %v5168_v42, %v5167_v41 }
 0xb4e   :  { %6352 = vmatpush1.bf16.msra.mxu0 %v6351_v44  ;;  %v5170_v44 = vld [vmem:[%s9268_s13 + $0xa0] sm:$0xff] }
 0xb4f   :  { %6353 = vmatprep.subr.bf16.mxu0 %v6567_v13  ;;  %v6396_v46 = vpack.c.bf16 %v5171_v45, %v5170_v44 }
 0xb52   :  { %6355 = vmatpush1.bf16.msra.mxu0 %v6354_v56 }
 0xb53   :  { %6356 = vmatprep.subr.bf16.mxu0 %v6567_v13 }
 0xb56   :  { %6358 = vmatpush1.bf16.msra.mxu0 %v6357_v51  ;;  %v6399_v51 = vpack.c.bf16 %v5173_v49, %v5172_v47 }
 0xb57   :  { %6359 = vmatprep.subr.bf16.mxu0 %v6567_v13 }
 0xb5a   :  { %6361 = vmatpush1.bf16.msra.mxu0 %v6360_v19  ;;  %v6402_v19 = vpack.c.bf16 %v5175_v53, %v5174_v52 }
 0xb5b   :  { %6362 = vmatprep.subr.bf16.mxu0 %v6567_v13 }
 0xb5e   :  { %6364 = vmatpush1.bf16.msra.mxu0 %v6363_v60  ;;  %v6405_v60 = vpack.c.bf16 %v5177_v59, %v5176_v54 }
 0xb5f   :  { %5481 = vmatprep.subr.mxu0 %v6565_v7 }
 0xb61   :  { %4110 = vmatmul.mubr.f32.vlgmr.msra.gmra.mrb[32].mxu0 %v6449_v32 }
 0xb62   :  { %5483 = vmatprep.mubr.msk.f32.mxu0 %vm6568_vm11, %v6565_v7 }
 0xc0c   :  { %v4021_v61 = vpop.f32.mrb[30].mxu0 }
 0xc0d   :  { %v4023_v62 = vpop.f32.mrb[31].mxu0 }
 0xc0e   :  { %v5179_v62 = vld [vmem:[%s9268_s13 + $0xe8] sm:$0xff] }
 0xc34   :  { %v4111_v63 = vpop.f32.mrb[32].mxu0 }
 0xc35   :  { %v4115_v0 = vmax.f32 %v4021_v61, %v4111_v63  ;;  %v4113_v55 = vpop.f32.mrb[33].mxu0  ;;  %v5178_v61 = vld [vmem:[%s9268_s13 + $0xe0] sm:$0xff] }
 0xc36   :  { %v6408_v63 = vpack.c.bf16 %v5179_v62, %v5178_v61  ;;  %v5182_v55 = vld [vmem:[%s9268_s13 + $0xf8] sm:$0xff] }
 0xc37   :  { %5482 = vmatpush3.msra.mxu0 %v4115_v0 }
 0xc38   :  { %5484 = vmatmul.mubr.msk.f32.vlgmr.msra.gmra.mrb[34].mxu0 %vm1799_vm12, %v4116_v1  ;;  %5486 = vmatprep.subr.mxu0 %v6565_v7 }
 0xc39   :  { %5487 = vmatpush3.msra.mxu0 %v4115_v0  ;;  %5488 = vmatprep.mubr.msk.f32.mxu0 %vm6568_vm11, %v6565_v7  ;;  %v5181_v0 = vld [vmem:[%s9268_s13 + $0xf0] sm:$0xff] }
 0xc3a   :  { %6365 = vmatprep.subr.bf16.mxu0 %v6567_v13  ;;  %v6411_v1 = vpack.c.bf16 %v5182_v55, %v5181_v0 }
 0xc3c   :  { %5489 = vmatmul.mubr.msk.f32.vlgmr.msra.gmra.mrb[36].mxu0 %vm1799_vm12, %v4190_v3  ;;  %v5184_v3 = vld [vmem:[%s9268_s13 + $0x108] sm:$0xff] }
 0xc3d   :  { %6367 = vmatpush3.bf16.msra.mxu0 %v6366_v4  ;;  %5511 = vmatprep.mubr.msk.f32.mxu0 %vm6568_vm11, %v6565_v7  ;;  %v6414_v4 = vpack.c.bf16 %v5184_v3, %v5183_v58 }
 0xc3e   :  { %6368 = vmatprep.subr.bf16.mxu0 %v6567_v13 }
 0xc41   :  { %6370 = vmatpush3.bf16.msra.mxu0 %v6369_v6  ;;  %v6417_v6 = vpack.c.bf16 %v5186_v18, %v5185_v5 }
 0xc42   :  { %6371 = vmatprep.subr.bf16.mxu0 %v6567_v13 }
 0xc45   :  { %6373 = vmatpush3.bf16.msra.mxu0 %v6372_v11  ;;  %v6420_v11 = vpack.c.bf16 %v5188_v9, %v5187_v8 }
 0xc46   :  { %6374 = vmatprep.subr.bf16.mxu0 %v6567_v13 }
 0xc49   :  { %6376 = vmatpush3.bf16.msra.mxu0 %v6375_v15  ;;  %v6423_v15 = vpack.c.bf16 %v5190_v14, %v5189_v12 }
 0xc4a   :  { %6377 = vmatprep.subr.bf16.mxu0 %v6567_v13 }
 0xc4d   :  { %6379 = vmatpush3.bf16.msra.mxu0 %v6378_v23  ;;  %v4609_v23 = vld [vmem:[%s9270_s15 + $0x28] sm:$0xff] }
 0xc4e   :  { %6380 = vmatprep.subr.bf16.mxu0 %v6567_v13  ;;  %v6432_v24 = vpack.c.bf16 %v4609_v23, %v4608_v22 }
 0xc50   :  { %6433 = vmatpush3.bf16.msra.mxu1 %v6432_v24 }
 0xc51   :  { %5595 = vmatprep.subr.mxu1 %v6565_v7 }
 0xd0b   :  { %v4186_v28 = vpop.f32.mrb[34].mxu0 }
 0xd0c   :  { %v5485_v10 = vpop.f32.mrb[35].mxu0 }
 0xd0f   :  { %v4260_v30 = vpop.f32.mrb[36].mxu0 }
 0xd10   :  { %v4264_v31 = vmax.f32 %v4186_v28, %v4260_v30  ;;  %v5490_v32 = vpop.f32.mrb[37].mxu0 }
 0xd12   :  { %v9108_v48 = vmax.f32 %v4264_v31, 0.0 }
 0xd14   :  { %5512 = vmatmul.mubr.msk.f32.vlgmr.msra.gmra.mrb[38].mxu0 %vm1960_vm13, %v9108_v48  ;;  %v4361_v56 = vrot.slane %v9108_v48, 1  ;;  %v4445_v2 = vrot.slane %v9108_v48, 2  ;;  %v4529_v16 = vrot.slane %v9108_v48, 3 }
 0xd15   :  { %6382 = vmatpush3.bf16.msra.mxu0 %v6381_v33  ;;  %5534 = vmatprep.mubr.msk.f32.mxu0 %vm6568_vm11, %v6565_v7 }
 0xd16   :  { %6383 = vmatprep.subr.bf16.mxu0 %v6567_v13 }
 0xd19   :  { %6385 = vmatpush3.bf16.msra.mxu0 %v6384_v34 }
 0xd1a   :  { %6386 = vmatprep.subr.bf16.mxu0 %v6567_v13 }
 0xd1d   :  { %6388 = vmatpush3.bf16.msra.mxu0 %v6387_v37 }
 0xd1e   :  { %6389 = vmatprep.subr.bf16.mxu0 %v6567_v13 }
 0xd21   :  { %6391 = vmatpush3.bf16.msra.mxu0 %v6390_v40 }
 0xd22   :  { %6392 = vmatprep.subr.bf16.mxu0 %v6567_v13 }
 0xd25   :  { %6394 = vmatpush3.bf16.msra.mxu0 %v6393_v43 }
 0xd26   :  { %6395 = vmatprep.subr.bf16.mxu0 %v6567_v13 }
 0xd28   :  { %5535 = vmatmul.mubr.msk.f32.vlgmr.msra.gmra.mrb[38].mxu0 %vm1960_vm13, %v4361_v56 }
 0xd29   :  { %6397 = vmatpush3.bf16.msra.mxu0 %v6396_v46  ;;  %5557 = vmatprep.mubr.msk.f32.mxu0 %vm6568_vm11, %v6565_v7 }
 0xd2a   :  { %6398 = vmatprep.subr.bf16.mxu0 %v6567_v13 }
 0xd2d   :  { %6400 = vmatpush3.bf16.msra.mxu0 %v6399_v51 }
 0xd2e   :  { %6401 = vmatprep.subr.bf16.mxu0 %v6567_v13 }
 0xd31   :  { %6403 = vmatpush3.bf16.msra.mxu0 %v6402_v19 }
 0xd32   :  { %6404 = vmatprep.subr.bf16.mxu0 %v6567_v13 }
 0xd35   :  { %6406 = vmatpush3.bf16.msra.mxu0 %v6405_v60 }
 0xd36   :  { %6407 = vmatprep.subr.bf16.mxu0 %v6567_v13 }
 0xd39   :  { %6409 = vmatpush3.bf16.msra.mxu0 %v6408_v63 }
 0xd3a   :  { %6410 = vmatprep.subr.bf16.mxu0 %v6567_v13 }
 0xd3c   :  { %5558 = vmatmul.mubr.msk.f32.vlgmr.msra.gmra.mrb[38].mxu0 %vm1960_vm13, %v4445_v2 }
 0xd3d   :  { %6412 = vmatpush3.bf16.msra.mxu0 %v6411_v1  ;;  %5580 = vmatprep.mubr.msk.f32.mxu0 %vm6568_vm11, %v6565_v7  ;;  %v4611_v7 = vld [vmem:[%s9271_s16] sm:$0x1] }
 0xd3e   :  { %6413 = vmatprep.subr.bf16.mxu0 %v6567_v13 }
 0xd41   :  { %6415 = vmatpush3.bf16.msra.mxu0 %v6414_v4 }
 0xd42   :  { %6416 = vmatprep.subr.bf16.mxu0 %v6567_v13 }
 0xd45   :  { %6418 = vmatpush3.bf16.msra.mxu0 %v6417_v6 }
 0xd46   :  { %6419 = vmatprep.subr.bf16.mxu0 %v6567_v13 }
 0xd49   :  { %6421 = vmatpush3.bf16.msra.mxu0 %v6420_v11 }
 0xd4a   :  { %6422 = vmatprep.subr.bf16.mxu0 %v6567_v13  ;;  %v4610_v13 = vld [vmem:[%s9270_s15 + $0x30] sm:$0x3]  ;;  %s4707_s15 = sshll.u32 %s6569_s14, 4  ;;  %s4708_s15 = int_to_ptr.vmem [resolvable:$true] %s4707_s15 }
 0xd4b   :  { %5596 = vmatpush3.msk.msra.mxu1 %vm2303_vm14, %v4610_v13  ;;  %s6541_s16 = scalar_lea.vmem %s4708_s15, 32  ;;  %p6546_p1 = scmp.lt.s32.totalorder %s4708_s15, %s4708_s15 }
 0xd4c   :  { %p6542_p0 = scmp.ne.s32.totalorder %s4708_s15, %s6541_s16  ;;  %p6547_p2 = scmp.lt.s32.totalorder %s6541_s16, %s6541_s16 }
 0xd4d   :  { %6424 = vmatpush3.bf16.msra.mxu0 %v6423_v15 }
 0xd4e   :  { %p6548_p3 = por %p6547_p2, %p6546_p1 }
 0xd50   :  { %5581 = vmatmul.mubr.msk.f32.vlgmr.msra.gmra.mrb[38].mxu0 %vm1960_vm13, %v4529_v16  ;;  %p6549_p4 = pnand %p6548_p3, %p6542_p0 }
 0xe23   :  { %v4598_v26 = vpop.f32.mrb[38].mxu0 }
 0xe24   :  { %v6451_v20 = vadd.f32 %v4598_v26, %v4266_v25  ;;  %v5582_v17 = vpop.f32.mrb[39].mxu0 }
 0xe26   :  { %v4603_v27 = vmax.f32 %v6451_v20, 0.0 }
 0xe28   :  { %5598 = vmatmul.mubr.msk.f32.vlgmr.msra.gmra.mrb[30].mxu1 %vm2299_vm15, %v4603_v27 }
 0xefb   :  { %v4684_v28 = vpop.f32.mrb[30].mxu1 }
 0xefc   :  { %v4685_v10 = vadd.f32 %v4684_v28, %v4611_v7  ;;  %v5599_v29 = vpop.f32.mrb[31].mxu1 }
 0xefe   :  { %v4688_v21 = vsel %vm2377_vm1, %v4685_v10, -inf }
 0xeff   :  { %4689 = vmax.xlane.f32.xlu0 %v4688_v21 }
 0xf8c   :  { %v4690_v30 = vpop.xlane.xlu0 %4689 }
 0xf8d   :  { %v4691_v31 = vsub.f32 %v4685_v10, %v4690_v30 }
 0xf8f   :  { %v4692_v32 = vmul.f32 1.442695, %v4691_v31 }
 0xf91   :  { %6537 = vpow2.f32 %v4692_v32 }
 0xf9b   :  { %v6538_v33 = vpop.eup %6537 }
 0xf9c   :  { %v4694_v48 = vsel %vm2377_vm1, %v6538_v33, 0.0 }
 0xf9d   :  { %4695 = vadd.xlane.f32.xlu1 %v4694_v48 }
0x102a   :  { %v4696_v50 = vpop.xlane.xlu1 %4695 }
0x102b   :  { %6539 = vlog2.f32 %v4696_v50 }
0x1035   :  { %v6540_v57 = vpop.eup %6539 }
0x1036   :  { %v4698_v34 = vmul.f32 0.6931472, %v6540_v57 }
0x1038   :  { %v4699_v35 = vsub.f32 %v4691_v31, %v4698_v34 }
0x103a   :  { %4700 = vst.msk [vmem:[#allocation2 + $0x1] sm:$0x1] %vm2377_vm1, %v4699_v35 }
0x103b   :  { %6552 = shalt.err (!%p6549_p4)
}
0x103c   :  { %s6553_s27 = scalar_lea.hbm %s9272_s17, 32 }
0x103d   :  { %p6554_p5 = scmp.ne.s32.totalorder %s9272_s17, %s6553_s27  ;;  %p6557_p6 = scmp.lt.u32.totalorder %s6553_s27, %s9272_s17 }
0x103f   :  { %p6559_p7 = pnand %p6557_p6, %p6554_p5 }
0x1041   :  { %6562 = shalt.err (!%p6559_p7)
}
0x1042   :  { %4710 = dma.vmem_to_hbm [thread:$0]  %s4708_s15, 32, %s9272_s17, [#allocation3]  }
0x1043   :  { %6563 = dma.done.wait [#allocation3], 32  }
0x1044   :  { %6564 = vsyncadd [#allocation3], 4294967264 }
0x1045   :  { %4714 = vsyncpa [#allocation3], 1 }

</bundles_post_ra>
